<compile_context>
chip_gen: v6e
topology: v6e:2x2x1
jax: 0.10.0
libtpu: 0.0.40
codegen_flags: <defaults>
</compile_context>

<pallas_src>
import functools

import jax
import jax.numpy as jnp
from jax.experimental import pallas as pl
from jax.experimental.pallas import tpu as pltpu

N_CLASSES = 6   # star-shaped generator heads / independent discriminators
NZ = 32         # latent dim
NGF = 16        # base feature width
IMG = 16        # output spatial size (small synthetic scale)


# ------------------------------------------------------------------ kernels --

def _mm_bias_act_kernel(a_ref, b_ref, bias_ref, o_ref, *, act):
    """Fused (M,K)@(K,N) on the MXU + f32 bias + activation epilogue (VPU/EUP)."""
    acc = jnp.dot(a_ref[...], b_ref[...], preferred_element_type=jnp.float32)
    acc = acc + bias_ref[...]
    if act == "relu":
        acc = jnp.maximum(acc, 0.0)
    elif act == "lrelu":
        acc = jnp.where(acc > 0, acc, 0.2 * acc)
    elif act == "tanh":
        acc = jnp.tanh(acc)
    o_ref[...] = acc


def matmul_bias_act(a, b, bias, act="none"):
    """Single-shot whole-array matmul (generator path, shared weights)."""
    M, K = a.shape
    K2, N = b.shape
    assert K == K2
    return pl.pallas_call(
        functools.partial(_mm_bias_act_kernel, act=act),
        out_shape=jax.ShapeDtypeStruct((M, N), jnp.float32),
        in_specs=[pl.BlockSpec(memory_space=pltpu.MemorySpace.VMEM)] * 3,
        out_specs=pl.BlockSpec(memory_space=pltpu.MemorySpace.VMEM),
    )(a, b, bias)


def class_matmul_bias_act(w, p, bias, act="none"):
    """Per-class matmul: grid=(6,) over the independent discriminators.

    w    : [NC, M, K]  (bf16 per-class weights)
    p    : [NC, K, N]  (bf16 per-class im2col patches, N lane-dense)
    bias : [NC, M, 1]  (f32)
    out  : [NC, M, N]  (f32)
    """
    NC, M, K = w.shape
    _, _, N = p.shape
    return pl.pallas_call(
        functools.partial(_mm_bias_act_kernel, act=act),
        out_shape=jax.ShapeDtypeStruct((NC, M, N), jnp.float32),
        grid=(NC,),
        in_specs=[
            pl.BlockSpec((None, M, K), lambda c: (c, 0, 0)),
            pl.BlockSpec((None, K, N), lambda c: (c, 0, 0)),
            pl.BlockSpec((None, M, 1), lambda c: (c, 0, 0)),
        ],
        out_specs=pl.BlockSpec((None, M, N), lambda c: (c, 0, 0)),
        compiler_params=pltpu.CompilerParams(
            dimension_semantics=("parallel",)),
    )(w, p, bias)


def _fc_loss_kernel(h_ref, w_ref, b_ref, dloss_ref, gloss_ref, *, batch):
    """Fused per-class fc (512->1 as a VPU row-reduction) + BCE-with-logits.

    Rows of h are [real (B) | detached fake (B) | gen-pass fake (B)].
    Accumulates the two scalar losses across the class grid axis.
    """
    c = pl.program_id(0)

    @pl.when(c == 0)
    def _():
        dloss_ref[...] = jnp.zeros_like(dloss_ref)
        gloss_ref[...] = jnp.zeros_like(gloss_ref)

    h = h_ref[...]                                   # [3B, 512] f32
    w = w_ref[...]                                   # [1, 512]  f32
    logits = jnp.sum(h * w, axis=-1, keepdims=True) + b_ref[...]   # [3B, 1]

    # numerically stable BCE-with-logits
    sp_pos = jnp.maximum(-logits, 0.0) + jnp.log1p(jnp.exp(-jnp.abs(logits)))  # tgt=1
    sp_neg = jnp.maximum(logits, 0.0) + jnp.log1p(jnp.exp(-jnp.abs(logits)))   # tgt=0

    row = jax.lax.broadcasted_iota(jnp.int32, logits.shape, 0)
    real_s = jnp.sum(jnp.where(row < batch, sp_pos, 0.0), keepdims=True)
    fake_s = jnp.sum(jnp.where((row >= batch) & (row < 2 * batch), sp_neg, 0.0),
                     keepdims=True)
    gen_s = jnp.sum(jnp.where(row >= 2 * batch, sp_pos, 0.0), keepdims=True)

    inv_n = 1.0 / (N_CLASSES * batch)                # mean over 6*B logits
    dloss_ref[...] = dloss_ref[...] + 0.5 * (real_s + fake_s) * inv_n
    gloss_ref[...] = gloss_ref[...] + gen_s * inv_n


def disc_fc_loss(h, w, b, batch):
    """h: [6, 3B, 512] f32; w: [6, 1, 512]; b: [6, 1, 1] -> (disc_loss, gen_loss)."""
    NC, B3, K = h.shape
    dloss, gloss = pl.pallas_call(
        functools.partial(_fc_loss_kernel, batch=batch),
        out_shape=[jax.ShapeDtypeStruct((1, 1), jnp.float32),
                   jax.ShapeDtypeStruct((1, 1), jnp.float32)],
        grid=(NC,),
        in_specs=[
            pl.BlockSpec((None, B3, K), lambda c: (c, 0, 0)),
            pl.BlockSpec((None, 1, K), lambda c: (c, 0, 0)),
            pl.BlockSpec((None, 1, 1), lambda c: (c, 0, 0)),
        ],
        out_specs=[pl.BlockSpec((1, 1), lambda c: (0, 0)),
                   pl.BlockSpec((1, 1), lambda c: (0, 0))],
        compiler_params=pltpu.CompilerParams(
            dimension_semantics=("arbitrary",)),   # class axis is a reduction
    )(h, w, b)
    return dloss[0, 0], gloss[0, 0]


# ------------------------------------------------------------- conv plumbing --
# Transposed im2col: patches are [cin*kh*kw, n*ho*wo] so the conv matmul output
# is [cout, n*ho*wo] (lane-dense along the big batch*spatial axis).

def _shifted_slices(xp, kh, kw, stride, ho, wo):
    cols = []
    for i in range(kh):
        for j in range(kw):
            cols.append(xp[..., i:i + stride * ho:stride, j:j + stride * wo:stride])
    return cols


def im2col_T(x, kh, kw, stride, pad):
    """x: [n, c, h, w] -> patches [c*kh*kw, n*ho*wo], ho, wo."""
    n, c, h, w = x.shape
    ho = (h + 2 * pad - kh) // stride + 1
    wo = (w + 2 * pad - kw) // stride + 1
    xp = jnp.pad(x, ((0, 0), (0, 0), (pad, pad), (pad, pad)))
    cols = _shifted_slices(xp, kh, kw, stride, ho, wo)     # each [n, c, ho, wo]
    p = jnp.stack(cols, axis=0)                            # [kk, n, c, ho, wo]
    p = p.transpose(2, 0, 1, 3, 4).reshape(c * kh * kw, n * ho * wo)
    return p, ho, wo


def im2col_T_classes(x, kh, kw, stride, pad):
    """x: [nc, n, c, h, w] -> patches [nc, c*kh*kw, n*ho*wo], ho, wo."""
    nc, n, c, h, w = x.shape
    ho = (h + 2 * pad - kh) // stride + 1
    wo = (w + 2 * pad - kw) // stride + 1
    xp = jnp.pad(x, ((0, 0), (0, 0), (0, 0), (pad, pad), (pad, pad)))
    cols = _shifted_slices(xp, kh, kw, stride, ho, wo)     # each [nc, n, c, ho, wo]
    p = jnp.stack(cols, axis=0)                            # [kk, nc, n, c, ho, wo]
    p = p.transpose(1, 3, 0, 2, 4, 5).reshape(nc, c * kh * kw, n * ho * wo)
    return p, ho, wo


def upsample2x(x):
    # TODO(synk): could be folded into the patch indexing; kept as cheap glue.
    return jnp.repeat(jnp.repeat(x, 2, axis=2), 2, axis=3)


# ------------------------------------------------------------------- params --

def init_params(key):
    """Deterministic naive init (~ weights_init_naive: N(0, 0.02), zero bias).
    Shapes mirror the PyTorch module layouts."""
    def nrm(k, shape, std=0.02):
        return std * jax.random.normal(k, shape, dtype=jnp.float32)

    keys = iter(jax.random.split(key, 16))
    p = {}
    # --- DCGanGeneratorStarShaped (shared trunk + 6 per-class 2-channel heads)
    p["g_fc_w"] = nrm(next(keys), (NZ, 4 * NGF * 4 * 4))
    p["g_fc_b"] = jnp.zeros((4 * NGF * 4 * 4,), jnp.float32)
    p["g_c1_w"] = nrm(next(keys), (2 * NGF, 4 * NGF, 3, 3))
    p["g_c1_b"] = jnp.zeros((2 * NGF,), jnp.float32)
    p["g_c2_w"] = nrm(next(keys), (NGF, 2 * NGF, 3, 3))
    p["g_c2_b"] = jnp.zeros((NGF,), jnp.float32)
    p["g_head_w"] = nrm(next(keys), (N_CLASSES, 2, NGF, 3, 3))   # c_out = 2
    p["g_head_b"] = jnp.zeros((N_CLASSES, 2), jnp.float32)
    # --- DCGanDiscriminatorInd6Class (6 independent discriminators, c_in = 2)
    p["d_c1_w"] = nrm(next(keys), (N_CLASSES, NGF, 2, 3, 3))
    p["d_c1_b"] = jnp.zeros((N_CLASSES, NGF), jnp.float32)
    p["d_c2_w"] = nrm(next(keys), (N_CLASSES, 2 * NGF, NGF, 3, 3))
    p["d_c2_b"] = jnp.zeros((N_CLASSES, 2 * NGF), jnp.float32)
    p["d_fc_w"] = nrm(next(keys), (N_CLASSES, 2 * NGF * 4 * 4, 1))
    p["d_fc_b"] = jnp.zeros((N_CLASSES, 1), jnp.float32)
    return p


def prepare_params(p):
    """One-time reshape + bf16 cast into kernel-friendly layouts (done outside
    the step, so no per-call cast/reshape glue)."""
    q = {}
    q["g_fc_w"] = p["g_fc_w"].astype(jnp.bfloat16)                         # [32, 1024]
    q["g_fc_b"] = p["g_fc_b"].reshape(1, -1)                               # [1, 1024]
    q["g_c1_w"] = p["g_c1_w"].reshape(2 * NGF, -1).astype(jnp.bfloat16)    # [32, 576]
    q["g_c1_b"] = p["g_c1_b"].reshape(-1, 1)
    q["g_c2_w"] = p["g_c2_w"].reshape(NGF, -1).astype(jnp.bfloat16)        # [16, 288]
    q["g_c2_b"] = p["g_c2_b"].reshape(-1, 1)
    # 6 heads merged into one 12-output-channel conv
    q["g_head_w"] = p["g_head_w"].reshape(N_CLASSES * 2, -1).astype(jnp.bfloat16)  # [12,144]
    q["g_head_b"] = p["g_head_b"].reshape(-1, 1)
    q["d_c1_w"] = p["d_c1_w"].reshape(N_CLASSES, NGF, -1).astype(jnp.bfloat16)     # [6,16,18]
    q["d_c1_b"] = p["d_c1_b"].reshape(N_CLASSES, NGF, 1)
    q["d_c2_w"] = p["d_c2_w"].reshape(N_CLASSES, 2 * NGF, -1).astype(jnp.bfloat16)  # [6,32,144]
    q["d_c2_b"] = p["d_c2_b"].reshape(N_CLASSES, 2 * NGF, 1)
    q["d_fc_w"] = p["d_fc_w"].transpose(0, 2, 1).astype(jnp.float32)       # [6, 1, 512]
    q["d_fc_b"] = p["d_fc_b"].reshape(N_CLASSES, 1, 1)
    return q


# ------------------------------------------------------------------- models --

def generator(q, z_all):
    """z_all: [2B, NZ] -> g_out: [6, 2B, 2, IMG, IMG] (all 6 heads in one conv)."""
    nb = z_all.shape[0]
    h = matmul_bias_act(z_all.astype(jnp.bfloat16), q["g_fc_w"], q["g_fc_b"],
                        act="relu")                                  # [2B, 1024]
    h = h.reshape(nb, 4 * NGF, 4, 4)
    h = upsample2x(h)                                                # 4 -> 8

    p1, ho, wo = im2col_T(h, 3, 3, 1, 1)                             # [576, 2B*64]
    y1 = matmul_bias_act(q["g_c1_w"], p1.astype(jnp.bfloat16),
                         q["g_c1_b"], act="relu")                    # [32, 256]
    h = y1.reshape(2 * NGF, nb, ho, wo).transpose(1, 0, 2, 3)
    h = upsample2x(h)                                                # 8 -> 16

    p2, ho, wo = im2col_T(h, 3, 3, 1, 1)                             # [288, 2B*256]
    y2 = matmul_bias_act(q["g_c2_w"], p2.astype(jnp.bfloat16),
                         q["g_c2_b"], act="relu")                    # [16, 1024]
    h = y2.reshape(NGF, nb, ho, wo).transpose(1, 0, 2, 3)            # [2B,16,16,16]

    p3, ho, wo = im2col_T(h, 3, 3, 1, 1)                             # [144, 2B*256]
    y3 = matmul_bias_act(q["g_head_w"], p3.astype(jnp.bfloat16),
                         q["g_head_b"], act="tanh")                  # [12, 1024]
    return y3.reshape(N_CLASSES, 2, nb, ho, wo).transpose(0, 2, 1, 3, 4)


def disc_losses(q, x_all, batch):
    """x_all: [6, 3B, 2, 16, 16] (rows per class = [real | fake.detach | gen])."""
    nc, b3 = x_all.shape[0], x_all.shape[1]

    p1, ho, wo = im2col_T_classes(x_all, 3, 3, 2, 1)                 # [6, 18, 3B*64]
    y1 = class_matmul_bias_act(q["d_c1_w"], p1.astype(jnp.bfloat16),
                               q["d_c1_b"], act="lrelu")             # [6, 16, 384]
    h = y1.reshape(nc, NGF, b3, ho, wo).transpose(0, 2, 1, 3, 4)     # [6,3B,16,8,8]

    p2, ho, wo = im2col_T_classes(h, 3, 3, 2, 1)                     # [6, 144, 3B*16]
    y2 = class_matmul_bias_act(q["d_c2_w"], p2.astype(jnp.bfloat16),
                               q["d_c2_b"], act="lrelu")             # [6, 32, 96]
    h = (y2.reshape(nc, 2 * NGF, b3, ho, wo)
           .transpose(0, 2, 1, 3, 4)
           .reshape(nc, b3, 2 * NGF * ho * wo))                      # [6, 3B, 512]

    return disc_fc_loss(h, q["d_fc_w"], q["d_fc_b"], batch)


def biogan_star_shaped_forward(q, x, rng):
    """Mirrors BioGanStarShaped.forward(x) -> (disc_loss, gen_loss).

    The two generator passes and three discriminator passes are batched; this
    is numerically identical because no optimizer step is applied in between
    (backward/step are training side effects, see TODOs at top)."""
    batch = x.shape[1]
    k1, k2 = jax.random.split(rng)
    z1 = jax.random.normal(k1, (batch, NZ), dtype=jnp.float32)   # disc-step noise
    z2 = jax.random.normal(k2, (batch, NZ), dtype=jnp.float32)   # gen-step noise

    g_all = generator(q, jnp.concatenate([z1, z2], axis=0))      # [6, 2B, 2, 16, 16]
    g_fake = jax.lax.stop_gradient(g_all[:, :batch])             # .detach()
    g_gen = g_all[:, batch:]

    x_all = jnp.concatenate([x, g_fake, g_gen], axis=1)          # [6, 3B, 2, 16, 16]
    disc_loss, gen_loss = disc_losses(q, x_all, batch)
    # n_disc_iters defaults to 1 => gen_loss computed every call.
    return disc_loss, gen_loss


# --------------------------------------------------------------------- main --

if __name__ == "__main__":
    root = jax.random.PRNGKey(0)
    k_params, k_x, k_fwd = jax.random.split(root, 3)

    params = init_params(k_params)
    q = prepare_params(params)

    # x: [n_classes=6, batch=2, c=2, 16, 16] in tanh range, like the real data
    x = jnp.tanh(jax.random.normal(k_x, (N_CLASSES, 2, 2, IMG, IMG),
                                   dtype=jnp.float32))

    fwd = jax.jit(biogan_star_shaped_forward)
    disc_loss, gen_loss = fwd(q, x, k_fwd)
    jax.block_until_ready((disc_loss, gen_loss))

    assert disc_loss.shape == () and gen_loss.shape == ()
    assert jnp.isfinite(disc_loss) and jnp.isfinite(gen_loss)
    print("KERNEL_OK")
</pallas_src>

<mosaic_0001>
module attributes {stable_mosaic.version = 11 : i64} {
  func.func @_mm_bias_act_kernel(%arg0: memref<4x32xbf16, #tpu.memory_space<vmem>>, %arg1: memref<32x1024xbf16, #tpu.memory_space<vmem>>, %arg2: memref<1x1024xf32, #tpu.memory_space<vmem>>, %arg3: memref<4x1024xf32, #tpu.memory_space<vmem>>) attributes {dimension_semantics = [], scalar_prefetch = 0 : i64, scratch_operands = 0 : i64, tpu.core_type = #tpu.core_type<tc>} {
    %c0 = arith.constant 0 : index
    %c0_0 = arith.constant 0 : index
    %0 = vector.load %arg0[%c0, %c0_0] : memref<4x32xbf16, #tpu.memory_space<vmem>>, vector<4x32xbf16>
    %c0_1 = arith.constant 0 : index
    %c0_2 = arith.constant 0 : index
    %1 = vector.load %arg1[%c0_1, %c0_2] : memref<32x1024xbf16, #tpu.memory_space<vmem>>, vector<32x1024xbf16>
    %cst = arith.constant dense<0.000000e+00> : vector<4x1024xf32>
    %2 = tpu.matmul %0, %1, %cst {dimension_numbers = #tpu.dot_dimension_numbers<[1], [0], [0], [1], [0, 0, 1, 1], [], []>} : vector<4x32xbf16>, vector<32x1024xbf16>, vector<4x1024xf32> -> vector<4x1024xf32>
    %c0_3 = arith.constant 0 : index
    %c0_4 = arith.constant 0 : index
    %3 = vector.load %arg2[%c0_3, %c0_4] : memref<1x1024xf32, #tpu.memory_space<vmem>>, vector<1x1024xf32>
    %4 = vector.broadcast %3 : vector<1x1024xf32> to vector<4x1024xf32>
    %5 = arith.addf %2, %4 : vector<4x1024xf32>
    %cst_5 = arith.constant 0.000000e+00 : f32
    %6 = vector.broadcast %cst_5 : f32 to vector<4x1024xf32>
    %7 = arith.maximumf %5, %6 : vector<4x1024xf32>
    %c0_6 = arith.constant 0 : index
    %c0_7 = arith.constant 0 : index
    %8 = vector.load %arg3[%c0_6, %c0_7] : memref<4x1024xf32, #tpu.memory_space<vmem>>, vector<4x1024xf32>
    tpu.vector_store %arg3[%c0_6, %c0_7], %7 {strides = array<i32>} : memref<4x1024xf32, #tpu.memory_space<vmem>>, vector<4x1024xf32>,
    return
  }
}

module attributes {stable_mosaic.version = 11 : i64} {
  func.func @_mm_bias_act_kernel(%arg0: memref<32x576xbf16, #tpu.memory_space<vmem>>, %arg1: memref<576x256xbf16, #tpu.memory_space<vmem>>, %arg2: memref<32x1xf32, #tpu.memory_space<vmem>>, %arg3: memref<32x256xf32, #tpu.memory_space<vmem>>) attributes {dimension_semantics = [], scalar_prefetch = 0 : i64, scratch_operands = 0 : i64, tpu.core_type = #tpu.core_type<tc>} {
    %c0 = arith.constant 0 : index
    %c0_0 = arith.constant 0 : index
    %0 = vector.load %arg0[%c0, %c0_0] : memref<32x576xbf16, #tpu.memory_space<vmem>>, vector<32x576xbf16>
    %c0_1 = arith.constant 0 : index
    %c0_2 = arith.constant 0 : index
    %1 = vector.load %arg1[%c0_1, %c0_2] : memref<576x256xbf16, #tpu.memory_space<vmem>>, vector<576x256xbf16>
    %cst = arith.constant dense<0.000000e+00> : vector<32x256xf32>
    %2 = tpu.matmul %0, %1, %cst {dimension_numbers = #tpu.dot_dimension_numbers<[1], [0], [0], [1], [0, 0, 1, 1], [], []>} : vector<32x576xbf16>, vector<576x256xbf16>, vector<32x256xf32> -> vector<32x256xf32>
    %c0_3 = arith.constant 0 : index
    %c0_4 = arith.constant 0 : index
    %3 = vector.load %arg2[%c0_3, %c0_4] : memref<32x1xf32, #tpu.memory_space<vmem>>, vector<32x1xf32>
    %4 = vector.broadcast %3 : vector<32x1xf32> to vector<32x256xf32>
    %5 = arith.addf %2, %4 : vector<32x256xf32>
    %cst_5 = arith.constant 0.000000e+00 : f32
    %6 = vector.broadcast %cst_5 : f32 to vector<32x256xf32>
    %7 = arith.maximumf %5, %6 : vector<32x256xf32>
    %c0_6 = arith.constant 0 : index
    %c0_7 = arith.constant 0 : index
    %8 = vector.load %arg3[%c0_6, %c0_7] : memref<32x256xf32, #tpu.memory_space<vmem>>, vector<32x256xf32>
    tpu.vector_store %arg3[%c0_6, %c0_7], %7 {strides = array<i32>} : memref<32x256xf32, #tpu.memory_space<vmem>>, vector<32x256xf32>,
    return
  }
}

module attributes {stable_mosaic.version = 11 : i64} {
  func.func @_mm_bias_act_kernel(%arg0: memref<16x288xbf16, #tpu.memory_space<vmem>>, %arg1: memref<288x1024xbf16, #tpu.memory_space<vmem>>, %arg2: memref<16x1xf32, #tpu.memory_space<vmem>>, %arg3: memref<16x1024xf32, #tpu.memory_space<vmem>>) attributes {dimension_semantics = [], scalar_prefetch = 0 : i64, scratch_operands = 0 : i64, tpu.core_type = #tpu.core_type<tc>} {
    %c0 = arith.constant 0 : index
    %c0_0 = arith.constant 0 : index
    %0 = vector.load %arg0[%c0, %c0_0] : memref<16x288xbf16, #tpu.memory_space<vmem>>, vector<16x288xbf16>
    %c0_1 = arith.constant 0 : index
    %c0_2 = arith.constant 0 : index
    %1 = vector.load %arg1[%c0_1, %c0_2] : memref<288x1024xbf16, #tpu.memory_space<vmem>>, vector<288x1024xbf16>
    %cst = arith.constant dense<0.000000e+00> : vector<16x1024xf32>
    %2 = tpu.matmul %0, %1, %cst {dimension_numbers = #tpu.dot_dimension_numbers<[1], [0], [0], [1], [0, 0, 1, 1], [], []>} : vector<16x288xbf16>, vector<288x1024xbf16>, vector<16x1024xf32> -> vector<16x1024xf32>
    %c0_3 = arith.constant 0 : index
    %c0_4 = arith.constant 0 : index
    %3 = vector.load %arg2[%c0_3, %c0_4] : memref<16x1xf32, #tpu.memory_space<vmem>>, vector<16x1xf32>
    %4 = vector.broadcast %3 : vector<16x1xf32> to vector<16x1024xf32>
    %5 = arith.addf %2, %4 : vector<16x1024xf32>
    %cst_5 = arith.constant 0.000000e+00 : f32
    %6 = vector.broadcast %cst_5 : f32 to vector<16x1024xf32>
    %7 = arith.maximumf %5, %6 : vector<16x1024xf32>
    %c0_6 = arith.constant 0 : index
    %c0_7 = arith.constant 0 : index
    %8 = vector.load %arg3[%c0_6, %c0_7] : memref<16x1024xf32, #tpu.memory_space<vmem>>, vector<16x1024xf32>
    tpu.vector_store %arg3[%c0_6, %c0_7], %7 {strides = array<i32>} : memref<16x1024xf32, #tpu.memory_space<vmem>>, vector<16x1024xf32>,
    return
  }
}

module attributes {stable_mosaic.version = 11 : i64} {
  func.func @_mm_bias_act_kernel(%arg0: memref<12x144xbf16, #tpu.memory_space<vmem>>, %arg1: memref<144x1024xbf16, #tpu.memory_space<vmem>>, %arg2: memref<12x1xf32, #tpu.memory_space<vmem>>, %arg3: memref<12x1024xf32, #tpu.memory_space<vmem>>) attributes {dimension_semantics = [], scalar_prefetch = 0 : i64, scratch_operands = 0 : i64, tpu.core_type = #tpu.core_type<tc>} {
    %c0 = arith.constant 0 : index
    %c0_0 = arith.constant 0 : index
    %0 = vector.load %arg0[%c0, %c0_0] : memref<12x144xbf16, #tpu.memory_space<vmem>>, vector<12x144xbf16>
    %c0_1 = arith.constant 0 : index
    %c0_2 = arith.constant 0 : index
    %1 = vector.load %arg1[%c0_1, %c0_2] : memref<144x1024xbf16, #tpu.memory_space<vmem>>, vector<144x1024xbf16>
    %cst = arith.constant dense<0.000000e+00> : vector<12x1024xf32>
    %2 = tpu.matmul %0, %1, %cst {dimension_numbers = #tpu.dot_dimension_numbers<[1], [0], [0], [1], [0, 0, 1, 1], [], []>} : vector<12x144xbf16>, vector<144x1024xbf16>, vector<12x1024xf32> -> vector<12x1024xf32>
    %c0_3 = arith.constant 0 : index
    %c0_4 = arith.constant 0 : index
    %3 = vector.load %arg2[%c0_3, %c0_4] : memref<12x1xf32, #tpu.memory_space<vmem>>, vector<12x1xf32>
    %4 = vector.broadcast %3 : vector<12x1xf32> to vector<12x1024xf32>
    %5 = arith.addf %2, %4 : vector<12x1024xf32>
    %6 = math.tanh %5 : vector<12x1024xf32>
    %c0_5 = arith.constant 0 : index
    %c0_6 = arith.constant 0 : index
    %7 = vector.load %arg3[%c0_5, %c0_6] : memref<12x1024xf32, #tpu.memory_space<vmem>>, vector<12x1024xf32>
    tpu.vector_store %arg3[%c0_5, %c0_6], %6 {strides = array<i32>} : memref<12x1024xf32, #tpu.memory_space<vmem>>, vector<12x1024xf32>,
    return
  }
}

module attributes {stable_mosaic.version = 11 : i64} {
  func.func @_mm_bias_act_kernel(%arg0: i32, %arg1: memref<1x16x18xbf16, #tpu.memory_space<vmem>>, %arg2: memref<1x18x384xbf16, #tpu.memory_space<vmem>>, %arg3: memref<1x16x1xf32, #tpu.memory_space<vmem>>, %arg4: memref<1x16x384xf32, #tpu.memory_space<vmem>>) attributes {dimension_semantics = [#tpu.dimension_semantics<parallel>], iteration_bounds = array<i64: 6>, scalar_prefetch = 0 : i64, scratch_operands = 0 : i64, tpu.core_type = #tpu.core_type<tc>, window_params = [{transform_indices = @transform_0, window_bounds = array<i64: 1, 16, 18>}, {transform_indices = @transform_1, window_bounds = array<i64: 1, 18, 384>}, {transform_indices = @transform_2, window_bounds = array<i64: 1, 16, 1>}, {transform_indices = @transform_3, window_bounds = array<i64: 1, 16, 384>}]} {
    %c0 = arith.constant 0 : index
    %c0_0 = arith.constant 0 : index
    %c0_1 = arith.constant 0 : index
    %0 = vector.load %arg1[%c0, %c0_0, %c0_1] : memref<1x16x18xbf16, #tpu.memory_space<vmem>>, vector<1x16x18xbf16>
    %1 = vector.shape_cast %0 : vector<1x16x18xbf16> to vector<16x18xbf16>
    %c0_2 = arith.constant 0 : index
    %c0_3 = arith.constant 0 : index
    %c0_4 = arith.constant 0 : index
    %2 = vector.load %arg2[%c0_2, %c0_3, %c0_4] : memref<1x18x384xbf16, #tpu.memory_space<vmem>>, vector<1x18x384xbf16>
    %3 = vector.shape_cast %2 : vector<1x18x384xbf16> to vector<18x384xbf16>
    %cst = arith.constant dense<0.000000e+00> : vector<16x384xf32>
    %4 = tpu.matmul %1, %3, %cst {dimension_numbers = #tpu.dot_dimension_numbers<[1], [0], [0], [1], [0, 0, 1, 1], [], []>} : vector<16x18xbf16>, vector<18x384xbf16>, vector<16x384xf32> -> vector<16x384xf32>
    %c0_5 = arith.constant 0 : index
    %c0_6 = arith.constant 0 : index
    %c0_7 = arith.constant 0 : index
    %5 = vector.load %arg3[%c0_5, %c0_6, %c0_7] : memref<1x16x1xf32, #tpu.memory_space<vmem>>, vector<1x16x1xf32>
    %6 = vector.shape_cast %5 : vector<1x16x1xf32> to vector<16x1xf32>
    %7 = vector.broadcast %6 : vector<16x1xf32> to vector<16x384xf32>
    %8 = arith.addf %4, %7 : vector<16x384xf32>
    %cst_8 = arith.constant 0.000000e+00 : f32
    %9 = vector.broadcast %cst_8 : f32 to vector<16x384xf32>
    %10 = arith.cmpf ogt, %8, %9 : vector<16x384xf32>
    %cst_9 = arith.constant 2.000000e-01 : f32
    %11 = vector.broadcast %cst_9 : f32 to vector<16x384xf32>
    %12 = arith.mulf %11, %8 : vector<16x384xf32>
    %13 = arith.select %10, %8, %12 : vector<16x384xi1>, vector<16x384xf32>
    %c0_10 = arith.constant 0 : index
    %c0_11 = arith.constant 0 : index
    %c0_12 = arith.constant 0 : index
    %14 = vector.load %arg4[%c0_10, %c0_11, %c0_12] : memref<1x16x384xf32, #tpu.memory_space<vmem>>, vector<1x16x384xf32>
    %15 = vector.shape_cast %14 : vector<1x16x384xf32> to vector<16x384xf32>
    %16 = vector.shape_cast %13 : vector<16x384xf32> to vector<1x16x384xf32>
    tpu.vector_store %arg4[%c0_10, %c0_11, %c0_12], %16 {strides = array<i32>} : memref<1x16x384xf32, #tpu.memory_space<vmem>>, vector<1x16x384xf32>,
    return
  }
  func.func @transform_0(%arg0: i32) -> (i32, i32, i32) {
    %c0_i32 = arith.constant 0 : i32
    %c0_i32_0 = arith.constant 0 : i32
    %c0_i32_1 = arith.constant 0 : i32
    return %arg0, %c0_i32, %c0_i32_0 : i32, i32, i32
  }
  func.func @transform_1(%arg0: i32) -> (i32, i32, i32) {
    %c0_i32 = arith.constant 0 : i32
    %c0_i32_0 = arith.constant 0 : i32
    %c0_i32_1 = arith.constant 0 : i32
    return %arg0, %c0_i32, %c0_i32_0 : i32, i32, i32
  }
  func.func @transform_2(%arg0: i32) -> (i32, i32, i32) {
    %c0_i32 = arith.constant 0 : i32
    %c0_i32_0 = arith.constant 0 : i32
    %c0_i32_1 = arith.constant 0 : i32
    return %arg0, %c0_i32, %c0_i32_0 : i32, i32, i32
  }
  func.func @transform_3(%arg0: i32) -> (i32, i32, i32) {
    %c0_i32 = arith.constant 0 : i32
    %c0_i32_0 = arith.constant 0 : i32
    %c0_i32_1 = arith.constant 0 : i32
    return %arg0, %c0_i32, %c0_i32_0 : i32, i32, i32
  }
}

module attributes {stable_mosaic.version = 11 : i64} {
  func.func @_mm_bias_act_kernel(%arg0: i32, %arg1: memref<1x32x144xbf16, #tpu.memory_space<vmem>>, %arg2: memref<1x144x96xbf16, #tpu.memory_space<vmem>>, %arg3: memref<1x32x1xf32, #tpu.memory_space<vmem>>, %arg4: memref<1x32x96xf32, #tpu.memory_space<vmem>>) attributes {dimension_semantics = [#tpu.dimension_semantics<parallel>], iteration_bounds = array<i64: 6>, scalar_prefetch = 0 : i64, scratch_operands = 0 : i64, tpu.core_type = #tpu.core_type<tc>, window_params = [{transform_indices = @transform_0, window_bounds = array<i64: 1, 32, 144>}, {transform_indices = @transform_1, window_bounds = array<i64: 1, 144, 96>}, {transform_indices = @transform_2, window_bounds = array<i64: 1, 32, 1>}, {transform_indices = @transform_3, window_bounds = array<i64: 1, 32, 96>}]} {
    %c0 = arith.constant 0 : index
    %c0_0 = arith.constant 0 : index
    %c0_1 = arith.constant 0 : index
    %0 = vector.load %arg1[%c0, %c0_0, %c0_1] : memref<1x32x144xbf16, #tpu.memory_space<vmem>>, vector<1x32x144xbf16>
    %1 = vector.shape_cast %0 : vector<1x32x144xbf16> to vector<32x144xbf16>
    %c0_2 = arith.constant 0 : index
    %c0_3 = arith.constant 0 : index
    %c0_4 = arith.constant 0 : index
    %2 = vector.load %arg2[%c0_2, %c0_3, %c0_4] : memref<1x144x96xbf16, #tpu.memory_space<vmem>>, vector<1x144x96xbf16>
    %3 = vector.shape_cast %2 : vector<1x144x96xbf16> to vector<144x96xbf16>
    %cst = arith.constant dense<0.000000e+00> : vector<32x96xf32>
    %4 = tpu.matmul %1, %3, %cst {dimension_numbers = #tpu.dot_dimension_numbers<[1], [0], [0], [1], [0, 0, 1, 1], [], []>} : vector<32x144xbf16>, vector<144x96xbf16>, vector<32x96xf32> -> vector<32x96xf32>
    %c0_5 = arith.constant 0 : index
    %c0_6 = arith.constant 0 : index
    %c0_7 = arith.constant 0 : index
    %5 = vector.load %arg3[%c0_5, %c0_6, %c0_7] : memref<1x32x1xf32, #tpu.memory_space<vmem>>, vector<1x32x1xf32>
    %6 = vector.shape_cast %5 : vector<1x32x1xf32> to vector<32x1xf32>
    %7 = vector.broadcast %6 : vector<32x1xf32> to vector<32x96xf32>
    %8 = arith.addf %4, %7 : vector<32x96xf32>
    %cst_8 = arith.constant 0.000000e+00 : f32
    %9 = vector.broadcast %cst_8 : f32 to vector<32x96xf32>
    %10 = arith.cmpf ogt, %8, %9 : vector<32x96xf32>
    %cst_9 = arith.constant 2.000000e-01 : f32
    %11 = vector.broadcast %cst_9 : f32 to vector<32x96xf32>
    %12 = arith.mulf %11, %8 : vector<32x96xf32>
    %13 = arith.select %10, %8, %12 : vector<32x96xi1>, vector<32x96xf32>
    %c0_10 = arith.constant 0 : index
    %c0_11 = arith.constant 0 : index
    %c0_12 = arith.constant 0 : index
    %14 = vector.load %arg4[%c0_10, %c0_11, %c0_12] : memref<1x32x96xf32, #tpu.memory_space<vmem>>, vector<1x32x96xf32>
    %15 = vector.shape_cast %14 : vector<1x32x96xf32> to vector<32x96xf32>
    %16 = vector.shape_cast %13 : vector<32x96xf32> to vector<1x32x96xf32>
    tpu.vector_store %arg4[%c0_10, %c0_11, %c0_12], %16 {strides = array<i32>} : memref<1x32x96xf32, #tpu.memory_space<vmem>>, vector<1x32x96xf32>,
    return
  }
  func.func @transform_0(%arg0: i32) -> (i32, i32, i32) {
    %c0_i32 = arith.constant 0 : i32
    %c0_i32_0 = arith.constant 0 : i32
    %c0_i32_1 = arith.constant 0 : i32
    return %arg0, %c0_i32, %c0_i32_0 : i32, i32, i32
  }
  func.func @transform_1(%arg0: i32) -> (i32, i32, i32) {
    %c0_i32 = arith.constant 0 : i32
    %c0_i32_0 = arith.constant 0 : i32
    %c0_i32_1 = arith.constant 0 : i32
    return %arg0, %c0_i32, %c0_i32_0 : i32, i32, i32
  }
  func.func @transform_2(%arg0: i32) -> (i32, i32, i32) {
    %c0_i32 = arith.constant 0 : i32
    %c0_i32_0 = arith.constant 0 : i32
    %c0_i32_1 = arith.constant 0 : i32
    return %arg0, %c0_i32, %c0_i32_0 : i32, i32, i32
  }
  func.func @transform_3(%arg0: i32) -> (i32, i32, i32) {
    %c0_i32 = arith.constant 0 : i32
    %c0_i32_0 = arith.constant 0 : i32
    %c0_i32_1 = arith.constant 0 : i32
    return %arg0, %c0_i32, %c0_i32_0 : i32, i32, i32
  }
}

module attributes {stable_mosaic.version = 11 : i64} {
  func.func @_fc_loss_kernel(%arg0: i32, %arg1: memref<1x6x512xf32, #tpu.memory_space<vmem>>, %arg2: memref<1x1x512xf32, #tpu.memory_space<vmem>>, %arg3: memref<1x1x1xf32, #tpu.memory_space<vmem>>, %arg4: memref<1x1xf32, #tpu.memory_space<vmem>>, %arg5: memref<1x1xf32, #tpu.memory_space<vmem>>) attributes {dimension_semantics = [#tpu.dimension_semantics<arbitrary>], iteration_bounds = array<i64: 6>, scalar_prefetch = 0 : i64, scratch_operands = 0 : i64, tpu.core_type = #tpu.core_type<tc>, window_params = [{transform_indices = @transform_0, window_bounds = array<i64: 1, 6, 512>}, {transform_indices = @transform_1, window_bounds = array<i64: 1, 1, 512>}, {transform_indices = @transform_2, window_bounds = array<i64: 1, 1, 1>}, {pipeline_mode = #tpu.pipeline_mode<synchronous>, transform_indices = @transform_3, window_bounds = array<i64: 1, 1>}, {pipeline_mode = #tpu.pipeline_mode<synchronous>, transform_indices = @transform_4, window_bounds = array<i64: 1, 1>}]} {
    %c0_i32 = arith.constant 0 : i32
    %0 = arith.cmpi eq, %arg0, %c0_i32 : i32
    %1 = arith.extui %0 : i1 to i32
    %c0_i32_0 = arith.constant 0 : i32
    %2 = arith.cmpi ne, %1, %c0_i32_0 : i32
    scf.if %2 {
      %cst_33 = arith.constant 0.000000e+00 : f32
      %77 = vector.broadcast %cst_33 : f32 to vector<1x1xf32>
      %c0_34 = arith.constant 0 : index
      %c0_35 = arith.constant 0 : index
      %78 = vector.load %arg4[%c0_34, %c0_35] : memref<1x1xf32, #tpu.memory_space<vmem>>, vector<1x1xf32>
      tpu.vector_store %arg4[%c0_34, %c0_35], %77 {strides = array<i32>} : memref<1x1xf32, #tpu.memory_space<vmem>>, vector<1x1xf32>,
      %cst_36 = arith.constant 0.000000e+00 : f32
      %79 = vector.broadcast %cst_36 : f32 to vector<1x1xf32>
      %c0_37 = arith.constant 0 : index
      %c0_38 = arith.constant 0 : index
      %80 = vector.load %arg5[%c0_37, %c0_38] : memref<1x1xf32, #tpu.memory_space<vmem>>, vector<1x1xf32>
      tpu.vector_store %arg5[%c0_37, %c0_38], %79 {strides = array<i32>} : memref<1x1xf32, #tpu.memory_space<vmem>>, vector<1x1xf32>,
    } else {
    }
    %c0 = arith.constant 0 : index
    %c0_1 = arith.constant 0 : index
    %c0_2 = arith.constant 0 : index
    %3 = vector.load %arg1[%c0, %c0_1, %c0_2] : memref<1x6x512xf32, #tpu.memory_space<vmem>>, vector<1x6x512xf32>
    %4 = vector.shape_cast %3 : vector<1x6x512xf32> to vector<6x512xf32>
    %c0_3 = arith.constant 0 : index
    %c0_4 = arith.constant 0 : index
    %c0_5 = arith.constant 0 : index
    %5 = vector.load %arg2[%c0_3, %c0_4, %c0_5] : memref<1x1x512xf32, #tpu.memory_space<vmem>>, vector<1x1x512xf32>
    %6 = vector.shape_cast %5 : vector<1x1x512xf32> to vector<1x512xf32>
    %7 = vector.broadcast %6 : vector<1x512xf32> to vector<6x512xf32>
    %8 = arith.mulf %4, %7 : vector<6x512xf32>
    %cst = arith.constant dense<0.000000e+00> : vector<6xf32>
    %9 = vector.multi_reduction <add>, %8, %cst [1] : vector<6x512xf32> to vector<6xf32>
    %10 = vector.shape_cast %9 : vector<6xf32> to vector<6x1xf32>
    %c0_6 = arith.constant 0 : index
    %c0_7 = arith.constant 0 : index
    %c0_8 = arith.constant 0 : index
    %11 = vector.load %arg3[%c0_6, %c0_7, %c0_8] : memref<1x1x1xf32, #tpu.memory_space<vmem>>, vector<1x1x1xf32>
    %12 = vector.shape_cast %11 : vector<1x1x1xf32> to vector<1x1xf32>
    %13 = vector.broadcast %12 : vector<1x1xf32> to vector<6x1xf32>
    %14 = arith.addf %10, %13 : vector<6x1xf32>
    %cst_9 = arith.constant 0.000000e+00 : f32
    %15 = vector.broadcast %cst_9 : f32 to vector<6x1xf32>
    %16 = arith.subf %15, %14 : vector<6x1xf32>
    %cst_10 = arith.constant 0.000000e+00 : f32
    %17 = vector.broadcast %cst_10 : f32 to vector<6x1xf32>
    %18 = arith.maximumf %16, %17 : vector<6x1xf32>
    %19 = math.absf %14 : vector<6x1xf32>
    %cst_11 = arith.constant 0.000000e+00 : f32
    %20 = vector.broadcast %cst_11 : f32 to vector<6x1xf32>
    %21 = arith.subf %20, %19 : vector<6x1xf32>
    %22 = math.exp %21 : vector<6x1xf32>
    %23 = math.log1p %22 : vector<6x1xf32>
    %24 = arith.addf %18, %23 : vector<6x1xf32>
    %cst_12 = arith.constant 0.000000e+00 : f32
    %25 = vector.broadcast %cst_12 : f32 to vector<6x1xf32>
    %26 = arith.maximumf %14, %25 : vector<6x1xf32>
    %27 = math.absf %14 : vector<6x1xf32>
    %cst_13 = arith.constant 0.000000e+00 : f32
    %28 = vector.broadcast %cst_13 : f32 to vector<6x1xf32>
    %29 = arith.subf %28, %27 : vector<6x1xf32>
    %30 = math.exp %29 : vector<6x1xf32>
    %31 = math.log1p %30 : vector<6x1xf32>
    %32 = arith.addf %26, %31 : vector<6x1xf32>
    %33 = tpu.iota {dimensions = array<i32: 0>} : vector<6x1xi32>
    %c2_i32 = arith.constant 2 : i32
    %34 = vector.broadcast %c2_i32 : i32 to vector<6x1xi32>
    %35 = arith.cmpi slt, %33, %34 : vector<6x1xi32>
    %cst_14 = arith.constant 0.000000e+00 : f32
    %36 = vector.broadcast %cst_14 : f32 to vector<6x1xf32>
    %37 = arith.select %35, %24, %36 : vector<6x1xi1>, vector<6x1xf32>
    %38 = vector.shape_cast %37 : vector<6x1xf32> to vector<1x6x1xf32>
    %cst_15 = arith.constant dense<0.000000e+00> : vector<1xf32>
    %39 = vector.multi_reduction <add>, %38, %cst_15 [1, 2] : vector<1x6x1xf32> to vector<1xf32>
    %40 = vector.shape_cast %39 : vector<1xf32> to vector<1x1x1xf32>
    %41 = vector.extract %40[0, 0, 0] : f32 from vector<1x1x1xf32>
    %42 = vector.broadcast %41 : f32 to vector<1x1xf32>
    %c2_i32_16 = arith.constant 2 : i32
    %43 = vector.broadcast %c2_i32_16 : i32 to vector<6x1xi32>
    %44 = arith.cmpi sge, %33, %43 : vector<6x1xi32>
    %c4_i32 = arith.constant 4 : i32
    %45 = vector.broadcast %c4_i32 : i32 to vector<6x1xi32>
    %46 = arith.cmpi slt, %33, %45 : vector<6x1xi32>
    %47 = arith.andi %44, %46 : vector<6x1xi1>
    %cst_17 = arith.constant 0.000000e+00 : f32
    %48 = vector.broadcast %cst_17 : f32 to vector<6x1xf32>
    %49 = arith.select %47, %32, %48 : vector<6x1xi1>, vector<6x1xf32>
    %50 = vector.shape_cast %49 : vector<6x1xf32> to vector<1x6x1xf32>
    %cst_18 = arith.constant dense<0.000000e+00> : vector<1xf32>
    %51 = vector.multi_reduction <add>, %50, %cst_18 [1, 2] : vector<1x6x1xf32> to vector<1xf32>
    %52 = vector.shape_cast %51 : vector<1xf32> to vector<1x1x1xf32>
    %53 = vector.extract %52[0, 0, 0] : f32 from vector<1x1x1xf32>
    %54 = vector.broadcast %53 : f32 to vector<1x1xf32>
    %c4_i32_19 = arith.constant 4 : i32
    %55 = vector.broadcast %c4_i32_19 : i32 to vector<6x1xi32>
    %56 = arith.cmpi sge, %33, %55 : vector<6x1xi32>
    %cst_20 = arith.constant 0.000000e+00 : f32
    %57 = vector.broadcast %cst_20 : f32 to vector<6x1xf32>
    %58 = arith.select %56, %24, %57 : vector<6x1xi1>, vector<6x1xf32>
    %59 = vector.shape_cast %58 : vector<6x1xf32> to vector<1x6x1xf32>
    %cst_21 = arith.constant dense<0.000000e+00> : vector<1xf32>
    %60 = vector.multi_reduction <add>, %59, %cst_21 [1, 2] : vector<1x6x1xf32> to vector<1xf32>
    %61 = vector.shape_cast %60 : vector<1xf32> to vector<1x1x1xf32>
    %62 = vector.extract %61[0, 0, 0] : f32 from vector<1x1x1xf32>
    %63 = vector.broadcast %62 : f32 to vector<1x1xf32>
    %c0_22 = arith.constant 0 : index
    %c0_23 = arith.constant 0 : index
    %64 = vector.load %arg4[%c0_22, %c0_23] : memref<1x1xf32, #tpu.memory_space<vmem>>, vector<1x1xf32>
    %65 = arith.addf %42, %54 : vector<1x1xf32>
    %cst_24 = arith.constant 5.000000e-01 : f32
    %66 = vector.broadcast %cst_24 : f32 to vector<1x1xf32>
    %67 = arith.mulf %66, %65 : vector<1x1xf32>
    %cst_25 = arith.constant 0.0833333358 : f32
    %68 = vector.broadcast %cst_25 : f32 to vector<1x1xf32>
    %69 = arith.mulf %67, %68 : vector<1x1xf32>
    %70 = arith.addf %64, %69 : vector<1x1xf32>
    %c0_26 = arith.constant 0 : index
    %c0_27 = arith.constant 0 : index
    %71 = vector.load %arg4[%c0_26, %c0_27] : memref<1x1xf32, #tpu.memory_space<vmem>>, vector<1x1xf32>
    tpu.vector_store %arg4[%c0_26, %c0_27], %70 {strides = array<i32>} : memref<1x1xf32, #tpu.memory_space<vmem>>, vector<1x1xf32>,
    %c0_28 = arith.constant 0 : index
    %c0_29 = arith.constant 0 : index
    %72 = vector.load %arg5[%c0_28, %c0_29] : memref<1x1xf32, #tpu.memory_space<vmem>>, vector<1x1xf32>
    %cst_30 = arith.constant 0.0833333358 : f32
    %73 = vector.broadcast %cst_30 : f32 to vector<1x1xf32>
    %74 = arith.mulf %63, %73 : vector<1x1xf32>
    %75 = arith.addf %72, %74 : vector<1x1xf32>
    %c0_31 = arith.constant 0 : index
    %c0_32 = arith.constant 0 : index
    %76 = vector.load %arg5[%c0_31, %c0_32] : memref<1x1xf32, #tpu.memory_space<vmem>>, vector<1x1xf32>
    tpu.vector_store %arg5[%c0_31, %c0_32], %75 {strides = array<i32>} : memref<1x1xf32, #tpu.memory_space<vmem>>, vector<1x1xf32>,
    return
  }
  func.func @transform_0(%arg0: i32) -> (i32, i32, i32) {
    %c0_i32 = arith.constant 0 : i32
    %c0_i32_0 = arith.constant 0 : i32
    %c0_i32_1 = arith.constant 0 : i32
    return %arg0, %c0_i32, %c0_i32_0 : i32, i32, i32
  }
  func.func @transform_1(%arg0: i32) -> (i32, i32, i32) {
    %c0_i32 = arith.constant 0 : i32
    %c0_i32_0 = arith.constant 0 : i32
    %c0_i32_1 = arith.constant 0 : i32
    return %arg0, %c0_i32, %c0_i32_0 : i32, i32, i32
  }
  func.func @transform_2(%arg0: i32) -> (i32, i32, i32) {
    %c0_i32 = arith.constant 0 : i32
    %c0_i32_0 = arith.constant 0 : i32
    %c0_i32_1 = arith.constant 0 : i32
    return %arg0, %c0_i32, %c0_i32_0 : i32, i32, i32
  }
  func.func @transform_3(%arg0: i32) -> (i32, i32) {
    %c0_i32 = arith.constant 0 : i32
    %c0_i32_0 = arith.constant 0 : i32
    %c0_i32_1 = arith.constant 0 : i32
    return %c0_i32, %c0_i32_0 : i32, i32
  }
  func.func @transform_4(%arg0: i32) -> (i32, i32) {
    %c0_i32 = arith.constant 0 : i32
    %c0_i32_0 = arith.constant 0 : i32
    %c0_i32_1 = arith.constant 0 : i32
    return %c0_i32, %c0_i32_0 : i32, i32
  }
}

</mosaic_0001>

<bundles_post_ra>
// kernel: biogan_star_shaped_forward.9
= control target key start
LH: loop header
LB: loop body
LE: loop exit
PB: predicated region body
PF: predicated region fallthrough
CT: control target
= control target key end

     0   :  { %8 = vsyncpa [#allocation3], 0  ;;  %s501_s0 = inlined_call_operand.vmem [shape: bf16[4,32], index: 0, kind: input, shape index: {}]   ;;  %s502_s1 = inlined_call_operand.hbm [shape: bf16[32,1024], index: 1, kind: input, shape index: {}]   ;;  %s503_s2 = inlined_call_operand.hbm [shape: f32[1,1024], index: 2, kind: input, shape index: {}]   ;;  %s504_s3 = inlined_call_operand.vmem [shape: f32[4,1024], index: 3, kind: output, shape index: {}]  }
   0x1   :  { %9 = vsyncpa [#allocation5], 0  ;;  %s451_s12 = smov [#allocation2]  }
   0x2   :  { %s17_s13 = sshll.u32 %s451_s12, 4  ;;  %s18_s13 = int_to_ptr.vmem [resolvable:$true] %s17_s13 }
   0x3   :  { %s415_s14 = scalar_lea.vmem %s18_s13, 2048  ;;  %p420_p1 = scmp.lt.s32.totalorder %s18_s13, %s18_s13 }
   0x4   :  { %p416_p0 = scmp.ne.s32.totalorder %s18_s13, %s415_s14  ;;  %p421_p2 = scmp.lt.s32.totalorder %s415_s14, %s415_s14 }
   0x6   :  { %p422_p3 = por %p421_p2, %p420_p1 }
   0x8   :  { %p423_p4 = pnand %p422_p3, %p416_p0 }
   0xa   :  { %426 = shalt.err (!%p423_p4)
}
   0xb   :  { %s452_s15 = smov 512   ;;  %s453_s16 = smov 32  }
   0xc   :  { %23 = dma.hbm_to_vmem [thread:$0]  %s502_s1, 2048, %s18_s13, [#allocation3], %s452_s15, %s452_s15, %s453_s16  }
   0xd   :  { %s454_s19 = smov [#allocation4]  }
   0xe   :  { %s30_s20 = sshll.u32 %s454_s19, 4  ;;  %s31_s20 = int_to_ptr.vmem [resolvable:$true] %s30_s20 }
   0xf   :  { %s435_s21 = scalar_lea.vmem %s31_s20, 128  ;;  %p440_p6 = scmp.lt.s32.totalorder %s31_s20, %s31_s20 }
  0x10   :  { %p436_p5 = scmp.ne.s32.totalorder %s31_s20, %s435_s21  ;;  %p441_p7 = scmp.lt.s32.totalorder %s435_s21, %s435_s21 }
  0x12   :  { %p442_p8 = por %p441_p7, %p440_p6 }
  0x14   :  { %p443_p9 = pnand %p442_p8, %p436_p5 }
  0x16   :  { %446 = shalt.err (!%p443_p9)
}
  0x17   :  { %33 = dma.hbm_to_vmem [thread:$0]  %s503_s2, 128, %s31_s20, [#allocation5]  }
  0x18   :  { %447 = dma.done.wait [#allocation3], 2048  }
  0x19   :  { %448 = vsyncadd [#allocation3], 4294965248 }
  0x1a   :  { %449 = dma.done.wait [#allocation5], 128  }
  0x1b   :  { %450 = vsyncadd [#allocation5], 4294967168  ;;  %v455_v0 = vmov 0   ;;  %v50_v1 = vld [vmem:[#allocation2 + $0x40] sm:$0xff]  ;;  %v51_v3 = vld [vmem:[#allocation2 + $0x48] sm:$0xff]  ;;  %vm180_vm0 = vcmask 261120   ;;  %v60_v34 = vlaneseq }
  0x1c   :  { %216 = vmatprep.mubr.bf16.mxu0 %v455_v0  ;;  %257 = vmatprep.mubr.bf16.mxu1 %v455_v0  ;;  %v54_v2 = vld [vmem:[#allocation2 + $0x60] sm:$0xff]  ;;  %v55_v5 = vld [vmem:[#allocation2 + $0x68] sm:$0xff]  ;;  %v52_v15 = vld [vmem:[#allocation2 + $0x50] sm:$0xff] }
  0x1d   :  { %v391_v4 = vcombine.high %v50_v1, %v54_v2  ;;  %v390_v6 = vcombine.low %v50_v1, %v54_v2  ;;  %v42_v7 = vld [vmem:[#allocation2] sm:$0xff]  ;;  %v393_v9 = vcombine.high %v51_v3, %v55_v5  ;;  %v392_v10 = vcombine.low %v51_v3, %v55_v5  ;;  %v43_v12 = vld [vmem:[#allocation2 + $0x8] sm:$0xff]  ;;  %v56_v16 = vld [vmem:[#allocation2 + $0x70] sm:$0xff] }
  0x1e   :  { %v46_v8 = vld [vmem:[#allocation2 + $0x20] sm:$0xff]  ;;  %v47_v13 = vld [vmem:[#allocation2 + $0x28] sm:$0xff]  ;;  %v53_v17 = vld [vmem:[#allocation2 + $0x58] sm:$0xff]  ;;  %v395_v21 = vcombine.high %v52_v15, %v56_v16  ;;  %v394_v28 = vcombine.low %v52_v15, %v56_v16  ;;  %v61_v35 = vshrl.u32 %v60_v34, 7 }
  0x1f   :  { %v383_v11 = vcombine.high %v42_v7, %v46_v8  ;;  %196 = vmatprep.subr.bf16.mxu0 %v391_v4  ;;  %v385_v14 = vcombine.high %v43_v12, %v47_v13  ;;  %237 = vmatprep.subr.bf16.mxu1 %v393_v9  ;;  %v382_v18 = vcombine.low %v42_v7, %v46_v8  ;;  %v57_v19 = vld [vmem:[#allocation2 + $0x78] sm:$0xff]  ;;  %v44_v23 = vld [vmem:[#allocation2 + $0x10] sm:$0xff]  ;;  %v41_v27 = vld [vmem:[%s501_s0] sm:$0x3] }
  0x20   :  { %197 = vmatpush1.bf16.msra.mxu0 %v390_v6  ;;  %238 = vmatpush1.bf16.msra.mxu1 %v392_v10  ;;  %v384_v20 = vcombine.low %v43_v12, %v47_v13  ;;  %v397_v22 = vcombine.high %v53_v17, %v57_v19  ;;  %v48_v24 = vld [vmem:[#allocation2 + $0x30] sm:$0xff]  ;;  %v45_v25 = vld [vmem:[#allocation2 + $0x18] sm:$0xff]  ;;  %v396_v29 = vcombine.low %v53_v17, %v57_v19  ;;  %v62_v36 = vsub.s32 0, %v61_v35  ;;  %v58_v37 = vld [vmem:[#allocation4] sm:$0xff] }
  0x21   :  { %198 = vmatprep.subr.bf16.mxu0 %v383_v11  ;;  %239 = vmatprep.subr.bf16.mxu1 %v385_v14  ;;  %v49_v26 = vld [vmem:[#allocation2 + $0x38] sm:$0xff]  ;;  %v387_v30 = vcombine.high %v44_v23, %v48_v24  ;;  %v386_v32 = vcombine.low %v44_v23, %v48_v24  ;;  %v70_v38 = vsub.s32 2, %v61_v35  ;;  %v66_v39 = vsub.s32 1, %v61_v35 }
  0x22   :  { %v389_v31 = vcombine.high %v45_v25, %v49_v26  ;;  %v388_v33 = vcombine.low %v45_v25, %v49_v26  ;;  %v74_v40 = vsub.s32 3, %v61_v35  ;;  %v63_v41 = vrot.slane %v58_v37, %v62_v36 }
  0x23   :  { %v71_v42 = vrot.slane %v58_v37, %v70_v38  ;;  %v67_v43 = vrot.slane %v58_v37, %v66_v39  ;;  %v78_v48 = vsub.s32 4, %v61_v35  ;;  %v86_v51 = vsub.s32 6, %v61_v35 }
  0x24   :  { %199 = vmatpush1.bf16.msra.mxu0 %v382_v18  ;;  %240 = vmatpush1.bf16.msra.mxu1 %v384_v20  ;;  %v75_v45 = vrot.slane %v58_v37, %v74_v40  ;;  %v82_v54 = vsub.s32 5, %v61_v35  ;;  %v90_v57 = vsub.s32 7, %v61_v35 }
  0x25   :  { %278 = vmatprep.subr.bf16.mxu0 %v395_v21  ;;  %319 = vmatprep.subr.bf16.mxu1 %v397_v22  ;;  %v79_v61 = vrot.slane %v58_v37, %v78_v48  ;;  %v87_v1 = vrot.slane %v58_v37, %v86_v51 }
  0x26   :  { %v83_v4 = vrot.slane %v58_v37, %v82_v54  ;;  %v91_v7 = vrot.slane %v58_v37, %v90_v57 }
  0x27   :  { %398 = vmatmul.mubr.msk.bf16.vlgmr.msra.gmra.mxu0 %vm180_vm0, %v41_v27  ;;  %399 = vmatmul.mubr.msk.bf16.vlgmr.msra.gmra.mxu1 %vm180_vm0, %v41_v27 }
  0x28   :  { %279 = vmatpush1.bf16.msra.mxu0 %v394_v28  ;;  %320 = vmatpush1.bf16.msra.mxu1 %v396_v29 }
  0x29   :  { %280 = vmatprep.subr.bf16.mxu0 %v387_v30  ;;  %321 = vmatprep.subr.bf16.mxu1 %v389_v31 }
  0x2a   :  { %298 = vmatprep.mubr.bf16.mxu0 %v455_v0  ;;  %339 = vmatprep.mubr.bf16.mxu1 %v455_v0 }
  0x2c   :  { %281 = vmatpush1.bf16.msra.mxu0 %v386_v32  ;;  %322 = vmatpush1.bf16.msra.mxu1 %v388_v33 }
  0x2f   :  { %400 = vmatmul.mubr.msk.bf16.vlgmr.msra.gmra.mxu0 %vm180_vm0, %v41_v27  ;;  %401 = vmatmul.mubr.msk.bf16.vlgmr.msra.gmra.mxu1 %vm180_vm0, %v41_v27 }
  0xe7   :  { %v218_v44 = vpop.f32.mrf.mxu0  ;;  %v259_v47 = vpop.f32.mrf.mxu1 }
  0xe8   :  { %v219_v46 = vadd.f32 %v218_v44, %v63_v41  ;;  %v260_v49 = vadd.f32 %v259_v47, %v71_v42 }
  0xe9   :  { %v220_v50 = vpop.f32.mrf.mxu0  ;;  %v261_v53 = vpop.f32.mrf.mxu1 }
  0xea   :  { %v221_v52 = vadd.f32 %v220_v50, %v67_v43  ;;  %v262_v55 = vadd.f32 %v261_v53, %v75_v45  ;;  %v348_v58 = vmax.f32 %v219_v46, 0.0  ;;  %v350_v62 = vmax.f32 %v260_v49, 0.0 }
  0xeb   :  { %v222_v56 = vpop.f32.mrf.mxu0  ;;  %v263_v60 = vpop.f32.mrf.mxu1 }
  0xec   :  { %v349_v59 = vmax.f32 %v221_v52, 0.0  ;;  %v351_v63 = vmax.f32 %v262_v55, 0.0 }
  0xed   :  { %v223_v0 = vpop.f32.mrf.mxu0  ;;  %v264_v3 = vpop.f32.mrf.mxu1 }
  0xee   :  { %v364_v2 = vcombine.low %v348_v58, %v349_v59  ;;  %v365_v5 = vcombine.low %v350_v62, %v351_v63 }
  0xef   :  { %v300_v6 = vpop.f32.mrf.mxu0  ;;  %v341_v9 = vpop.f32.mrf.mxu1 }
  0xf0   :  { %372 = vst [vmem:[%s504_s3] sm:$0xff] %v364_v2  ;;  %v301_v8 = vadd.f32 %v300_v6, %v79_v61  ;;  %373 = vst [vmem:[%s504_s3 + $0x8] sm:$0xff] %v365_v5  ;;  %v342_v10 = vadd.f32 %v341_v9, %v87_v1 }
  0xf1   :  { %v302_v11 = vpop.f32.mrf.mxu0  ;;  %v343_v13 = vpop.f32.mrf.mxu1 }
  0xf2   :  { %v303_v12 = vadd.f32 %v302_v11, %v83_v4  ;;  %v344_v14 = vadd.f32 %v343_v13, %v91_v7  ;;  %v352_v16 = vmax.f32 %v301_v8, 0.0  ;;  %v354_v19 = vmax.f32 %v342_v10, 0.0 }
  0xf3   :  { %v304_v15 = vpop.f32.mrf.mxu0  ;;  %v345_v18 = vpop.f32.mrf.mxu1 }
  0xf4   :  { %v353_v17 = vmax.f32 %v303_v12, 0.0  ;;  %v355_v20 = vmax.f32 %v344_v14, 0.0 }
  0xf5   :  { %v305_v21 = vpop.f32.mrf.mxu0  ;;  %v346_v23 = vpop.f32.mrf.mxu1 }
  0xf6   :  { %v366_v22 = vcombine.low %v352_v16, %v353_v17  ;;  %v367_v24 = vcombine.low %v354_v19, %v355_v20 }
  0xf8   :  { %374 = vst [vmem:[%s504_s3 + $0x10] sm:$0xff] %v366_v22  ;;  %375 = vst [vmem:[%s504_s3 + $0x18] sm:$0xff] %v367_v24 }
  0xf9   :  { %380 = vsyncpa [#allocation3], 1 }
  0xfa   :  { %381 = vsyncpa [#allocation5], 1 }

// kernel: biogan_star_shaped_forward.10
= control target key start
LH: loop header
LB: loop body
LE: loop exit
PB: predicated region body
PF: predicated region fallthrough
CT: control target
= control target key end

     0   :  { %v936_v1 = vmov 0   ;;  %vm533_vm0 = vcmask 523264   ;;  %s1243_s1 = inlined_call_operand.vmem [shape: bf16[576,256], index: 1, kind: input, shape index: {}]   ;;  %s1244_s0 = inlined_call_operand.vmem [shape: bf16[32,576], index: 0, kind: input, shape index: {}]   ;;  %s1245_s2 = inlined_call_operand.vmem [shape: f32[32,1], index: 2, kind: input, shape index: {}]   ;;  %s1246_s3 = inlined_call_operand.vmem [shape: f32[32,256], index: 3, kind: output, shape index: {}]  }
   0x1   :  { %v814_v0 = vld [vmem:[%s1243_s1 + $0x74] ss:$8 sps:$4 sm:$0xff]   ;;  %812 = vset.pattern.permute.xlu0 %v936_v1  ;;  %813 = vset.pattern.permute.xlu1 %v936_v1  ;;  %v818_v3 = vld [vmem:[%s1243_s1 + $0x70] ss:$8 sps:$4 sm:$0xff]   ;;  %v820_v5 = vld [vmem:[%s1243_s1 + $0x64] ss:$8 sps:$4 sm:$0xff]  }
   0x2   :  { %v816_v2 = vld [vmem:[%s1243_s1 + $0x174] ss:$8 sps:$4 sm:$0xff]   ;;  %540 = vmatprep.subr.bf16.mxu0 %v814_v0  ;;  %v819_v4 = vld [vmem:[%s1243_s1 + $0x170] ss:$8 sps:$4 sm:$0xff]   ;;  %v822_v6 = vld [vmem:[%s1243_s1 + $0x164] ss:$8 sps:$4 sm:$0xff]  }
   0x3   :  { %593 = vmatprep.subr.bf16.mxu1 %v816_v2  ;;  %541 = vmatpush1.bf16.msra.mxu0 %v818_v3  ;;  %v824_v7 = vld [vmem:[%s1243_s1 + $0x60] ss:$8 sps:$4 sm:$0xff]   ;;  %v826_v9 = vld [vmem:[%s1243_s1 + $0x54] ss:$8 sps:$4 sm:$0xff]   ;;  %v830_v11 = vld [vmem:[%s1243_s1 + $0x50] ss:$8 sps:$4 sm:$0xff]  }
   0x4   :  { %594 = vmatpush1.bf16.msra.mxu1 %v819_v4  ;;  %542 = vmatprep.subr.bf16.mxu0 %v820_v5  ;;  %v825_v8 = vld [vmem:[%s1243_s1 + $0x160] ss:$8 sps:$4 sm:$0xff]   ;;  %v828_v10 = vld [vmem:[%s1243_s1 + $0x154] ss:$8 sps:$4 sm:$0xff]   ;;  %v831_v12 = vld [vmem:[%s1243_s1 + $0x150] ss:$8 sps:$4 sm:$0xff]  }
   0x5   :  { %595 = vmatprep.subr.bf16.mxu1 %v822_v6  ;;  %v832_v13 = vld [vmem:[%s1243_s1 + $0x44] ss:$8 sps:$4 sm:$0xff]   ;;  %v836_v15 = vld [vmem:[%s1243_s1 + $0x40] ss:$8 sps:$4 sm:$0xff]   ;;  %v838_v17 = vld [vmem:[%s1243_s1 + $0x34] ss:$8 sps:$4 sm:$0xff]  }
   0x6   :  { %v834_v14 = vld [vmem:[%s1243_s1 + $0x144] ss:$8 sps:$4 sm:$0xff]   ;;  %v837_v16 = vld [vmem:[%s1243_s1 + $0x140] ss:$8 sps:$4 sm:$0xff]   ;;  %v840_v18 = vld [vmem:[%s1243_s1 + $0x134] ss:$8 sps:$4 sm:$0xff]  }
   0x7   :  { %543 = vmatpush1.bf16.msra.mxu0 %v824_v7  ;;  %v842_v19 = vld [vmem:[%s1243_s1 + $0x30] ss:$8 sps:$4 sm:$0xff]   ;;  %v844_v21 = vld [vmem:[%s1243_s1 + $0x24] ss:$8 sps:$4 sm:$0xff]   ;;  %v848_v23 = vld [vmem:[%s1243_s1 + $0x20] ss:$8 sps:$4 sm:$0xff]  }
   0x8   :  { %596 = vmatpush1.bf16.msra.mxu1 %v825_v8  ;;  %544 = vmatprep.subr.bf16.mxu0 %v826_v9  ;;  %v843_v20 = vld [vmem:[%s1243_s1 + $0x130] ss:$8 sps:$4 sm:$0xff]   ;;  %v846_v22 = vld [vmem:[%s1243_s1 + $0x124] ss:$8 sps:$4 sm:$0xff]   ;;  %v849_v24 = vld [vmem:[%s1243_s1 + $0x120] ss:$8 sps:$4 sm:$0xff]  }
   0x9   :  { %597 = vmatprep.subr.bf16.mxu1 %v828_v10  ;;  %v850_v25 = vld [vmem:[%s1243_s1 + $0x14] ss:$8 sps:$4 sm:$0xff]   ;;  %v854_v27 = vld [vmem:[%s1243_s1 + $0x10] ss:$8 sps:$4 sm:$0xff]   ;;  %v856_v29 = vld [vmem:[%s1243_s1 + $0x4] ss:$8 sps:$4 sm:$0xff]  }
   0xa   :  { %v852_v26 = vld [vmem:[%s1243_s1 + $0x114] ss:$8 sps:$4 sm:$0xff]   ;;  %v855_v28 = vld [vmem:[%s1243_s1 + $0x110] ss:$8 sps:$4 sm:$0xff]   ;;  %v858_v30 = vld [vmem:[%s1243_s1 + $0x104] ss:$8 sps:$4 sm:$0xff]  }
   0xb   :  { %545 = vmatpush1.bf16.msra.mxu0 %v830_v11  ;;  %v860_v31 = vld [vmem:[%s1243_s1] ss:$8 sps:$4 sm:$0xff]   ;;  %v862_v33 = vld [vmem:[%s1243_s1 + $0xf4] ss:$8 sps:$4 sm:$0xff]   ;;  %v866_v35 = vld [vmem:[%s1243_s1 + $0xf0] ss:$8 sps:$4 sm:$0xff]  }
   0xc   :  { %598 = vmatpush1.bf16.msra.mxu1 %v831_v12  ;;  %546 = vmatprep.subr.bf16.mxu0 %v832_v13  ;;  %v861_v32 = vld [vmem:[%s1243_s1 + $0x100] ss:$8 sps:$4 sm:$0xff]   ;;  %v864_v34 = vld [vmem:[%s1243_s1 + $0x1f4] ss:$8 sps:$4 sm:$0xff]   ;;  %v867_v36 = vld [vmem:[%s1243_s1 + $0x1f0] ss:$8 sps:$4 sm:$0xff]  }
   0xd   :  { %599 = vmatprep.subr.bf16.mxu1 %v834_v14  ;;  %v868_v37 = vld [vmem:[%s1243_s1 + $0xe4] ss:$8 sps:$4 sm:$0xff]   ;;  %v872_v39 = vld [vmem:[%s1243_s1 + $0xe0] ss:$8 sps:$4 sm:$0xff]   ;;  %v874_v41 = vld [vmem:[%s1243_s1 + $0xd4] ss:$8 sps:$4 sm:$0xff]  }
   0xe   :  { %v870_v38 = vld [vmem:[%s1243_s1 + $0x1e4] ss:$8 sps:$4 sm:$0xff]   ;;  %v873_v40 = vld [vmem:[%s1243_s1 + $0x1e0] ss:$8 sps:$4 sm:$0xff]   ;;  %v876_v42 = vld [vmem:[%s1243_s1 + $0x1d4] ss:$8 sps:$4 sm:$0xff]  }
   0xf   :  { %547 = vmatpush1.bf16.msra.mxu0 %v836_v15  ;;  %v878_v43 = vld [vmem:[%s1243_s1 + $0xd0] ss:$8 sps:$4 sm:$0xff]   ;;  %v880_v45 = vld [vmem:[%s1243_s1 + $0xc4] ss:$8 sps:$4 sm:$0xff]   ;;  %v884_v47 = vld [vmem:[%s1243_s1 + $0xc0] ss:$8 sps:$4 sm:$0xff]  }
  0x10   :  { %600 = vmatpush1.bf16.msra.mxu1 %v837_v16  ;;  %548 = vmatprep.subr.bf16.mxu0 %v838_v17  ;;  %v879_v44 = vld [vmem:[%s1243_s1 + $0x1d0] ss:$8 sps:$4 sm:$0xff]   ;;  %v882_v46 = vld [vmem:[%s1243_s1 + $0x1c4] ss:$8 sps:$4 sm:$0xff]   ;;  %v885_v48 = vld [vmem:[%s1243_s1 + $0x1c0] ss:$8 sps:$4 sm:$0xff]  }
  0x11   :  { %601 = vmatprep.subr.bf16.mxu1 %v840_v18  ;;  %v886_v49 = vld [vmem:[%s1243_s1 + $0xb4] ss:$8 sps:$4 sm:$0xff]   ;;  %v912_v50 = vld [vmem:[%s1244_s0 + $0x4] ss:$20 sps:$4 sm:$0xff]   ;;  %v915_v52 = vld [vmem:[%s1244_s0 + $0xc] ss:$20 sps:$4 sm:$0xff]  }
  0x12   :  { %v888_v51 = vld [vmem:[%s1243_s1 + $0x1b4] ss:$8 sps:$4 sm:$0xff]   ;;  %572 = vmatprep.mubr.bf16.mxu0 %v912_v50  ;;  %v890_v53 = vld [vmem:[%s1243_s1 + $0xb0] ss:$8 sps:$4 sm:$0xff]   ;;  %625 = vmatprep.mubr.bf16.mxu1 %v915_v52  ;;  %v892_v55 = vld [vmem:[%s1243_s1 + $0xa4] ss:$8 sps:$4 sm:$0xff]  }
  0x13   :  { %549 = vmatpush1.bf16.msra.mxu0 %v842_v19  ;;  %v891_v54 = vld [vmem:[%s1243_s1 + $0x1b0] ss:$8 sps:$4 sm:$0xff]   ;;  %v894_v56 = vld [vmem:[%s1243_s1 + $0x1a4] ss:$8 sps:$4 sm:$0xff]   ;;  %v896_v57 = vld [vmem:[%s1243_s1 + $0xa0] ss:$8 sps:$4 sm:$0xff]  }
  0x14   :  { %602 = vmatpush1.bf16.msra.mxu1 %v843_v20  ;;  %550 = vmatprep.subr.bf16.mxu0 %v844_v21  ;;  %v897_v58 = vld [vmem:[%s1243_s1 + $0x1a0] ss:$8 sps:$4 sm:$0xff]   ;;  %v898_v59 = vld [vmem:[%s1243_s1 + $0x94] ss:$8 sps:$4 sm:$0xff]   ;;  %v902_v62 = vld [vmem:[%s1243_s1 + $0x90] ss:$8 sps:$4 sm:$0xff]  }
  0x15   :  { %603 = vmatprep.subr.bf16.mxu1 %v846_v22  ;;  %v900_v60 = vld [vmem:[%s1243_s1 + $0x194] ss:$8 sps:$4 sm:$0xff]   ;;  %v99_v61 = vld [vmem:[%s1245_s2] sm:$0xff]  ;;  %v903_v63 = vld [vmem:[%s1243_s1 + $0x190] ss:$8 sps:$4 sm:$0xff]  }
  0x16   :  { %v101_v0 = vld [vmem:[%s1245_s2 + $0x10] sm:$0xff]  ;;  %v904_v2 = vld [vmem:[%s1243_s1 + $0x84] ss:$8 sps:$4 sm:$0xff]   ;;  %105 = vperm.xlu0 %812, %v99_v61   ;;  %v102_v5 = vld [vmem:[%s1245_s2 + $0x18] sm:$0xff] }
  0x17   :  { %551 = vmatpush1.bf16.msra.mxu0 %v848_v23  ;;  %v906_v3 = vld [vmem:[%s1243_s1 + $0x184] ss:$8 sps:$4 sm:$0xff]   ;;  %115 = vperm.xlu1 %813, %v101_v0   ;;  %v908_v6 = vld [vmem:[%s1243_s1 + $0x80] ss:$8 sps:$4 sm:$0xff]   ;;  %v918_v8 = vld [vmem:[%s1243_s1 + $0x234] ss:$8 sps:$4 sm:$0xff]  }
  0x18   :  { %604 = vmatpush1.bf16.msra.mxu1 %v849_v24  ;;  %552 = vmatprep.subr.bf16.mxu0 %v850_v25  ;;  %v100_v4 = vld [vmem:[%s1245_s2 + $0x8] sm:$0xff]  ;;  %v910_v9 = vld [vmem:[%s1244_s0] ss:$20 sps:$4 sm:$0xff]   ;;  %v916_v11 = vld [vmem:[%s1243_s1 + $0x230] ss:$8 sps:$4 sm:$0xff]  }
  0x19   :  { %605 = vmatprep.subr.bf16.mxu1 %v852_v26  ;;  %v909_v7 = vld [vmem:[%s1243_s1 + $0x180] ss:$8 sps:$4 sm:$0xff]   ;;  %v921_v12 = vld [vmem:[%s1243_s1 + $0x224] ss:$8 sps:$4 sm:$0xff]   ;;  %v930_v16 = vld [vmem:[%s1243_s1 + $0x214] ss:$8 sps:$4 sm:$0xff]  }
  0x1a   :  { %110 = vperm.xlu0 %812, %v100_v4   ;;  %v913_v10 = vld [vmem:[%s1244_s0 + $0x8] ss:$20 sps:$4 sm:$0xff]   ;;  %v922_v13 = vld [vmem:[%s1244_s0 + $0x2c] ss:$20 sps:$4 sm:$0xff]   ;;  %v927_v18 = vld [vmem:[%s1244_s0 + $0x30] ss:$20 sps:$4 sm:$0xff]  }
  0x1b   :  { %553 = vmatpush1.bf16.msra.mxu0 %v854_v27  ;;  %120 = vperm.xlu1 %813, %v102_v5   ;;  %v924_v14 = vld [vmem:[%s1244_s0 + $0x34] ss:$20 sps:$4 sm:$0xff]   ;;  %v928_v19 = vld [vmem:[%s1243_s1 + $0x210] ss:$8 sps:$4 sm:$0xff]   ;;  %v933_v20 = vld [vmem:[%s1243_s1 + $0x204] ss:$8 sps:$4 sm:$0xff]  }
  0x1c   :  { %606 = vmatpush1.bf16.msra.mxu1 %v855_v28  ;;  %554 = vmatprep.subr.bf16.mxu0 %v856_v29  ;;  %v919_v15 = vld [vmem:[%s1243_s1 + $0x220] ss:$8 sps:$4 sm:$0xff]   ;;  %v934_v22 = vld [vmem:[%s1244_s0 + $0x10] ss:$20 sps:$4 sm:$0xff]   ;;  %v935_v23 = vld [vmem:[%s1244_s0 + $0x38] ss:$20 sps:$4 sm:$0xff]  }
  0x1d   :  { %607 = vmatprep.subr.bf16.mxu1 %v858_v30  ;;  %v926_v17 = vld [vmem:[%s1244_s0 + $0x28] ss:$20 sps:$4 sm:$0xff]  }
  0x1e   :  { %v931_v21 = vld [vmem:[%s1243_s1 + $0x200] ss:$8 sps:$4 sm:$0xff]  }
  0x1f   :  { %555 = vmatpush1.bf16.msra.mxu0 %v860_v31 }
  0x20   :  { %608 = vmatpush1.bf16.msra.mxu1 %v861_v32  ;;  %556 = vmatprep.subr.bf16.mxu0 %v862_v33 }
  0x21   :  { %609 = vmatprep.subr.bf16.mxu1 %v864_v34 }
  0x23   :  { %557 = vmatpush2.bf16.msra.mxu0 %v866_v35 }
  0x24   :  { %610 = vmatpush2.bf16.msra.mxu1 %v867_v36  ;;  %558 = vmatprep.subr.bf16.mxu0 %v868_v37 }
  0x25   :  { %611 = vmatprep.subr.bf16.mxu1 %v870_v38 }
  0x27   :  { %559 = vmatpush2.bf16.msra.mxu0 %v872_v39 }
  0x28   :  { %612 = vmatpush2.bf16.msra.mxu1 %v873_v40  ;;  %560 = vmatprep.subr.bf16.mxu0 %v874_v41 }
  0x29   :  { %613 = vmatprep.subr.bf16.mxu1 %v876_v42 }
  0x2b   :  { %561 = vmatpush2.bf16.msra.mxu0 %v878_v43 }
  0x2c   :  { %614 = vmatpush2.bf16.msra.mxu1 %v879_v44  ;;  %562 = vmatprep.subr.bf16.mxu0 %v880_v45 }
  0x2d   :  { %615 = vmatprep.subr.bf16.mxu1 %v882_v46 }
  0x2f   :  { %563 = vmatpush2.bf16.msra.mxu0 %v884_v47 }
  0x30   :  { %616 = vmatpush2.bf16.msra.mxu1 %v885_v48  ;;  %564 = vmatprep.subr.bf16.mxu0 %v886_v49 }
  0x31   :  { %617 = vmatprep.subr.bf16.mxu1 %v888_v51 }
  0x33   :  { %565 = vmatpush2.bf16.msra.mxu0 %v890_v53 }
  0x34   :  { %618 = vmatpush2.bf16.msra.mxu1 %v891_v54  ;;  %566 = vmatprep.subr.bf16.mxu0 %v892_v55 }
  0x35   :  { %619 = vmatprep.subr.bf16.mxu1 %v894_v56 }
  0x37   :  { %567 = vmatpush2.bf16.msra.mxu0 %v896_v57 }
  0x38   :  { %620 = vmatpush2.bf16.msra.mxu1 %v897_v58  ;;  %568 = vmatprep.subr.bf16.mxu0 %v898_v59 }
  0x39   :  { %621 = vmatprep.subr.bf16.mxu1 %v900_v60 }
  0x3b   :  { %569 = vmatpush2.bf16.msra.mxu0 %v902_v62 }
  0x3c   :  { %622 = vmatpush2.bf16.msra.mxu1 %v903_v63  ;;  %570 = vmatprep.subr.bf16.mxu0 %v904_v2 }
  0x3d   :  { %623 = vmatprep.subr.bf16.mxu1 %v906_v3 }
  0x3f   :  { %571 = vmatpush2.bf16.msra.mxu0 %v908_v6 }
  0x40   :  { %624 = vmatpush2.bf16.msra.mxu1 %v909_v7  ;;  %654 = vmatprep.subr.bf16.mxu0 %v918_v8 }
  0x41   :  { %803 = vmatprep.subr.bf16.mxu1 %v918_v8 }
  0x42   :  { %573 = vmatmul.mubr.bf16.vlgmr.msra.gmra.mxu0 %v910_v9 }
  0x43   :  { %626 = vmatmul.mubr.bf16.vlgmr.msra.gmra.mxu1 %v913_v10  ;;  %655 = vmatpush1.bf16.msra.mxu0 %v916_v11 }
  0x44   :  { %807 = vmatpush1.bf16.msra.mxu1 %v916_v11  ;;  %656 = vmatprep.subr.bf16.mxu0 %v921_v12 }
  0x45   :  { %804 = vmatprep.subr.bf16.mxu1 %v921_v12  ;;  %582 = vmatprep.mubr.bf16.mxu0 %v922_v13 }
  0x46   :  { %635 = vmatprep.mubr.bf16.mxu1 %v924_v14 }
  0x47   :  { %657 = vmatpush1.bf16.msra.mxu0 %v919_v15 }
  0x48   :  { %808 = vmatpush1.bf16.msra.mxu1 %v919_v15  ;;  %658 = vmatprep.subr.bf16.mxu0 %v930_v16 }
  0x49   :  { %805 = vmatprep.subr.bf16.mxu1 %v930_v16 }
  0x4a   :  { %583 = vmatmul.mubr.bf16.gmra.mxu0 %v926_v17 }
  0x4b   :  { %636 = vmatmul.mubr.bf16.gmra.mxu1 %v927_v18  ;;  %659 = vmatpush1.bf16.msra.mxu0 %v928_v19 }
  0x4c   :  { %809 = vmatpush1.bf16.msra.mxu1 %v928_v19  ;;  %660 = vmatprep.subr.bf16.mxu0 %v933_v20 }
  0x4d   :  { %806 = vmatprep.subr.bf16.mxu1 %v933_v20  ;;  %678 = vmatprep.mubr.bf16.mxu0 %v936_v1 }
  0x4e   :  { %688 = vmatprep.mubr.bf16.mxu1 %v936_v1 }
  0x4f   :  { %661 = vmatpush1.bf16.msra.mxu0 %v931_v21 }
  0x50   :  { %810 = vmatpush1.bf16.msra.mxu1 %v931_v21 }
  0x52   :  { %801 = vmatmul.mubr.msk.bf16.vlgmr.msra.gmra.mxu0 %vm533_vm0, %v934_v22 }
  0x53   :  { %802 = vmatmul.mubr.msk.bf16.vlgmr.msra.gmra.mxu1 %vm533_vm0, %v935_v23 }
  0x91   :  { %v106_v1 = vpop.permute.xlu0 %105 }
  0x92   :  { %v116_v30 = vpop.permute.xlu1 %115 }
  0x95   :  { %v111_v38 = vpop.permute.xlu0 %110 }
  0x96   :  { %v121_v40 = vpop.permute.xlu1 %120 }
 0x102   :  { %v574_v24 = vpop.f32.mrf.mxu0 }
 0x103   :  { %v627_v25 = vpop.f32.mrf.mxu1  ;;  %v575_v37 = vadd.f32 %v574_v24, %v106_v1 }
 0x104   :  { %v576_v26 = vpop.f32.mrf.mxu0 }
 0x105   :  { %v629_v27 = vpop.f32.mrf.mxu1  ;;  %v577_v43 = vadd.f32 %v576_v26, %v106_v1  ;;  %v628_v49 = vadd.f32 %v627_v25, %v575_v37 }
 0x106   :  { %v578_v28 = vpop.f32.mrf.mxu0 }
 0x107   :  { %v631_v29 = vpop.f32.mrf.mxu1  ;;  %v579_v45 = vadd.f32 %v578_v28, %v111_v38  ;;  %v630_v55 = vadd.f32 %v629_v27, %v577_v43 }
 0x108   :  { %v580_v31 = vpop.f32.mrf.mxu0 }
 0x109   :  { %v633_v32 = vpop.f32.mrf.mxu1  ;;  %v581_v51 = vadd.f32 %v580_v31, %v111_v38  ;;  %v632_v59 = vadd.f32 %v631_v29, %v579_v45 }
 0x10a   :  { %v584_v33 = vpop.f32.mrf.mxu0 }
 0x10b   :  { %v637_v34 = vpop.f32.mrf.mxu1  ;;  %v585_v39 = vadd.f32 %v584_v33, %v116_v30  ;;  %v634_v4 = vadd.f32 %v633_v32, %v581_v51 }
 0x10c   :  { %v586_v35 = vpop.f32.mrf.mxu0 }
 0x10d   :  { %v639_v36 = vpop.f32.mrf.mxu1  ;;  %v587_v44 = vadd.f32 %v586_v35, %v116_v30  ;;  %v638_v50 = vadd.f32 %v637_v34, %v585_v39 }
 0x10e   :  { %v588_v41 = vpop.f32.mrf.mxu0 }
 0x10f   :  { %v641_v42 = vpop.f32.mrf.mxu1  ;;  %v589_v46 = vadd.f32 %v588_v41, %v121_v40  ;;  %v640_v56 = vadd.f32 %v639_v36, %v587_v44 }
 0x110   :  { %v590_v47 = vpop.f32.mrf.mxu0 }
 0x111   :  { %v643_v48 = vpop.f32.mrf.mxu1  ;;  %v591_v52 = vadd.f32 %v590_v47, %v121_v40  ;;  %v642_v60 = vadd.f32 %v641_v42, %v589_v46 }
 0x112   :  { %v680_v53 = vpop.f32.mrf.mxu0 }
 0x113   :  { %v690_v54 = vpop.f32.mrf.mxu1  ;;  %v681_v57 = vadd.f32 %v680_v53, %v628_v49  ;;  %v644_v5 = vadd.f32 %v643_v48, %v591_v52 }
 0x114   :  { %v691_v58 = vadd.f32 %v690_v54, %v638_v50  ;;  %v682_v61 = vpop.f32.mrf.mxu0 }
 0x115   :  { %v692_v62 = vpop.f32.mrf.mxu1  ;;  %v699_v63 = vmax.f32 %v681_v57, 0.0  ;;  %v683_v2 = vadd.f32 %v682_v61, %v630_v55 }
 0x116   :  { %v703_v0 = vmax.f32 %v691_v58, 0.0  ;;  %v693_v3 = vadd.f32 %v692_v62, %v640_v56  ;;  %v684_v6 = vpop.f32.mrf.mxu0 }
 0x117   :  { %v694_v7 = vpop.f32.mrf.mxu1  ;;  %707 = vst [vmem:[%s1246_s3] sm:$0xff] %v699_v63  ;;  %v700_v8 = vmax.f32 %v683_v2, 0.0  ;;  %v685_v10 = vadd.f32 %v684_v6, %v632_v59 }
 0x118   :  { %711 = vst [vmem:[%s1246_s3 + $0x20] sm:$0xff] %v703_v0  ;;  %v704_v9 = vmax.f32 %v693_v3, 0.0  ;;  %v695_v11 = vadd.f32 %v694_v7, %v642_v60  ;;  %v686_v12 = vpop.f32.mrf.mxu0 }
 0x119   :  { %v696_v13 = vpop.f32.mrf.mxu1  ;;  %708 = vst [vmem:[%s1246_s3 + $0x8] sm:$0xff] %v700_v8  ;;  %v701_v14 = vmax.f32 %v685_v10, 0.0  ;;  %v687_v16 = vadd.f32 %v686_v12, %v634_v4 }
 0x11a   :  { %712 = vst [vmem:[%s1246_s3 + $0x28] sm:$0xff] %v704_v9  ;;  %v705_v15 = vmax.f32 %v695_v11, 0.0  ;;  %v697_v17 = vadd.f32 %v696_v13, %v644_v5 }
 0x11b   :  { %709 = vst [vmem:[%s1246_s3 + $0x10] sm:$0xff] %v701_v14  ;;  %v702_v18 = vmax.f32 %v687_v16, 0.0 }
 0x11c   :  { %713 = vst [vmem:[%s1246_s3 + $0x30] sm:$0xff] %v705_v15  ;;  %v706_v19 = vmax.f32 %v697_v17, 0.0 }
 0x11d   :  { %710 = vst [vmem:[%s1246_s3 + $0x18] sm:$0xff] %v702_v18 }
 0x11e   :  { %714 = vst [vmem:[%s1246_s3 + $0x38] sm:$0xff] %v706_v19 }

// kernel: biogan_star_shaped_forward.11
= control target key start
LH: loop header
LB: loop body
LE: loop exit
PB: predicated region body
PF: predicated region fallthrough
CT: control target
= control target key end

     0   :  { %v1451_v3 = vmov 0   ;;  %vm910_vm0 = vcmask 261120   ;;  %s2014_s1 = inlined_call_operand.vmem [shape: bf16[288,1024], index: 1, kind: input, shape index: {}]   ;;  %s2015_s0 = inlined_call_operand.vmem [shape: bf16[16,288], index: 0, kind: input, shape index: {}]   ;;  %s2016_s2 = inlined_call_operand.vmem [shape: f32[16,1], index: 2, kind: input, shape index: {}]   ;;  %s2017_s3 = inlined_call_operand.vmem [shape: f32[16,1024], index: 3, kind: output, shape index: {}]  }
   0x1   :  { %v75_v0 = vld [vmem:[%s2014_s1 + $0x1c0] sm:$0xff]  ;;  %989 = vmatprep.mubr.bf16.mxu1 %v1451_v3  ;;  %1446 = vset.pattern.permute.xlu0 %v1451_v3  ;;  %v76_v18 = vld [vmem:[%s2014_s1 + $0x1c8] sm:$0xff] }
   0x2   :  { %v79_v1 = vld [vmem:[%s2014_s1 + $0x1e0] sm:$0xff]  ;;  %v80_v19 = vld [vmem:[%s2014_s1 + $0x1e8] sm:$0xff] }
   0x3   :  { %v155_v2 = vld [vmem:[%s2014_s1 + $0x440] sm:$0xff]  ;;  %v1354_v4 = vcombine.high %v75_v0, %v79_v1  ;;  %v1353_v6 = vcombine.low %v75_v0, %v79_v1  ;;  %v1356_v22 = vcombine.high %v76_v18, %v80_v19  ;;  %v68_v25 = vld [vmem:[%s2014_s1 + $0x188] sm:$0xff]  ;;  %v1355_v29 = vcombine.low %v76_v18, %v80_v19 }
   0x4   :  { %v159_v5 = vld [vmem:[%s2014_s1 + $0x460] sm:$0xff]  ;;  %v72_v26 = vld [vmem:[%s2014_s1 + $0x1a8] sm:$0xff] }
   0x5   :  { %v67_v7 = vld [vmem:[%s2014_s1 + $0x180] sm:$0xff]  ;;  %v1434_v9 = vcombine.high %v155_v2, %v159_v5  ;;  %v1433_v10 = vcombine.low %v155_v2, %v159_v5  ;;  %914 = vmatprep.subr.bf16.mxu0 %v1354_v4  ;;  %v1525_v27 = vld [vmem:[%s2015_s0 + $0x8] ss:$12 sps:$4 sm:$0xff]   ;;  %v1348_v31 = vcombine.high %v68_v25, %v72_v26  ;;  %v1347_v37 = vcombine.low %v68_v25, %v72_v26 }
   0x6   :  { %v71_v8 = vld [vmem:[%s2014_s1 + $0x1a0] sm:$0xff]  ;;  %915 = vmatpush1.bf16.msra.mxu0 %v1353_v6  ;;  %v60_v34 = vld [vmem:[%s2014_s1 + $0x148] sm:$0xff] }
   0x7   :  { %v1346_v11 = vcombine.high %v67_v7, %v71_v8  ;;  %v147_v12 = vld [vmem:[%s2014_s1 + $0x400] sm:$0xff]  ;;  %969 = vmatprep.subr.bf16.mxu1 %v1434_v9  ;;  %v1345_v17 = vcombine.low %v67_v7, %v71_v8  ;;  %v64_v35 = vld [vmem:[%s2014_s1 + $0x168] sm:$0xff] }
   0x8   :  { %v151_v13 = vld [vmem:[%s2014_s1 + $0x420] sm:$0xff]  ;;  %970 = vmatpush1.bf16.msra.mxu1 %v1433_v10  ;;  %v1340_v39 = vcombine.high %v60_v34, %v64_v35  ;;  %v52_v42 = vld [vmem:[%s2014_s1 + $0x108] sm:$0xff]  ;;  %v1339_v45 = vcombine.low %v60_v34, %v64_v35 }
   0x9   :  { %v59_v14 = vld [vmem:[%s2014_s1 + $0x140] sm:$0xff]  ;;  %v1426_v15 = vcombine.high %v147_v12, %v151_v13  ;;  %916 = vmatprep.subr.bf16.mxu0 %v1346_v11  ;;  %v1425_v20 = vcombine.low %v147_v12, %v151_v13  ;;  %v56_v43 = vld [vmem:[%s2014_s1 + $0x128] sm:$0xff] }
   0xa   :  { %v63_v16 = vld [vmem:[%s2014_s1 + $0x160] sm:$0xff]  ;;  %917 = vmatpush1.bf16.msra.mxu0 %v1345_v17  ;;  %v1332_v47 = vcombine.high %v52_v42, %v56_v43  ;;  %v44_v50 = vld [vmem:[%s2014_s1 + $0xc8] sm:$0xff]  ;;  %v1331_v53 = vcombine.low %v52_v42, %v56_v43 }
   0xb   :  { %v1338_v21 = vcombine.high %v59_v14, %v63_v16  ;;  %971 = vmatprep.subr.bf16.mxu1 %v1426_v15  ;;  %v51_v23 = vld [vmem:[%s2014_s1 + $0x100] sm:$0xff]  ;;  %v1337_v28 = vcombine.low %v59_v14, %v63_v16  ;;  %v48_v51 = vld [vmem:[%s2014_s1 + $0xe8] sm:$0xff] }
   0xc   :  { %v55_v24 = vld [vmem:[%s2014_s1 + $0x120] sm:$0xff]  ;;  %972 = vmatpush1.bf16.msra.mxu1 %v1425_v20  ;;  %v1324_v56 = vcombine.high %v44_v50, %v48_v51  ;;  %v36_v58 = vld [vmem:[%s2014_s1 + $0x88] sm:$0xff]  ;;  %v1323_v62 = vcombine.low %v44_v50, %v48_v51 }
   0xd   :  { %918 = vmatprep.subr.bf16.mxu0 %v1338_v21  ;;  %v1330_v30 = vcombine.high %v51_v23, %v55_v24  ;;  %1000 = vmatprep.subr.bf16.mxu1 %v1356_v22  ;;  %v43_v32 = vld [vmem:[%s2014_s1 + $0xc0] sm:$0xff]  ;;  %v1329_v36 = vcombine.low %v51_v23, %v55_v24  ;;  %v40_v59 = vld [vmem:[%s2014_s1 + $0xa8] sm:$0xff] }
   0xe   :  { %v47_v33 = vld [vmem:[%s2014_s1 + $0xe0] sm:$0xff]  ;;  %919 = vmatpush1.bf16.msra.mxu0 %v1337_v28  ;;  %v1316_v0 = vcombine.high %v36_v58, %v40_v59  ;;  %v28_v4 = vld [vmem:[%s2014_s1 + $0x48] sm:$0xff]  ;;  %v1315_v7 = vcombine.low %v36_v58, %v40_v59 }
   0xf   :  { %1441 = vmatmul.mubr.msk.bf16.vlgmr.msra.gmra.mxu1 %vm910_vm0, %v1525_v27  ;;  %920 = vmatprep.subr.bf16.mxu0 %v1330_v30  ;;  %v1322_v38 = vcombine.high %v43_v32, %v47_v33  ;;  %v35_v40 = vld [vmem:[%s2014_s1 + $0x80] sm:$0xff]  ;;  %v1321_v44 = vcombine.low %v43_v32, %v47_v33  ;;  %v32_v5 = vld [vmem:[%s2014_s1 + $0x68] sm:$0xff] }
  0x10   :  { %1001 = vmatpush1.bf16.msra.mxu1 %v1355_v29  ;;  %v39_v41 = vld [vmem:[%s2014_s1 + $0xa0] sm:$0xff]  ;;  %v1308_v9 = vcombine.high %v28_v4, %v32_v5  ;;  %v20_v12 = vld [vmem:[%s2014_s1 + $0x8] sm:$0xff]  ;;  %v1307_v15 = vcombine.low %v28_v4, %v32_v5 }
  0x11   :  { %1002 = vmatprep.subr.bf16.mxu1 %v1348_v31  ;;  %v1314_v46 = vcombine.high %v35_v40, %v39_v41  ;;  %v27_v48 = vld [vmem:[%s2014_s1 + $0x40] sm:$0xff]  ;;  %v1313_v52 = vcombine.low %v35_v40, %v39_v41  ;;  %v24_v13 = vld [vmem:[%s2014_s1 + $0x28] sm:$0xff] }
  0x12   :  { %921 = vmatpush1.bf16.msra.mxu0 %v1329_v36  ;;  %v31_v49 = vld [vmem:[%s2014_s1 + $0x60] sm:$0xff]  ;;  %v1300_v17 = vcombine.high %v20_v12, %v24_v13  ;;  %v140_v20 = vld [vmem:[%s2014_s1 + $0x3c8] sm:$0xff]  ;;  %v1299_v23 = vcombine.low %v20_v12, %v24_v13 }
  0x13   :  { %922 = vmatprep.subr.bf16.mxu0 %v1322_v38  ;;  %v1306_v54 = vcombine.high %v27_v48, %v31_v49  ;;  %v19_v55 = vld [vmem:[%s2014_s1] sm:$0xff]  ;;  %v1305_v61 = vcombine.low %v27_v48, %v31_v49  ;;  %v144_v21 = vld [vmem:[%s2014_s1 + $0x3e8] sm:$0xff] }
  0x14   :  { %1003 = vmatpush1.bf16.msra.mxu1 %v1347_v37  ;;  %v23_v57 = vld [vmem:[%s2014_s1 + $0x20] sm:$0xff]  ;;  %v1420_v25 = vcombine.high %v140_v20, %v144_v21  ;;  %v132_v29 = vld [vmem:[%s2014_s1 + $0x388] sm:$0xff]  ;;  %v1419_v32 = vcombine.low %v140_v20, %v144_v21 }
  0x15   :  { %1004 = vmatprep.subr.bf16.mxu1 %v1340_v39  ;;  %v1580_v60 = vld [vmem:[%s2015_s0 + $0x4] ss:$12 sps:$4 sm:$0xff]   ;;  %v1298_v63 = vcombine.high %v19_v55, %v23_v57  ;;  %v1297_v6 = vcombine.low %v19_v55, %v23_v57  ;;  %v136_v30 = vld [vmem:[%s2014_s1 + $0x3a8] sm:$0xff] }
  0x16   :  { %923 = vmatpush1.bf16.msra.mxu0 %v1321_v44  ;;  %v139_v1 = vld [vmem:[%s2014_s1 + $0x3c0] sm:$0xff]  ;;  %946 = vmatprep.mubr.bf16.mxu0 %v1580_v60  ;;  %v1412_v34 = vcombine.high %v132_v29, %v136_v30  ;;  %v124_v37 = vld [vmem:[%s2014_s1 + $0x348] sm:$0xff]  ;;  %v1411_v40 = vcombine.low %v132_v29, %v136_v30 }
  0x17   :  { %924 = vmatprep.subr.bf16.mxu0 %v1314_v46  ;;  %v143_v2 = vld [vmem:[%s2014_s1 + $0x3e0] sm:$0xff]  ;;  %1032 = vmatprep.mubr.bf16.mxu1 %v1580_v60  ;;  %v128_v38 = vld [vmem:[%s2014_s1 + $0x368] sm:$0xff] }
  0x18   :  { %1005 = vmatpush1.bf16.msra.mxu1 %v1339_v45  ;;  %v1418_v8 = vcombine.high %v139_v1, %v143_v2  ;;  %v131_v10 = vld [vmem:[%s2014_s1 + $0x380] sm:$0xff]  ;;  %v1417_v14 = vcombine.low %v139_v1, %v143_v2  ;;  %v1404_v42 = vcombine.high %v124_v37, %v128_v38  ;;  %v116_v45 = vld [vmem:[%s2014_s1 + $0x308] sm:$0xff]  ;;  %v1403_v49 = vcombine.low %v124_v37, %v128_v38 }
  0x19   :  { %1006 = vmatprep.subr.bf16.mxu1 %v1332_v47  ;;  %v135_v11 = vld [vmem:[%s2014_s1 + $0x3a0] sm:$0xff]  ;;  %v120_v46 = vld [vmem:[%s2014_s1 + $0x328] sm:$0xff] }
  0x1a   :  { %925 = vmatpush1.bf16.msra.mxu0 %v1313_v52  ;;  %v1410_v16 = vcombine.high %v131_v10, %v135_v11  ;;  %v123_v18 = vld [vmem:[%s2014_s1 + $0x340] sm:$0xff]  ;;  %v1409_v22 = vcombine.low %v131_v10, %v135_v11  ;;  %v164_v51 = vld [vmem:[%s2016_s2 + $0x8] sm:$0xff]  ;;  %v1396_v52 = vcombine.high %v116_v45, %v120_v46  ;;  %v1395_v58 = vcombine.low %v116_v45, %v120_v46 }
  0x1b   :  { %926 = vmatprep.subr.bf16.mxu0 %v1306_v54  ;;  %v127_v19 = vld [vmem:[%s2014_s1 + $0x360] sm:$0xff]  ;;  %v108_v55 = vld [vmem:[%s2014_s1 + $0x2c8] sm:$0xff] }
  0x1c   :  { %1007 = vmatpush1.bf16.msra.mxu1 %v1331_v53  ;;  %v1402_v24 = vcombine.high %v123_v18, %v127_v19  ;;  %v115_v26 = vld [vmem:[%s2014_s1 + $0x300] sm:$0xff]  ;;  %v1401_v31 = vcombine.low %v123_v18, %v127_v19  ;;  %v104_v1 = vld [vmem:[%s2014_s1 + $0x2a8] sm:$0xff] }
  0x1d   :  { %1008 = vmatprep.subr.bf16.mxu1 %v1324_v56  ;;  %v119_v28 = vld [vmem:[%s2014_s1 + $0x320] sm:$0xff]  ;;  %v112_v56 = vld [vmem:[%s2014_s1 + $0x2e8] sm:$0xff] }
  0x1e   :  { %927 = vmatpush1.bf16.msra.mxu0 %v1305_v61  ;;  %v1394_v33 = vcombine.high %v115_v26, %v119_v28  ;;  %v107_v35 = vld [vmem:[%s2014_s1 + $0x2c0] sm:$0xff]  ;;  %v1393_v39 = vcombine.low %v115_v26, %v119_v28  ;;  %v1388_v61 = vcombine.high %v108_v55, %v112_v56  ;;  %v1387_v4 = vcombine.low %v108_v55, %v112_v56  ;;  %v96_v10 = vld [vmem:[%s2014_s1 + $0x268] sm:$0xff]  ;;  %v157_v26 = vld [vmem:[%s2014_s1 + $0x450] sm:$0xff] }
  0x1f   :  { %928 = vmatprep.subr.bf16.mxu0 %v1298_v63  ;;  %v111_v36 = vld [vmem:[%s2014_s1 + $0x2e0] sm:$0xff]  ;;  %v84_v18 = vld [vmem:[%s2014_s1 + $0x208] sm:$0xff]  ;;  %v161_v28 = vld [vmem:[%s2014_s1 + $0x470] sm:$0xff] }
  0x20   :  { %1009 = vmatpush1.bf16.msra.mxu1 %v1323_v62  ;;  %v1386_v41 = vcombine.high %v107_v35, %v111_v36  ;;  %v99_v43 = vld [vmem:[%s2014_s1 + $0x280] sm:$0xff]  ;;  %v1385_v48 = vcombine.low %v107_v35, %v111_v36  ;;  %v88_v19 = vld [vmem:[%s2014_s1 + $0x228] sm:$0xff]  ;;  %v149_v35 = vld [vmem:[%s2014_s1 + $0x410] sm:$0xff]  ;;  %v1437_v38 = vcombine.low %v157_v26, %v161_v28 }
  0x21   :  { %1010 = vmatprep.subr.bf16.mxu1 %v1316_v0  ;;  %v103_v44 = vld [vmem:[%s2014_s1 + $0x2a0] sm:$0xff]  ;;  %v100_v0 = vld [vmem:[%s2014_s1 + $0x288] sm:$0xff]  ;;  %v1363_v30 = vcombine.low %v84_v18, %v88_v19  ;;  %v153_v36 = vld [vmem:[%s2014_s1 + $0x430] sm:$0xff] }
  0x22   :  { %929 = vmatpush1.bf16.msra.mxu0 %v1297_v6  ;;  %v163_v47 = vld [vmem:[%s2016_s2] sm:$0xff]  ;;  %v1378_v50 = vcombine.high %v99_v43, %v103_v44  ;;  %v1377_v57 = vcombine.low %v99_v43, %v103_v44  ;;  %v1380_v6 = vcombine.high %v100_v0, %v104_v1  ;;  %v1379_v12 = vcombine.low %v100_v0, %v104_v1  ;;  %v78_v43 = vld [vmem:[%s2014_s1 + $0x1d8] sm:$0xff] }
  0x23   :  { %930 = vmatprep.subr.bf16.mxu0 %v1418_v8  ;;  %167 = vperm.xlu0 %1446, %v163_v47   ;;  %v91_v53 = vld [vmem:[%s2014_s1 + $0x240] sm:$0xff]  ;;  %v160_v8 = vld [vmem:[%s2014_s1 + $0x468] sm:$0xff]  ;;  %v82_v44 = vld [vmem:[%s2014_s1 + $0x1f8] sm:$0xff]  ;;  %v1429_v46 = vcombine.low %v149_v35, %v153_v36 }
  0x24   :  { %1011 = vmatpush1.bf16.msra.mxu1 %v1315_v7  ;;  %v95_v54 = vld [vmem:[%s2014_s1 + $0x260] sm:$0xff]  ;;  %v156_v7 = vld [vmem:[%s2014_s1 + $0x448] sm:$0xff] }
  0x25   :  { %1012 = vmatprep.subr.bf16.mxu1 %v1308_v9  ;;  %v1370_v59 = vcombine.high %v91_v53, %v95_v54  ;;  %v83_v62 = vld [vmem:[%s2014_s1 + $0x200] sm:$0xff]  ;;  %v1369_v2 = vcombine.low %v91_v53, %v95_v54  ;;  %v92_v9 = vld [vmem:[%s2014_s1 + $0x248] sm:$0xff]  ;;  %v1436_v13 = vcombine.high %v156_v7, %v160_v8  ;;  %v1435_v20 = vcombine.low %v156_v7, %v160_v8 }
  0x26   :  { %931 = vmatpush2.bf16.msra.mxu0 %v1417_v14  ;;  %v87_v63 = vld [vmem:[%s2014_s1 + $0x220] sm:$0xff]  ;;  %v1372_v14 = vcombine.high %v92_v9, %v96_v10  ;;  %v1371_v21 = vcombine.low %v92_v9, %v96_v10  ;;  %v1359_v54 = vcombine.low %v78_v43, %v82_v44 }
  0x27   :  { %932 = vmatprep.subr.bf16.mxu0 %v1410_v16  ;;  %172 = vperm.xlu0 %1446, %v164_v51   ;;  %v1362_v5 = vcombine.high %v83_v62, %v87_v63  ;;  %v1361_v11 = vcombine.low %v83_v62, %v87_v63  ;;  %v152_v16 = vld [vmem:[%s2014_s1 + $0x428] sm:$0xff]  ;;  %v70_v51 = vld [vmem:[%s2014_s1 + $0x198] sm:$0xff] }
  0x28   :  { %1013 = vmatpush1.bf16.msra.mxu1 %v1307_v15  ;;  %v148_v15 = vld [vmem:[%s2014_s1 + $0x408] sm:$0xff] }
  0x29   :  { %1014 = vmatprep.subr.bf16.mxu1 %v1300_v17  ;;  %v1707_v17 = vld [vmem:[%s2015_s0] ss:$12 sps:$4 sm:$0xff]   ;;  %v1427_v29 = vcombine.low %v148_v15, %v152_v16 }
  0x2a   :  { %933 = vmatpush2.bf16.msra.mxu0 %v1409_v22  ;;  %v1428_v22 = vcombine.high %v148_v15, %v152_v16 }
  0x2b   :  { %934 = vmatprep.subr.bf16.mxu0 %v1402_v24  ;;  %v77_v24 = vld [vmem:[%s2014_s1 + $0x1d0] sm:$0xff] }
  0x2c   :  { %1015 = vmatpush1.bf16.msra.mxu1 %v1299_v23  ;;  %v1364_v23 = vcombine.high %v84_v18, %v88_v19  ;;  %v21_v19 = vld [vmem:[%s2014_s1 + $0x10] sm:$0xff] }
  0x2d   :  { %1016 = vmatprep.subr.bf16.mxu1 %v1420_v25  ;;  %v81_v25 = vld [vmem:[%s2014_s1 + $0x1f0] sm:$0xff] }
  0x2e   :  { %935 = vmatpush2.bf16.msra.mxu0 %v1401_v31  ;;  %v1358_v31 = vcombine.high %v77_v24, %v81_v25  ;;  %v1357_v37 = vcombine.low %v77_v24, %v81_v25 }
  0x2f   :  { %936 = vmatprep.subr.bf16.mxu0 %v1394_v33  ;;  %v69_v33 = vld [vmem:[%s2014_s1 + $0x190] sm:$0xff] }
  0x30   :  { %1017 = vmatpush2.bf16.msra.mxu1 %v1419_v32  ;;  %v1438_v32 = vcombine.high %v157_v26, %v161_v28  ;;  %v141_v28 = vld [vmem:[%s2014_s1 + $0x3d0] sm:$0xff] }
  0x31   :  { %1018 = vmatprep.subr.bf16.mxu1 %v1412_v34  ;;  %v73_v34 = vld [vmem:[%s2014_s1 + $0x1b0] sm:$0xff] }
  0x32   :  { %937 = vmatpush2.bf16.msra.mxu0 %v1393_v39  ;;  %v1350_v39 = vcombine.high %v69_v33, %v73_v34  ;;  %v1349_v45 = vcombine.low %v69_v33, %v73_v34 }
  0x33   :  { %938 = vmatprep.subr.bf16.mxu0 %v1386_v41  ;;  %v61_v41 = vld [vmem:[%s2014_s1 + $0x150] sm:$0xff] }
  0x34   :  { %1019 = vmatpush2.bf16.msra.mxu1 %v1411_v40  ;;  %v1430_v40 = vcombine.high %v149_v35, %v153_v36  ;;  %v133_v36 = vld [vmem:[%s2014_s1 + $0x390] sm:$0xff] }
  0x35   :  { %1020 = vmatprep.subr.bf16.mxu1 %v1404_v42  ;;  %v65_v42 = vld [vmem:[%s2014_s1 + $0x170] sm:$0xff] }
  0x36   :  { %939 = vmatpush2.bf16.msra.mxu0 %v1385_v48  ;;  %v1342_v47 = vcombine.high %v61_v41, %v65_v42  ;;  %v1360_v48 = vcombine.high %v78_v43, %v82_v44  ;;  %v1341_v53 = vcombine.low %v61_v41, %v65_v42  ;;  %v125_v44 = vld [vmem:[%s2014_s1 + $0x350] sm:$0xff] }
  0x37   :  { %940 = vmatprep.subr.bf16.mxu0 %v1378_v50  ;;  %v57_v50 = vld [vmem:[%s2014_s1 + $0x130] sm:$0xff] }
  0x38   :  { %1021 = vmatpush2.bf16.msra.mxu1 %v1403_v49  ;;  %v53_v49 = vld [vmem:[%s2014_s1 + $0x110] sm:$0xff] }
  0x39   :  { %1022 = vmatprep.subr.bf16.mxu1 %v1396_v52  ;;  %v74_v52 = vld [vmem:[%s2014_s1 + $0x1b8] sm:$0xff]  ;;  %v1334_v55 = vcombine.high %v53_v49, %v57_v50  ;;  %v1333_v62 = vcombine.low %v53_v49, %v57_v50 }
  0x3a   :  { %941 = vmatpush2.bf16.msra.mxu0 %v1377_v57  ;;  %v1352_v56 = vcombine.high %v70_v51, %v74_v52  ;;  %v45_v57 = vld [vmem:[%s2014_s1 + $0xd0] sm:$0xff]  ;;  %v1351_v63 = vcombine.low %v70_v51, %v74_v52 }
  0x3b   :  { %942 = vmatprep.subr.bf16.mxu0 %v1370_v59  ;;  %v62_v59 = vld [vmem:[%s2014_s1 + $0x158] sm:$0xff]  ;;  %v117_v52 = vld [vmem:[%s2014_s1 + $0x310] sm:$0xff] }
  0x3c   :  { %1023 = vmatpush2.bf16.msra.mxu1 %v1395_v58  ;;  %v49_v58 = vld [vmem:[%s2014_s1 + $0xf0] sm:$0xff] }
  0x3d   :  { %1024 = vmatprep.subr.bf16.mxu1 %v1388_v61  ;;  %v66_v61 = vld [vmem:[%s2014_s1 + $0x178] sm:$0xff]  ;;  %v1326_v0 = vcombine.high %v45_v57, %v49_v58  ;;  %v1325_v7 = vcombine.low %v45_v57, %v49_v58 }
  0x3e   :  { %943 = vmatpush2.bf16.msra.mxu0 %v1369_v2  ;;  %v1344_v1 = vcombine.high %v62_v59, %v66_v61  ;;  %v37_v2 = vld [vmem:[%s2014_s1 + $0x90] sm:$0xff]  ;;  %v1343_v8 = vcombine.low %v62_v59, %v66_v61 }
  0x3f   :  { %944 = vmatprep.subr.bf16.mxu0 %v1362_v5  ;;  %v54_v5 = vld [vmem:[%s2014_s1 + $0x118] sm:$0xff]  ;;  %v109_v61 = vld [vmem:[%s2014_s1 + $0x2d0] sm:$0xff] }
  0x40   :  { %1025 = vmatpush2.bf16.msra.mxu1 %v1387_v4  ;;  %v41_v4 = vld [vmem:[%s2014_s1 + $0xb0] sm:$0xff] }
  0x41   :  { %1026 = vmatprep.subr.bf16.mxu1 %v1380_v6  ;;  %v58_v6 = vld [vmem:[%s2014_s1 + $0x138] sm:$0xff]  ;;  %v1318_v9 = vcombine.high %v37_v2, %v41_v4 }
  0x42   :  { %945 = vmatpush2.bf16.msra.mxu0 %v1361_v11  ;;  %v1336_v10 = vcombine.high %v54_v5, %v58_v6  ;;  %v33_v11 = vld [vmem:[%s2014_s1 + $0x70] sm:$0xff]  ;;  %v1335_v15 = vcombine.low %v54_v5, %v58_v6 }
  0x43   :  { %1055 = vmatprep.subr.bf16.mxu0 %v1436_v13  ;;  %v50_v13 = vld [vmem:[%s2014_s1 + $0xf8] sm:$0xff]  ;;  %v101_v6 = vld [vmem:[%s2014_s1 + $0x290] sm:$0xff] }
  0x44   :  { %1027 = vmatpush2.bf16.msra.mxu1 %v1379_v12  ;;  %v46_v12 = vld [vmem:[%s2014_s1 + $0xd8] sm:$0xff] }
  0x45   :  { %1028 = vmatprep.subr.bf16.mxu1 %v1372_v14  ;;  %947 = vmatmul.mubr.bf16.vlgmr.msra.gmra.mxu0 %v1707_v17  ;;  %v1317_v14 = vcombine.low %v37_v2, %v41_v4  ;;  %v1328_v18 = vcombine.high %v46_v12, %v50_v13  ;;  %v1327_v24 = vcombine.low %v46_v12, %v50_v13  ;;  %v93_v13 = vld [vmem:[%s2014_s1 + $0x250] sm:$0xff] }
  0x46   :  { %1056 = vmatpush1.bf16.msra.mxu0 %v1435_v20  ;;  %1075 = vmatprep.mubr.bf16.mxu0 %v1451_v3  ;;  %v25_v20 = vld [vmem:[%s2014_s1 + $0x30] sm:$0xff] }
  0x47   :  { %1057 = vmatprep.subr.bf16.mxu0 %v1428_v22  ;;  %v42_v22 = vld [vmem:[%s2014_s1 + $0xb8] sm:$0xff]  ;;  %v1302_v25 = vcombine.high %v21_v19, %v25_v20 }
  0x48   :  { %1029 = vmatpush2.bf16.msra.mxu1 %v1371_v21  ;;  %v38_v21 = vld [vmem:[%s2014_s1 + $0x98] sm:$0xff] }
  0x49   :  { %1030 = vmatprep.subr.bf16.mxu1 %v1364_v23  ;;  %v1320_v26 = vcombine.high %v38_v21, %v42_v22  ;;  %v1319_v33 = vcombine.low %v38_v21, %v42_v22  ;;  %v85_v22 = vld [vmem:[%s2014_s1 + $0x210] sm:$0xff] }
  0x4a   :  { %1058 = vmatpush1.bf16.msra.mxu0 %v1427_v29  ;;  %v145_v29 = vld [vmem:[%s2014_s1 + $0x3f0] sm:$0xff] }
  0x4b   :  { %1086 = vmatprep.subr.bf16.mxu0 %v1358_v31  ;;  %v34_v31 = vld [vmem:[%s2014_s1 + $0x78] sm:$0xff]  ;;  %v1422_v34 = vcombine.high %v141_v28, %v145_v29 }
  0x4c   :  { %1031 = vmatpush2.bf16.msra.mxu1 %v1363_v30  ;;  %v30_v30 = vld [vmem:[%s2014_s1 + $0x58] sm:$0xff] }
  0x4d   :  { %1141 = vmatprep.subr.bf16.mxu1 %v1438_v32  ;;  %1442 = vmatmul.mubr.msk.bf16.vlgmr.msra.gmra.mxu0 %vm910_vm0, %v1525_v27  ;;  %v1301_v32 = vcombine.low %v21_v19, %v25_v20  ;;  %v1312_v35 = vcombine.high %v30_v30, %v34_v31  ;;  %v1311_v41 = vcombine.low %v30_v30, %v34_v31  ;;  %v158_v31 = vld [vmem:[%s2014_s1 + $0x458] sm:$0xff] }
  0x4e   :  { %1087 = vmatpush1.bf16.msra.mxu0 %v1357_v37  ;;  %1118 = vmatprep.mubr.bf16.mxu0 %v1580_v60  ;;  %v137_v37 = vld [vmem:[%s2014_s1 + $0x3b0] sm:$0xff] }
  0x4f   :  { %1033 = vmatmul.mubr.bf16.vlgmr.msra.gmra.mxu1 %v1707_v17  ;;  %1088 = vmatprep.subr.bf16.mxu0 %v1350_v39  ;;  %v26_v39 = vld [vmem:[%s2014_s1 + $0x38] sm:$0xff]  ;;  %v1414_v42 = vcombine.high %v133_v36, %v137_v37 }
  0x50   :  { %1142 = vmatpush1.bf16.msra.mxu1 %v1437_v38  ;;  %1161 = vmatprep.mubr.bf16.mxu1 %v1451_v3  ;;  %v22_v38 = vld [vmem:[%s2014_s1 + $0x18] sm:$0xff] }
  0x51   :  { %1143 = vmatprep.subr.bf16.mxu1 %v1430_v40  ;;  %v1421_v40 = vcombine.low %v141_v28, %v145_v29  ;;  %v1304_v43 = vcombine.high %v22_v38, %v26_v39  ;;  %v1303_v49 = vcombine.low %v22_v38, %v26_v39  ;;  %v150_v39 = vld [vmem:[%s2014_s1 + $0x418] sm:$0xff] }
  0x52   :  { %1089 = vmatpush1.bf16.msra.mxu0 %v1349_v45  ;;  %v129_v45 = vld [vmem:[%s2014_s1 + $0x370] sm:$0xff] }
  0x53   :  { %1090 = vmatprep.subr.bf16.mxu0 %v1342_v47  ;;  %v146_v47 = vld [vmem:[%s2014_s1 + $0x3f8] sm:$0xff]  ;;  %v1406_v50 = vcombine.high %v125_v44, %v129_v45 }
  0x54   :  { %1144 = vmatpush1.bf16.msra.mxu1 %v1429_v46  ;;  %v142_v46 = vld [vmem:[%s2014_s1 + $0x3d8] sm:$0xff] }
  0x55   :  { %1172 = vmatprep.subr.bf16.mxu1 %v1360_v48  ;;  %v1413_v48 = vcombine.low %v133_v36, %v137_v37  ;;  %v1424_v51 = vcombine.high %v142_v46, %v146_v47  ;;  %v1423_v57 = vcombine.low %v142_v46, %v146_v47 }
  0x56   :  { %1091 = vmatpush1.bf16.msra.mxu0 %v1341_v53  ;;  %v121_v53 = vld [vmem:[%s2014_s1 + $0x330] sm:$0xff] }
  0x57   :  { %1443 = vmatmul.mubr.msk.bf16.vlgmr.msra.gmra.mxu1 %vm910_vm0, %v1525_v27  ;;  %1092 = vmatprep.subr.bf16.mxu0 %v1334_v55  ;;  %v138_v55 = vld [vmem:[%s2014_s1 + $0x3b8] sm:$0xff]  ;;  %v1398_v58 = vcombine.high %v117_v52, %v121_v53 }
  0x58   :  { %1173 = vmatpush1.bf16.msra.mxu1 %v1359_v54  ;;  %1204 = vmatprep.mubr.bf16.mxu1 %v1580_v60  ;;  %v29_v60 = vld [vmem:[%s2014_s1 + $0x50] sm:$0xff]  ;;  %v134_v54 = vld [vmem:[%s2014_s1 + $0x398] sm:$0xff] }
  0x59   :  { %1174 = vmatprep.subr.bf16.mxu1 %v1352_v56  ;;  %v1310_v16 = vcombine.high %v29_v60, %v33_v11  ;;  %v1309_v23 = vcombine.low %v29_v60, %v33_v11  ;;  %v1405_v56 = vcombine.low %v125_v44, %v129_v45  ;;  %v1416_v59 = vcombine.high %v134_v54, %v138_v55 }
  0x5a   :  { %1093 = vmatpush1.bf16.msra.mxu0 %v1333_v62  ;;  %v113_v62 = vld [vmem:[%s2014_s1 + $0x2f0] sm:$0xff]  ;;  %v1415_v2 = vcombine.low %v134_v54, %v138_v55 }
  0x5b   :  { %1094 = vmatprep.subr.bf16.mxu0 %v1326_v0  ;;  %v130_v0 = vld [vmem:[%s2014_s1 + $0x378] sm:$0xff]  ;;  %v1390_v4 = vcombine.high %v109_v61, %v113_v62 }
  0x5c   :  { %1175 = vmatpush1.bf16.msra.mxu1 %v1351_v63  ;;  %v126_v63 = vld [vmem:[%s2014_s1 + $0x358] sm:$0xff] }
  0x5d   :  { %1176 = vmatprep.subr.bf16.mxu1 %v1344_v1  ;;  %v1397_v1 = vcombine.low %v117_v52, %v121_v53  ;;  %v1408_v5 = vcombine.high %v126_v63, %v130_v0  ;;  %v1407_v60 = vcombine.low %v126_v63, %v130_v0 }
  0x5e   :  { %1095 = vmatpush1.bf16.msra.mxu0 %v1325_v7  ;;  %v105_v7 = vld [vmem:[%s2014_s1 + $0x2b0] sm:$0xff] }
  0x5f   :  { %1096 = vmatprep.subr.bf16.mxu0 %v1318_v9  ;;  %v122_v9 = vld [vmem:[%s2014_s1 + $0x338] sm:$0xff]  ;;  %v1382_v11 = vcombine.high %v101_v6, %v105_v7 }
  0x60   :  { %1177 = vmatpush1.bf16.msra.mxu1 %v1343_v8  ;;  %v118_v8 = vld [vmem:[%s2014_s1 + $0x318] sm:$0xff] }
  0x61   :  { %1178 = vmatprep.subr.bf16.mxu1 %v1336_v10  ;;  %v1389_v10 = vcombine.low %v109_v61, %v113_v62  ;;  %v1400_v12 = vcombine.high %v118_v8, %v122_v9  ;;  %v1399_v19 = vcombine.low %v118_v8, %v122_v9 }
  0x62   :  { %1097 = vmatpush1.bf16.msra.mxu0 %v1317_v14  ;;  %v97_v14 = vld [vmem:[%s2014_s1 + $0x270] sm:$0xff] }
  0x63   :  { %1098 = vmatprep.subr.bf16.mxu0 %v1310_v16  ;;  %v114_v16 = vld [vmem:[%s2014_s1 + $0x2f8] sm:$0xff]  ;;  %v1374_v20 = vcombine.high %v93_v13, %v97_v14 }
  0x64   :  { %1179 = vmatpush1.bf16.msra.mxu1 %v1335_v15  ;;  %v110_v15 = vld [vmem:[%s2014_s1 + $0x2d8] sm:$0xff] }
  0x65   :  { %1180 = vmatprep.subr.bf16.mxu1 %v1328_v18  ;;  %v1381_v18 = vcombine.low %v101_v6, %v105_v7  ;;  %v1392_v21 = vcombine.high %v110_v15, %v114_v16  ;;  %v1391_v28 = vcombine.low %v110_v15, %v114_v16 }
  0x66   :  { %1099 = vmatpush1.bf16.msra.mxu0 %v1309_v23  ;;  %v89_v23 = vld [vmem:[%s2014_s1 + $0x230] sm:$0xff] }
  0x67   :  { %1100 = vmatprep.subr.bf16.mxu0 %v1302_v25  ;;  %v106_v25 = vld [vmem:[%s2014_s1 + $0x2b8] sm:$0xff]  ;;  %v1366_v29 = vcombine.high %v85_v22, %v89_v23 }
  0x68   :  { %1181 = vmatpush1.bf16.msra.mxu1 %v1327_v24  ;;  %v102_v24 = vld [vmem:[%s2014_s1 + $0x298] sm:$0xff] }
  0x69   :  { %1182 = vmatprep.subr.bf16.mxu1 %v1320_v26  ;;  %v1373_v26 = vcombine.low %v93_v13, %v97_v14  ;;  %v1384_v30 = vcombine.high %v102_v24, %v106_v25  ;;  %v1383_v36 = vcombine.low %v102_v24, %v106_v25 }
  0x6a   :  { %1101 = vmatpush1.bf16.msra.mxu0 %v1301_v32  ;;  %v162_v32 = vld [vmem:[%s2014_s1 + $0x478] sm:$0xff] }
  0x6b   :  { %1102 = vmatprep.subr.bf16.mxu0 %v1422_v34  ;;  %v98_v34 = vld [vmem:[%s2014_s1 + $0x278] sm:$0xff]  ;;  %v1440_v37 = vcombine.high %v158_v31, %v162_v32 }
  0x6c   :  { %1183 = vmatpush1.bf16.msra.mxu1 %v1319_v33  ;;  %v94_v33 = vld [vmem:[%s2014_s1 + $0x258] sm:$0xff] }
  0x6d   :  { %1184 = vmatprep.subr.bf16.mxu1 %v1312_v35  ;;  %v1365_v35 = vcombine.low %v85_v22, %v89_v23  ;;  %v1376_v38 = vcombine.high %v94_v33, %v98_v34  ;;  %v1375_v44 = vcombine.low %v94_v33, %v98_v34 }
  0x6e   :  { %1103 = vmatpush2.bf16.msra.mxu0 %v1421_v40  ;;  %v154_v40 = vld [vmem:[%s2014_s1 + $0x438] sm:$0xff] }
  0x6f   :  { %1104 = vmatprep.subr.bf16.mxu0 %v1414_v42  ;;  %v90_v42 = vld [vmem:[%s2014_s1 + $0x238] sm:$0xff]  ;;  %v1432_v45 = vcombine.high %v150_v39, %v154_v40  ;;  %v1431_v47 = vcombine.low %v150_v39, %v154_v40 }
  0x70   :  { %1185 = vmatpush1.bf16.msra.mxu1 %v1311_v41  ;;  %v86_v41 = vld [vmem:[%s2014_s1 + $0x218] sm:$0xff] }
  0x71   :  { %1186 = vmatprep.subr.bf16.mxu1 %v1304_v43  ;;  %v1439_v43 = vcombine.low %v158_v31, %v162_v32  ;;  %v1368_v46 = vcombine.high %v86_v41, %v90_v42 }
  0x72   :  { %1105 = vmatpush2.bf16.msra.mxu0 %v1413_v48  ;;  %v1367_v48 = vcombine.low %v86_v41, %v90_v42 }
  0x73   :  { %1106 = vmatprep.subr.bf16.mxu0 %v1406_v50 }
  0x74   :  { %1187 = vmatpush1.bf16.msra.mxu1 %v1303_v49 }
  0x75   :  { %1188 = vmatprep.subr.bf16.mxu1 %v1424_v51 }
  0x76   :  { %1107 = vmatpush2.bf16.msra.mxu0 %v1405_v56 }
  0x77   :  { %1108 = vmatprep.subr.bf16.mxu0 %v1398_v58 }
  0x78   :  { %1189 = vmatpush2.bf16.msra.mxu1 %v1423_v57 }
  0x79   :  { %1190 = vmatprep.subr.bf16.mxu1 %v1416_v59 }
  0x7a   :  { %1109 = vmatpush2.bf16.msra.mxu0 %v1397_v1 }
  0x7b   :  { %1110 = vmatprep.subr.bf16.mxu0 %v1390_v4 }
  0x7c   :  { %1191 = vmatpush2.bf16.msra.mxu1 %v1415_v2 }
  0x7d   :  { %1192 = vmatprep.subr.bf16.mxu1 %v1408_v5 }
  0x7e   :  { %1111 = vmatpush2.bf16.msra.mxu0 %v1389_v10 }
  0x7f   :  { %1112 = vmatprep.subr.bf16.mxu0 %v1382_v11 }
  0x80   :  { %1193 = vmatpush2.bf16.msra.mxu1 %v1407_v60 }
  0x81   :  { %1194 = vmatprep.subr.bf16.mxu1 %v1400_v12 }
  0x82   :  { %1113 = vmatpush2.bf16.msra.mxu0 %v1381_v18 }
  0x83   :  { %1114 = vmatprep.subr.bf16.mxu0 %v1374_v20 }
  0x84   :  { %1195 = vmatpush2.bf16.msra.mxu1 %v1399_v19 }
  0x85   :  { %1196 = vmatprep.subr.bf16.mxu1 %v1392_v21 }
  0x86   :  { %1115 = vmatpush2.bf16.msra.mxu0 %v1373_v26 }
  0x87   :  { %1116 = vmatprep.subr.bf16.mxu0 %v1366_v29 }
  0x88   :  { %1197 = vmatpush2.bf16.msra.mxu1 %v1391_v28 }
  0x89   :  { %1198 = vmatprep.subr.bf16.mxu1 %v1384_v30 }
  0x8a   :  { %1117 = vmatpush2.bf16.msra.mxu0 %v1365_v35 }
  0x8b   :  { %1227 = vmatprep.subr.bf16.mxu0 %v1440_v37 }
  0x8c   :  { %1199 = vmatpush2.bf16.msra.mxu1 %v1383_v36 }
  0x8d   :  { %1200 = vmatprep.subr.bf16.mxu1 %v1376_v38  ;;  %1119 = vmatmul.mubr.bf16.vlgmr.msra.gmra.mxu0 %v1707_v17 }
  0x8e   :  { %1228 = vmatpush1.bf16.msra.mxu0 %v1439_v43  ;;  %1247 = vmatprep.mubr.bf16.mxu0 %v1451_v3 }
  0x8f   :  { %1229 = vmatprep.subr.bf16.mxu0 %v1432_v45 }
  0x90   :  { %1201 = vmatpush2.bf16.msra.mxu1 %v1375_v44 }
  0x91   :  { %1202 = vmatprep.subr.bf16.mxu1 %v1368_v46 }
  0x92   :  { %1230 = vmatpush1.bf16.msra.mxu0 %v1431_v47 }
  0x94   :  { %1203 = vmatpush2.bf16.msra.mxu1 %v1367_v48 }
  0x95   :  { %1444 = vmatmul.mubr.msk.bf16.vlgmr.msra.gmra.mxu0 %vm910_vm0, %v1525_v27 }
  0x97   :  { %1205 = vmatmul.mubr.bf16.vlgmr.msra.gmra.mxu1 %v1707_v17 }
  0x9e   :  { %v1946_v50 = vpop.permute.xlu0 %167 }
  0xa2   :  { %v1949_v3 = vpop.permute.xlu0 %172 }
  0xcf   :  { %v991_v49 = vpop.f32.mrf.mxu1 }
  0xd1   :  { %v993_v51 = vpop.f32.mrf.mxu1 }
  0xd3   :  { %v995_v55 = vpop.f32.mrf.mxu1 }
  0xd5   :  { %v997_v62 = vpop.f32.mrf.mxu1 }
 0x105   :  { %v948_v52 = vpop.f32.mrf.mxu0 }
 0x106   :  { %v949_v53 = vadd.f32 %v948_v52, %v1946_v50 }
 0x107   :  { %v950_v54 = vpop.f32.mrf.mxu0 }
 0x108   :  { %v992_v56 = vadd.f32 %v991_v49, %v949_v53  ;;  %v951_v57 = vadd.f32 %v950_v54, %v1946_v50 }
 0x109   :  { %v952_v58 = vpop.f32.mrf.mxu0 }
 0x10a   :  { %v1258_v59 = vmax.f32 %v992_v56, 0.0  ;;  %v994_v61 = vadd.f32 %v993_v51, %v951_v57  ;;  %v953_v27 = vadd.f32 %v952_v58, %v1949_v3 }
 0x10b   :  { %v954_v17 = vpop.f32.mrf.mxu0 }
 0x10c   :  { %1274 = vst [vmem:[%s2017_s3] sm:$0xff] %v1258_v59  ;;  %v1259_v63 = vmax.f32 %v994_v61, 0.0  ;;  %v996_v0 = vadd.f32 %v995_v55, %v953_v27  ;;  %v955_v1 = vadd.f32 %v954_v17, %v1949_v3 }
 0x10d   :  { %v1077_v2 = vpop.f32.mrf.mxu0 }
 0x10e   :  { %1275 = vst [vmem:[%s2017_s3 + $0x8] sm:$0xff] %v1259_v63  ;;  %v1266_v4 = vmax.f32 %v996_v0, 0.0  ;;  %v998_v5 = vadd.f32 %v997_v62, %v955_v1 }
 0x10f   :  { %v1034_v6 = vpop.f32.mrf.mxu1  ;;  %v1079_v8 = vpop.f32.mrf.mxu0 }
 0x110   :  { %v1035_v7 = vadd.f32 %v1034_v6, %v1946_v50  ;;  %1282 = vst [vmem:[%s2017_s3 + $0x40] sm:$0xff] %v1266_v4  ;;  %v1267_v9 = vmax.f32 %v998_v5, 0.0 }
 0x111   :  { %v1036_v10 = vpop.f32.mrf.mxu1  ;;  %v1081_v13 = vpop.f32.mrf.mxu0 }
 0x112   :  { %v1078_v60 = vadd.f32 %v1077_v2, %v1035_v7  ;;  %v1037_v11 = vadd.f32 %v1036_v10, %v1946_v50  ;;  %1283 = vst [vmem:[%s2017_s3 + $0x48] sm:$0xff] %v1267_v9 }
 0x113   :  { %v1038_v12 = vpop.f32.mrf.mxu1  ;;  %v1083_v22 = vpop.f32.mrf.mxu0 }
 0x114   :  { %v1260_v14 = vmax.f32 %v1078_v60, 0.0  ;;  %v1080_v15 = vadd.f32 %v1079_v8, %v1037_v11  ;;  %v1039_v16 = vadd.f32 %v1038_v12, %v1949_v3 }
 0x115   :  { %v1040_v18 = vpop.f32.mrf.mxu1 }
 0x116   :  { %1276 = vst [vmem:[%s2017_s3 + $0x10] sm:$0xff] %v1260_v14  ;;  %v1261_v19 = vmax.f32 %v1080_v15, 0.0  ;;  %v1082_v20 = vadd.f32 %v1081_v13, %v1039_v16  ;;  %v1041_v21 = vadd.f32 %v1040_v18, %v1949_v3 }
 0x117   :  { %v1163_v26 = vpop.f32.mrf.mxu1 }
 0x118   :  { %1277 = vst [vmem:[%s2017_s3 + $0x18] sm:$0xff] %v1261_v19  ;;  %v1268_v23 = vmax.f32 %v1082_v20, 0.0  ;;  %v1084_v24 = vadd.f32 %v1083_v22, %v1041_v21 }
 0x119   :  { %v1165_v28 = vpop.f32.mrf.mxu1 }
 0x11a   :  { %1284 = vst [vmem:[%s2017_s3 + $0x50] sm:$0xff] %v1268_v23  ;;  %v1269_v25 = vmax.f32 %v1084_v24, 0.0 }
 0x11b   :  { %v1167_v32 = vpop.f32.mrf.mxu1 }
 0x11c   :  { %1285 = vst [vmem:[%s2017_s3 + $0x58] sm:$0xff] %v1269_v25 }
 0x11d   :  { %v1169_v40 = vpop.f32.mrf.mxu1 }
 0x14d   :  { %v1120_v29 = vpop.f32.mrf.mxu0 }
 0x14e   :  { %v1121_v30 = vadd.f32 %v1120_v29, %v1946_v50 }
 0x14f   :  { %v1122_v31 = vpop.f32.mrf.mxu0 }
 0x150   :  { %v1164_v33 = vadd.f32 %v1163_v26, %v1121_v30  ;;  %v1123_v34 = vadd.f32 %v1122_v31, %v1946_v50 }
 0x151   :  { %v1124_v35 = vpop.f32.mrf.mxu0 }
 0x152   :  { %v1262_v36 = vmax.f32 %v1164_v33, 0.0  ;;  %v1166_v37 = vadd.f32 %v1165_v28, %v1123_v34  ;;  %v1125_v38 = vadd.f32 %v1124_v35, %v1949_v3 }
 0x153   :  { %v1126_v39 = vpop.f32.mrf.mxu0 }
 0x154   :  { %1278 = vst [vmem:[%s2017_s3 + $0x20] sm:$0xff] %v1262_v36  ;;  %v1263_v41 = vmax.f32 %v1166_v37, 0.0  ;;  %v1168_v42 = vadd.f32 %v1167_v32, %v1125_v38  ;;  %v1127_v43 = vadd.f32 %v1126_v39, %v1949_v3 }
 0x155   :  { %v1249_v44 = vpop.f32.mrf.mxu0 }
 0x156   :  { %1279 = vst [vmem:[%s2017_s3 + $0x28] sm:$0xff] %v1263_v41  ;;  %v1270_v45 = vmax.f32 %v1168_v42, 0.0  ;;  %v1170_v46 = vadd.f32 %v1169_v40, %v1127_v43 }
 0x157   :  { %v1206_v47 = vpop.f32.mrf.mxu1  ;;  %v1251_v49 = vpop.f32.mrf.mxu0 }
 0x158   :  { %v1207_v48 = vadd.f32 %v1206_v47, %v1946_v50  ;;  %1286 = vst [vmem:[%s2017_s3 + $0x60] sm:$0xff] %v1270_v45  ;;  %v1271_v51 = vmax.f32 %v1170_v46, 0.0 }
 0x159   :  { %v1208_v52 = vpop.f32.mrf.mxu1  ;;  %v1253_v56 = vpop.f32.mrf.mxu0 }
 0x15a   :  { %v1250_v53 = vadd.f32 %v1249_v44, %v1207_v48  ;;  %v1209_v54 = vadd.f32 %v1208_v52, %v1946_v50  ;;  %1287 = vst [vmem:[%s2017_s3 + $0x68] sm:$0xff] %v1271_v51 }
 0x15b   :  { %v1210_v55 = vpop.f32.mrf.mxu1  ;;  %v1255_v50 = vpop.f32.mrf.mxu0 }
 0x15c   :  { %v1264_v57 = vmax.f32 %v1250_v53, 0.0  ;;  %v1252_v58 = vadd.f32 %v1251_v49, %v1209_v54  ;;  %v1211_v59 = vadd.f32 %v1210_v55, %v1949_v3 }
 0x15d   :  { %v1212_v61 = vpop.f32.mrf.mxu1 }
 0x15e   :  { %1280 = vst [vmem:[%s2017_s3 + $0x30] sm:$0xff] %v1264_v57  ;;  %v1265_v27 = vmax.f32 %v1252_v58, 0.0  ;;  %v1254_v17 = vadd.f32 %v1253_v56, %v1211_v59  ;;  %v1213_v62 = vadd.f32 %v1212_v61, %v1949_v3 }
 0x160   :  { %1281 = vst [vmem:[%s2017_s3 + $0x38] sm:$0xff] %v1265_v27  ;;  %v1272_v63 = vmax.f32 %v1254_v17, 0.0  ;;  %v1256_v0 = vadd.f32 %v1255_v50, %v1213_v62 }
 0x162   :  { %1288 = vst [vmem:[%s2017_s3 + $0x70] sm:$0xff] %v1272_v63  ;;  %v1273_v1 = vmax.f32 %v1256_v0, 0.0 }
 0x164   :  { %1289 = vst [vmem:[%s2017_s3 + $0x78] sm:$0xff] %v1273_v1 }

// kernel: biogan_star_shaped_forward.12
= control target key start
LH: loop header
LB: loop body
LE: loop exit
PB: predicated region body
PF: predicated region fallthrough
CT: control target
= control target key end

     0   :  { %v797_v3 = vmov 0   ;;  %vm470_vm0 = vcmask 130048   ;;  %s1110_s1 = inlined_call_operand.vmem [shape: bf16[144,1024], index: 1, kind: input, shape index: {}]   ;;  %s1111_s0 = inlined_call_operand.vmem [shape: bf16[12,144], index: 0, kind: input, shape index: {}]   ;;  %s1112_s2 = inlined_call_operand.vmem [shape: f32[12,1], index: 2, kind: input, shape index: {}]   ;;  %s1113_s3 = inlined_call_operand.vmem [shape: f32[12,1024], index: 3, kind: output, shape index: {}]  }
   0x1   :  { %v73_v0 = vld [vmem:[%s1110_s1 + $0x1c0] sm:$0xff]  ;;  %v74_v2 = vld [vmem:[%s1110_s1 + $0x1c8] sm:$0xff]  ;;  %761 = vset.pattern.permute.xlu0 %v797_v3 }
   0x2   :  { %v77_v1 = vld [vmem:[%s1110_s1 + $0x1e0] sm:$0xff]  ;;  %v78_v5 = vld [vmem:[%s1110_s1 + $0x1e8] sm:$0xff] }
   0x3   :  { %v741_v4 = vcombine.high %v73_v0, %v77_v1  ;;  %v740_v6 = vcombine.low %v73_v0, %v77_v1  ;;  %v65_v7 = vld [vmem:[%s1110_s1 + $0x180] sm:$0xff]  ;;  %v743_v9 = vcombine.high %v74_v2, %v78_v5  ;;  %v742_v10 = vcombine.low %v74_v2, %v78_v5  ;;  %v66_v12 = vld [vmem:[%s1110_s1 + $0x188] sm:$0xff] }
   0x4   :  { %v69_v8 = vld [vmem:[%s1110_s1 + $0x1a0] sm:$0xff]  ;;  %v70_v13 = vld [vmem:[%s1110_s1 + $0x1a8] sm:$0xff] }
   0x5   :  { %v733_v11 = vcombine.high %v65_v7, %v69_v8  ;;  %v57_v14 = vld [vmem:[%s1110_s1 + $0x140] sm:$0xff]  ;;  %474 = vmatprep.subr.bf16.mxu0 %v741_v4  ;;  %v735_v15 = vcombine.high %v66_v12, %v70_v13  ;;  %v58_v17 = vld [vmem:[%s1110_s1 + $0x148] sm:$0xff]  ;;  %517 = vmatprep.subr.bf16.mxu1 %v743_v9  ;;  %v732_v19 = vcombine.low %v65_v7, %v69_v8 }
   0x6   :  { %v61_v16 = vld [vmem:[%s1110_s1 + $0x160] sm:$0xff]  ;;  %v62_v18 = vld [vmem:[%s1110_s1 + $0x168] sm:$0xff]  ;;  %475 = vmatpush1.bf16.msra.mxu0 %v740_v6  ;;  %518 = vmatpush1.bf16.msra.mxu1 %v742_v10  ;;  %v734_v20 = vcombine.low %v66_v12, %v70_v13  ;;  %v75_v10 = vld [vmem:[%s1110_s1 + $0x1d0] sm:$0xff] }
   0x7   :  { %476 = vmatprep.subr.bf16.mxu0 %v733_v11  ;;  %v725_v21 = vcombine.high %v57_v14, %v61_v16  ;;  %519 = vmatprep.subr.bf16.mxu1 %v735_v15  ;;  %v727_v22 = vcombine.high %v58_v17, %v62_v18  ;;  %v49_v23 = vld [vmem:[%s1110_s1 + $0x100] sm:$0xff]  ;;  %v50_v25 = vld [vmem:[%s1110_s1 + $0x108] sm:$0xff]  ;;  %v724_v27 = vcombine.low %v57_v14, %v61_v16  ;;  %v79_v11 = vld [vmem:[%s1110_s1 + $0x1f0] sm:$0xff] }
   0x8   :  { %v53_v24 = vld [vmem:[%s1110_s1 + $0x120] sm:$0xff]  ;;  %v54_v26 = vld [vmem:[%s1110_s1 + $0x128] sm:$0xff]  ;;  %v726_v28 = vcombine.low %v58_v17, %v62_v18  ;;  %v76_v12 = vld [vmem:[%s1110_s1 + $0x1d8] sm:$0xff]  ;;  %v745_v16 = vcombine.high %v75_v10, %v79_v11 }
   0x9   :  { %v717_v29 = vcombine.high %v49_v23, %v53_v24  ;;  %v719_v30 = vcombine.high %v50_v25, %v54_v26  ;;  %v41_v31 = vld [vmem:[%s1110_s1 + $0xc0] sm:$0xff]  ;;  %v42_v33 = vld [vmem:[%s1110_s1 + $0xc8] sm:$0xff]  ;;  %v716_v35 = vcombine.low %v49_v23, %v53_v24  ;;  %v718_v37 = vcombine.low %v50_v25, %v54_v26  ;;  %v80_v13 = vld [vmem:[%s1110_s1 + $0x1f8] sm:$0xff] }
   0xa   :  { %477 = vmatpush1.bf16.msra.mxu0 %v732_v19  ;;  %520 = vmatpush1.bf16.msra.mxu1 %v734_v20  ;;  %v45_v32 = vld [vmem:[%s1110_s1 + $0xe0] sm:$0xff]  ;;  %v46_v34 = vld [vmem:[%s1110_s1 + $0xe8] sm:$0xff]  ;;  %v747_v17 = vcombine.high %v76_v12, %v80_v13  ;;  %v67_v18 = vld [vmem:[%s1110_s1 + $0x190] sm:$0xff]  ;;  %v744_v23 = vcombine.low %v75_v10, %v79_v11  ;;  %v746_v24 = vcombine.low %v76_v12, %v80_v13 }
   0xb   :  { %478 = vmatprep.subr.bf16.mxu0 %v725_v21  ;;  %521 = vmatprep.subr.bf16.mxu1 %v727_v22  ;;  %v881_v36 = vld [vmem:[%s1111_s0 + $0x4] ss:$8 sps:$4 sm:$0x3f]   ;;  %v709_v38 = vcombine.high %v41_v31, %v45_v32  ;;  %v711_v39 = vcombine.high %v42_v33, %v46_v34  ;;  %v708_v44 = vcombine.low %v41_v31, %v45_v32  ;;  %v90_v5 = vld [vmem:[%s1112_s2 + $0x8] sm:$0xf]  ;;  %v71_v19 = vld [vmem:[%s1110_s1 + $0x1b0] sm:$0xff] }
   0xc   :  { %v33_v40 = vld [vmem:[%s1110_s1 + $0x80] sm:$0xff]  ;;  %756 = vmatprep.mubr.msk.bf16.mxu0 %vm470_vm0, %v881_v36  ;;  %v34_v42 = vld [vmem:[%s1110_s1 + $0x88] sm:$0xff]  ;;  %757 = vmatprep.mubr.msk.bf16.mxu1 %vm470_vm0, %v881_v36  ;;  %v710_v45 = vcombine.low %v42_v33, %v46_v34  ;;  %v68_v21 = vld [vmem:[%s1110_s1 + $0x198] sm:$0xff]  ;;  %v737_v25 = vcombine.high %v67_v18, %v71_v19  ;;  %v736_v31 = vcombine.low %v67_v18, %v71_v19 }
   0xd   :  { %v37_v41 = vld [vmem:[%s1110_s1 + $0xa0] sm:$0xff]  ;;  %v38_v43 = vld [vmem:[%s1110_s1 + $0xa8] sm:$0xff]  ;;  %v72_v22 = vld [vmem:[%s1110_s1 + $0x1b8] sm:$0xff] }
   0xe   :  { %479 = vmatpush1.bf16.msra.mxu0 %v724_v27  ;;  %522 = vmatpush1.bf16.msra.mxu1 %v726_v28  ;;  %v701_v46 = vcombine.high %v33_v40, %v37_v41  ;;  %v703_v47 = vcombine.high %v34_v42, %v38_v43  ;;  %v25_v48 = vld [vmem:[%s1110_s1 + $0x40] sm:$0xff]  ;;  %v26_v50 = vld [vmem:[%s1110_s1 + $0x48] sm:$0xff]  ;;  %v700_v52 = vcombine.low %v33_v40, %v37_v41  ;;  %v59_v27 = vld [vmem:[%s1110_s1 + $0x150] sm:$0xff] }
   0xf   :  { %480 = vmatprep.subr.bf16.mxu0 %v717_v29  ;;  %523 = vmatprep.subr.bf16.mxu1 %v719_v30  ;;  %v29_v49 = vld [vmem:[%s1110_s1 + $0x60] sm:$0xff]  ;;  %v30_v51 = vld [vmem:[%s1110_s1 + $0x68] sm:$0xff]  ;;  %v702_v53 = vcombine.low %v34_v42, %v38_v43  ;;  %v739_v26 = vcombine.high %v68_v21, %v72_v22  ;;  %v63_v28 = vld [vmem:[%s1110_s1 + $0x170] sm:$0xff]  ;;  %v738_v32 = vcombine.low %v68_v21, %v72_v22 }
  0x10   :  { %v693_v54 = vcombine.high %v25_v48, %v29_v49  ;;  %v695_v55 = vcombine.high %v26_v50, %v30_v51  ;;  %v17_v56 = vld [vmem:[%s1110_s1] sm:$0xff]  ;;  %v18_v58 = vld [vmem:[%s1110_s1 + $0x8] sm:$0xff]  ;;  %v692_v60 = vcombine.low %v25_v48, %v29_v49  ;;  %v694_v61 = vcombine.low %v26_v50, %v30_v51  ;;  %v60_v29 = vld [vmem:[%s1110_s1 + $0x158] sm:$0xff] }
  0x11   :  { %v21_v57 = vld [vmem:[%s1110_s1 + $0x20] sm:$0xff]  ;;  %v22_v59 = vld [vmem:[%s1110_s1 + $0x28] sm:$0xff]  ;;  %v64_v30 = vld [vmem:[%s1110_s1 + $0x178] sm:$0xff]  ;;  %v729_v33 = vcombine.high %v59_v27, %v63_v28  ;;  %v728_v40 = vcombine.low %v59_v27, %v63_v28 }
  0x12   :  { %481 = vmatpush1.bf16.msra.mxu0 %v716_v35  ;;  %524 = vmatpush1.bf16.msra.mxu1 %v718_v37  ;;  %v685_v62 = vcombine.high %v17_v56, %v21_v57  ;;  %v89_v63 = vld [vmem:[%s1112_s2] sm:$0xff]  ;;  %v687_v0 = vcombine.high %v18_v58, %v22_v59  ;;  %v82_v3 = vld [vmem:[%s1110_s1 + $0x208] sm:$0xff]  ;;  %v684_v6 = vcombine.low %v17_v56, %v21_v57  ;;  %v51_v35 = vld [vmem:[%s1110_s1 + $0x110] sm:$0xff] }
  0x13   :  { %482 = vmatprep.subr.bf16.mxu0 %v709_v38  ;;  %525 = vmatprep.subr.bf16.mxu1 %v711_v39  ;;  %v81_v1 = vld [vmem:[%s1110_s1 + $0x200] sm:$0xff]  ;;  %v86_v4 = vld [vmem:[%s1110_s1 + $0x228] sm:$0xff]  ;;  %v686_v7 = vcombine.low %v18_v58, %v22_v59  ;;  %v731_v34 = vcombine.high %v60_v29, %v64_v30  ;;  %v55_v37 = vld [vmem:[%s1110_s1 + $0x130] sm:$0xff]  ;;  %v730_v41 = vcombine.low %v60_v29, %v64_v30 }
  0x14   :  { %v85_v2 = vld [vmem:[%s1110_s1 + $0x220] sm:$0xff]  ;;  %93 = vperm.xlu0 %761, %v89_v63   ;;  %v751_v9 = vcombine.high %v82_v3, %v86_v4  ;;  %v750_v15 = vcombine.low %v82_v3, %v86_v4  ;;  %v52_v38 = vld [vmem:[%s1110_s1 + $0x118] sm:$0xff]  ;;  %v721_v42 = vcombine.high %v51_v35, %v55_v37  ;;  %v35_v51 = vld [vmem:[%s1110_s1 + $0x90] sm:$0xff] }
  0x15   :  { %v749_v8 = vcombine.high %v81_v1, %v85_v2  ;;  %v748_v14 = vcombine.low %v81_v1, %v85_v2  ;;  %v962_v20 = vld [vmem:[%s1111_s0] ss:$8 sps:$4 sm:$0x3f]   ;;  %v56_v39 = vld [vmem:[%s1110_s1 + $0x138] sm:$0xff]  ;;  %v27_v59 = vld [vmem:[%s1110_s1 + $0x50] sm:$0xff] }
  0x16   :  { %483 = vmatpush1.bf16.msra.mxu0 %v708_v44  ;;  %526 = vmatpush1.bf16.msra.mxu1 %v710_v45  ;;  %v723_v43 = vcombine.high %v52_v38, %v56_v39  ;;  %v43_v44 = vld [vmem:[%s1110_s1 + $0xd0] sm:$0xff]  ;;  %v722_v48 = vcombine.low %v52_v38, %v56_v39  ;;  %v84_v13 = vld [vmem:[%s1110_s1 + $0x218] sm:$0xff] }
  0x17   :  { %484 = vmatprep.subr.bf16.mxu0 %v701_v46  ;;  %527 = vmatprep.subr.bf16.mxu1 %v703_v47  ;;  %v47_v45 = vld [vmem:[%s1110_s1 + $0xf0] sm:$0xff]  ;;  %v48_v46 = vld [vmem:[%s1110_s1 + $0xf8] sm:$0xff]  ;;  %v720_v47 = vcombine.low %v51_v35, %v55_v37 }
  0x18   :  { %98 = vperm.xlu0 %761, %v90_v5   ;;  %v713_v49 = vcombine.high %v43_v44, %v47_v45  ;;  %v19_v3 = vld [vmem:[%s1110_s1 + $0x10] sm:$0xff]  ;;  %v20_v5 = vld [vmem:[%s1110_s1 + $0x18] sm:$0xff] }
  0x19   :  { %v23_v4 = vld [vmem:[%s1110_s1 + $0x30] sm:$0xff] }
  0x1a   :  { %485 = vmatpush1.bf16.msra.mxu0 %v700_v52  ;;  %528 = vmatpush1.bf16.msra.mxu1 %v702_v53  ;;  %v39_v52 = vld [vmem:[%s1110_s1 + $0xb0] sm:$0xff]  ;;  %v36_v53 = vld [vmem:[%s1110_s1 + $0x98] sm:$0xff] }
  0x1b   :  { %486 = vmatprep.subr.bf16.mxu0 %v693_v54  ;;  %529 = vmatprep.subr.bf16.mxu1 %v695_v55  ;;  %v40_v54 = vld [vmem:[%s1110_s1 + $0xb8] sm:$0xff]  ;;  %v712_v55 = vcombine.low %v43_v44, %v47_v45  ;;  %v705_v57 = vcombine.high %v35_v51, %v39_v52  ;;  %v704_v63 = vcombine.low %v35_v51, %v39_v52  ;;  %v83_v11 = vld [vmem:[%s1110_s1 + $0x210] sm:$0xff] }
  0x1c   :  { %v707_v58 = vcombine.high %v36_v53, %v40_v54  ;;  %v87_v12 = vld [vmem:[%s1110_s1 + $0x230] sm:$0xff] }
  0x1d   :  { %v752_v19 = vcombine.low %v83_v11, %v87_v12 }
  0x1e   :  { %487 = vmatpush1.bf16.msra.mxu0 %v692_v60  ;;  %530 = vmatpush1.bf16.msra.mxu1 %v694_v61  ;;  %v31_v60 = vld [vmem:[%s1110_s1 + $0x70] sm:$0xff]  ;;  %v28_v61 = vld [vmem:[%s1110_s1 + $0x58] sm:$0xff] }
  0x1f   :  { %488 = vmatprep.subr.bf16.mxu0 %v685_v62  ;;  %531 = vmatprep.subr.bf16.mxu1 %v687_v0  ;;  %v32_v62 = vld [vmem:[%s1110_s1 + $0x78] sm:$0xff]  ;;  %v706_v0 = vcombine.low %v36_v53, %v40_v54  ;;  %v697_v1 = vcombine.high %v27_v59, %v31_v60 }
  0x20   :  { %v699_v2 = vcombine.high %v28_v61, %v32_v62 }
  0x22   :  { %489 = vmatpush1.bf16.msra.mxu0 %v684_v6  ;;  %532 = vmatpush1.bf16.msra.mxu1 %v686_v7  ;;  %v24_v6 = vld [vmem:[%s1110_s1 + $0x38] sm:$0xff]  ;;  %v696_v7 = vcombine.low %v27_v59, %v31_v60 }
  0x23   :  { %504 = vmatprep.subr.bf16.mxu0 %v749_v8  ;;  %547 = vmatprep.subr.bf16.mxu1 %v751_v9  ;;  %v698_v8 = vcombine.low %v28_v61, %v32_v62  ;;  %v689_v9 = vcombine.high %v19_v3, %v23_v4  ;;  %v691_v10 = vcombine.high %v20_v5, %v24_v6 }
  0x26   :  { %505 = vmatpush2.bf16.msra.mxu0 %v748_v14  ;;  %548 = vmatpush2.bf16.msra.mxu1 %v750_v15  ;;  %v88_v14 = vld [vmem:[%s1110_s1 + $0x238] sm:$0xff]  ;;  %v688_v15 = vcombine.low %v19_v3, %v23_v4 }
  0x27   :  { %560 = vmatprep.subr.bf16.mxu0 %v745_v16  ;;  %603 = vmatprep.subr.bf16.mxu1 %v747_v17  ;;  %v690_v16 = vcombine.low %v20_v5, %v24_v6  ;;  %v753_v17 = vcombine.high %v83_v11, %v87_v12  ;;  %v755_v18 = vcombine.high %v84_v13, %v88_v14 }
  0x28   :  { %v754_v21 = vcombine.low %v84_v13, %v88_v14 }
  0x29   :  { %507 = vmatmul.mubr.bf16.vlgmr.msra.gmra.mxu0 %v962_v20  ;;  %550 = vmatmul.mubr.bf16.vlgmr.msra.gmra.mxu1 %v962_v20 }
  0x2a   :  { %561 = vmatpush1.bf16.msra.mxu0 %v744_v23  ;;  %604 = vmatpush1.bf16.msra.mxu1 %v746_v24 }
  0x2b   :  { %562 = vmatprep.subr.bf16.mxu0 %v737_v25  ;;  %605 = vmatprep.subr.bf16.mxu1 %v739_v26 }
  0x2c   :  { %758 = vmatprep.mubr.msk.bf16.mxu0 %vm470_vm0, %v881_v36  ;;  %759 = vmatprep.mubr.msk.bf16.mxu1 %vm470_vm0, %v881_v36  ;;  %v44_v36 = vld [vmem:[%s1110_s1 + $0xd8] sm:$0xff] }
  0x2d   :  { %v715_v50 = vcombine.high %v44_v36, %v48_v46  ;;  %v714_v56 = vcombine.low %v44_v36, %v48_v46 }
  0x2e   :  { %563 = vmatpush1.bf16.msra.mxu0 %v736_v31  ;;  %606 = vmatpush1.bf16.msra.mxu1 %v738_v32 }
  0x2f   :  { %564 = vmatprep.subr.bf16.mxu0 %v729_v33  ;;  %607 = vmatprep.subr.bf16.mxu1 %v731_v34 }
  0x32   :  { %565 = vmatpush1.bf16.msra.mxu0 %v728_v40  ;;  %608 = vmatpush1.bf16.msra.mxu1 %v730_v41 }
  0x33   :  { %566 = vmatprep.subr.bf16.mxu0 %v721_v42  ;;  %609 = vmatprep.subr.bf16.mxu1 %v723_v43 }
  0x36   :  { %567 = vmatpush1.bf16.msra.mxu0 %v720_v47  ;;  %610 = vmatpush1.bf16.msra.mxu1 %v722_v48 }
  0x37   :  { %568 = vmatprep.subr.bf16.mxu0 %v713_v49  ;;  %611 = vmatprep.subr.bf16.mxu1 %v715_v50 }
  0x3a   :  { %569 = vmatpush1.bf16.msra.mxu0 %v712_v55  ;;  %612 = vmatpush1.bf16.msra.mxu1 %v714_v56 }
  0x3b   :  { %570 = vmatprep.subr.bf16.mxu0 %v705_v57  ;;  %613 = vmatprep.subr.bf16.mxu1 %v707_v58 }
  0x3e   :  { %571 = vmatpush1.bf16.msra.mxu0 %v704_v63  ;;  %614 = vmatpush1.bf16.msra.mxu1 %v706_v0 }
  0x3f   :  { %572 = vmatprep.subr.bf16.mxu0 %v697_v1  ;;  %615 = vmatprep.subr.bf16.mxu1 %v699_v2 }
  0x42   :  { %573 = vmatpush1.bf16.msra.mxu0 %v696_v7  ;;  %616 = vmatpush1.bf16.msra.mxu1 %v698_v8 }
  0x43   :  { %574 = vmatprep.subr.bf16.mxu0 %v689_v9  ;;  %617 = vmatprep.subr.bf16.mxu1 %v691_v10 }
  0x46   :  { %575 = vmatpush1.bf16.msra.mxu0 %v688_v15  ;;  %618 = vmatpush1.bf16.msra.mxu1 %v690_v16 }
  0x47   :  { %590 = vmatprep.subr.bf16.mxu0 %v753_v17  ;;  %633 = vmatprep.subr.bf16.mxu1 %v755_v18 }
  0x4a   :  { %591 = vmatpush2.bf16.msra.mxu0 %v752_v19  ;;  %634 = vmatpush2.bf16.msra.mxu1 %v754_v21 }
  0x4d   :  { %593 = vmatmul.mubr.bf16.vlgmr.msra.gmra.mxu0 %v962_v20  ;;  %636 = vmatmul.mubr.bf16.vlgmr.msra.gmra.mxu1 %v962_v20 }
  0x8f   :  { %v94_v22 = vpop.permute.xlu0 %93 }
  0x93   :  { %v99_v28 = vpop.permute.xlu0 %98 }
  0xe9   :  { %v508_v23 = vpop.f32.mrf.mxu0  ;;  %v551_v25 = vpop.f32.mrf.mxu1 }
  0xea   :  { %v509_v24 = vadd.f32 %v508_v23, %v94_v22  ;;  %v552_v26 = vadd.f32 %v551_v25, %v94_v22 }
  0xeb   :  { %v510_v27 = vpop.f32.mrf.mxu0  ;;  %v553_v30 = vpop.f32.mrf.mxu1 }
  0xec   :  { %765 = vtanh.f32 %v509_v24  ;;  %v511_v29 = vadd.f32 %v510_v27, %v94_v22  ;;  %v554_v31 = vadd.f32 %v553_v30, %v94_v22 }
  0xed   :  { %767 = vtanh.f32 %v552_v26  ;;  %v512_v32 = vpop.f32.mrf.mxu0  ;;  %v555_v34 = vpop.f32.mrf.mxu1 }
  0xee   :  { %769 = vtanh.f32 %v511_v29  ;;  %v513_v33 = vadd.f32 %v512_v32, %v99_v28  ;;  %v556_v35 = vadd.f32 %v555_v34, %v99_v28 }
  0xef   :  { %771 = vtanh.f32 %v554_v31  ;;  %v514_v37 = vpop.f32.mrf.mxu0  ;;  %v557_v38 = vpop.f32.mrf.mxu1 }
  0xf0   :  { %773 = vtanh.f32 %v513_v33  ;;  %v515_v20 = vadd.f32 %v514_v37, %v99_v28  ;;  %v558_v39 = vadd.f32 %v557_v38, %v99_v28 }
  0xf1   :  { %775 = vtanh.f32 %v556_v35 }
  0xf2   :  { %777 = vtanh.f32 %v515_v20 }
  0xf3   :  { %779 = vtanh.f32 %v558_v39 }
  0xf9   :  { %v766_v40 = vpop.eup %765 }
  0xfa   :  { %v768_v41 = vpop.eup %767  ;;  %662 = vst [vmem:[%s1113_s3] sm:$0xff] %v766_v40 }
  0xfb   :  { %v770_v42 = vpop.eup %769  ;;  %664 = vst [vmem:[%s1113_s3 + $0x10] sm:$0xff] %v768_v41 }
  0xfc   :  { %v772_v43 = vpop.eup %771  ;;  %663 = vst [vmem:[%s1113_s3 + $0x8] sm:$0xff] %v770_v42 }
  0xfd   :  { %v774_v44 = vpop.eup %773  ;;  %665 = vst [vmem:[%s1113_s3 + $0x18] sm:$0xff] %v772_v43 }
  0xfe   :  { %v776_v45 = vpop.eup %775  ;;  %670 = vst [vmem:[%s1113_s3 + $0x40] sm:$0xf] %v774_v44 }
  0xff   :  { %v778_v36 = vpop.eup %777  ;;  %672 = vst [vmem:[%s1113_s3 + $0x50] sm:$0xf] %v776_v45 }
 0x100   :  { %v780_v46 = vpop.eup %779  ;;  %671 = vst [vmem:[%s1113_s3 + $0x48] sm:$0xf] %v778_v36 }
 0x101   :  { %673 = vst [vmem:[%s1113_s3 + $0x58] sm:$0xf] %v780_v46 }
 0x10d   :  { %v594_v47 = vpop.f32.mrf.mxu0  ;;  %v637_v49 = vpop.f32.mrf.mxu1 }
 0x10e   :  { %v595_v48 = vadd.f32 %v594_v47, %v94_v22  ;;  %v638_v50 = vadd.f32 %v637_v49, %v94_v22 }
 0x10f   :  { %v596_v51 = vpop.f32.mrf.mxu0  ;;  %v639_v53 = vpop.f32.mrf.mxu1 }
 0x110   :  { %781 = vtanh.f32 %v595_v48  ;;  %v597_v52 = vadd.f32 %v596_v51, %v94_v22  ;;  %v640_v54 = vadd.f32 %v639_v53, %v94_v22 }
 0x111   :  { %783 = vtanh.f32 %v638_v50  ;;  %v598_v55 = vpop.f32.mrf.mxu0  ;;  %v641_v57 = vpop.f32.mrf.mxu1 }
 0x112   :  { %785 = vtanh.f32 %v597_v52  ;;  %v599_v56 = vadd.f32 %v598_v55, %v99_v28  ;;  %v642_v58 = vadd.f32 %v641_v57, %v99_v28 }
 0x113   :  { %787 = vtanh.f32 %v640_v54  ;;  %v600_v59 = vpop.f32.mrf.mxu0  ;;  %v643_v61 = vpop.f32.mrf.mxu1 }
 0x114   :  { %789 = vtanh.f32 %v599_v56  ;;  %v601_v60 = vadd.f32 %v600_v59, %v99_v28  ;;  %v644_v62 = vadd.f32 %v643_v61, %v99_v28 }
 0x115   :  { %791 = vtanh.f32 %v642_v58 }
 0x116   :  { %793 = vtanh.f32 %v601_v60 }
 0x117   :  { %795 = vtanh.f32 %v644_v62 }
 0x11d   :  { %v782_v63 = vpop.eup %781 }
 0x11e   :  { %v784_v0 = vpop.eup %783  ;;  %666 = vst [vmem:[%s1113_s3 + $0x20] sm:$0xff] %v782_v63 }
 0x11f   :  { %v786_v1 = vpop.eup %785  ;;  %668 = vst [vmem:[%s1113_s3 + $0x30] sm:$0xff] %v784_v0 }
 0x120   :  { %v788_v2 = vpop.eup %787  ;;  %667 = vst [vmem:[%s1113_s3 + $0x28] sm:$0xff] %v786_v1 }
 0x121   :  { %v790_v3 = vpop.eup %789  ;;  %669 = vst [vmem:[%s1113_s3 + $0x38] sm:$0xff] %v788_v2 }
 0x122   :  { %v792_v4 = vpop.eup %791  ;;  %674 = vst [vmem:[%s1113_s3 + $0x60] sm:$0xf] %v790_v3 }
 0x123   :  { %v794_v5 = vpop.eup %793  ;;  %676 = vst [vmem:[%s1113_s3 + $0x70] sm:$0xf] %v792_v4 }
 0x124   :  { %v796_v6 = vpop.eup %795  ;;  %675 = vst [vmem:[%s1113_s3 + $0x68] sm:$0xf] %v794_v5 }
 0x125   :  { %677 = vst [vmem:[%s1113_s3 + $0x78] sm:$0xf] %v796_v6 }

// kernel: biogan_star_shaped_forward.13
= control target key start
LH: loop header
LB: loop body
LE: loop exit
PB: predicated region body
PF: predicated region fallthrough
CT: control target
= control target key end

     0   :  { %s551_s12 = smov 0   ;;  %s588_s0 = inlined_call_operand.vmem [shape: bf16[6,16,18], index: 0, kind: input, shape index: {}]   ;;  %s589_s1 = inlined_call_operand.vmem [shape: bf16[6,18,384], index: 1, kind: input, shape index: {}]   ;;  %s590_s2 = inlined_call_operand.vmem [shape: f32[6,16,1], index: 2, kind: input, shape index: {}]   ;;  %s591_s3 = inlined_call_operand.vmem [shape: f32[6,16,384], index: 3, kind: output, shape index: {}]  }
   0x1 LB: > { %s462_s13 = sadd.s32 4294967295, %s526_s12   ;;  %p466_p0 = scmp.ge.s32.totalorder %s526_s12, 1  ;;  %s526_s12 = sphi %s551_s12, %s13_s12  }
   0x2   : > { %p157_p1 = scmp.lt.s32.totalorder %s526_s12, 7 }
   0x4   : > { %p158_p2 = pnand %p466_p0, %p157_p1 }
   0x5   : > { %p191_p3 = scmp.lt.s32.totalorder (!%p158_p2), %s462_s13, 5 }
   0x6   : > { %161 = sbr.rel (%p158_p2) target bundleno = 231 (0xe7), region = 32 }
   0xb   : > { %v528_v0 = vmov 0.0   ;;  %v529_v1 = vmov 0   ;;  %s593_s13 = smov (!%p191_p3, %s462_s13), 5  ;;  %vm530_vm0 = vmmov 0   ;;  %vm265_vm1 = vcmask 1040384  }
   0xc   : > { %490 = vmatprep.subr.bf16.mxu1 %v528_v0  ;;  %307 = vmatprep.mubr.bf16.mxu0 %v529_v1  ;;  %s498_s14 = smul.u32 36, %s593_s13  ;;  %s485_s15 = sshll.u32 %s593_s13, 3  ;;  %vm261_vm2 = vcmask 146432  }
   0xd   : > { %494 = vmatprep.mubr.msk.bf16.mxu1 %vm530_vm0, %v528_v0  ;;  %511 = vset.pattern.permute.xlu0 %v529_v1  ;;  %s195_s18 = scalar_lea.vmem %s588_s0, %s485_s15  ;;  %s486_s19 = sshll.u32 %s593_s13, 4 }
   0xe   : > { %s200_s22 = scalar_lea.vmem %s589_s1, %s498_s14  ;;  %s205_s25 = scalar_lea.vmem %s590_s2, %s486_s19  ;;  %v519_v12 = vld [vmem:[%s195_s18] sm:$0xff]  }
   0xf   : > { %v218_v2 = vld [vmem:[%s200_s22 + $0x18] sm:$0x11]  ;;  %v514_v5 = vld [vmem:[%s200_s22 + $0x20] ss:$0 sps:$4 sm:$0x11]   ;;  %v221_v13 = vld [vmem:[%s205_s25 + $0x8] sm:$0xff] }
  0x10   : > { %v478_v3 = vcombine.high %v218_v2, %v218_v2  ;;  %v477_v4 = vcombine.low %v218_v2, %v218_v2  ;;  %v515_v6 = vld [vmem:[%s200_s22 + $0x4] ss:$12 sps:$4 sm:$0xff]   ;;  %v273_v8 = vsel %vm265_vm1, %v514_v5, 0  ;;  %v517_v10 = vld [vmem:[%s200_s22] ss:$12 sps:$4 sm:$0xff]   ;;  %s499_s26 = smul.u32 48, %s593_s13 }
  0x11   : > { %v220_v9 = vld [vmem:[%s205_s25] sm:$0xff]  ;;  %491 = vmatpush3.bf16.msra.mxu1 %v273_v8  ;;  %v518_v11 = vld [vmem:[%s200_s22 + $0x8] ss:$12 sps:$4 sm:$0xff]  }
  0x12   : > { %480 = vmatprep.subr.msk.bf16.mxu0 %vm265_vm1, %v478_v3  ;;  %v267_v7 = vsel %vm265_vm1, %v477_v4, 0  ;;  %492 = vmatprep.subr.bf16.mxu1 %v528_v0  ;;  %s577_s29 = scalar_lea.vmem %s591_s3, %s499_s26 }
  0x13   : > { %288 = vmatpush1.bf16.msra.mxu0 %v267_v7  ;;  %224 = vperm.xlu0 %511, %v220_v9  }
  0x14   : > { %289 = vmatprep.subr.bf16.mxu0 %v515_v6 }
  0x15   : > { %493 = vmatpush3.bf16.msra.mxu1 %v518_v11 }
  0x17   : > { %290 = vmatpush1.bf16.msra.mxu0 %v517_v10  ;;  %229 = vperm.xlu0 %511, %v221_v13  }
  0x18   : > { %495 = vmatmul.mubr.msk.bf16.vlgmr.msra.gmra.mxu1 %vm261_vm2, %v519_v12 }
  0x1a   : > { %481 = vmatmul.mubr.msk.bf16.vlgmr.msra.gmra.mxu0 %vm261_vm2, %v519_v12 }
  0x8e   : > { %v225_v14 = vpop.permute.xlu0 %224 }
  0x92   : > { %v230_v19 = vpop.permute.xlu0 %229 }
  0xd8   : > { %v352_v16 = vpop.f32.mrf.mxu1 }
  0xd9   : > { %v353_v18 = vadd.f32 %v352_v16, %v225_v14 }
  0xda   : > { %v309_v15 = vpop.f32.mrf.mxu0  ;;  %v496_v21 = vpop.f32.mrf.mxu1 }
  0xdb   : > { %v310_v17 = vadd.f32 %v309_v15, %v225_v14  ;;  %vm361_vm4 = vcmp.gt.f32.partialorder %v353_v18, 0.0  ;;  %v367_v23 = vmul.f32 0.2, %v353_v18 }
  0xdc   : > { %v311_v20 = vpop.f32.mrf.mxu0  ;;  %v355_v26 = vpop.f32.mrf.mxu1 }
  0xdd   : > { %vm359_vm3 = vcmp.gt.f32.partialorder %v310_v17, 0.0  ;;  %v365_v22 = vmul.f32 0.2, %v310_v17  ;;  %v312_v24 = vadd.f32 %v311_v20, %v225_v14  ;;  %v373_v28 = vsel %vm361_vm4, %v353_v18, %v367_v23 }
  0xde   : > { %v313_v25 = vpop.f32.mrf.mxu0  ;;  %v356_v30 = vadd.f32 %v355_v26, %v230_v19  ;;  %379 = vst [vmem:[%s577_s29 + $0x10] sm:$0xff] %v373_v28  ;;  %v497_v33 = vpop.f32.mrf.mxu1 }
  0xdf   : > { %v371_v27 = vsel %vm359_vm3, %v310_v17, %v365_v22  ;;  %v314_v29 = vadd.f32 %v313_v25, %v230_v19  ;;  %vm360_vm5 = vcmp.gt.f32.partialorder %v312_v24, 0.0  ;;  %v366_v31 = vmul.f32 0.2, %v312_v24 }
  0xe0   : > { %377 = vst [vmem:[%s577_s29] sm:$0xff] %v371_v27  ;;  %v315_v32 = vpop.f32.mrf.mxu0  ;;  %vm364_vm7 = vcmp.gt.f32.partialorder %v356_v30, 0.0  ;;  %v370_v35 = vmul.f32 0.2, %v356_v30 }
  0xe1   : > { %vm362_vm6 = vcmp.gt.f32.partialorder %v314_v29, 0.0  ;;  %v368_v34 = vmul.f32 0.2, %v314_v29  ;;  %v372_v36 = vsel %vm360_vm5, %v312_v24, %v366_v31  ;;  %v316_v37 = vadd.f32 %v315_v32, %v230_v19 }
  0xe2   : > { %378 = vst [vmem:[%s577_s29 + $0x8] sm:$0xff] %v372_v36  ;;  %v376_v39 = vsel %vm364_vm7, %v356_v30, %v370_v35 }
  0xe3   : > { %v374_v38 = vsel %vm362_vm6, %v314_v29, %v368_v34  ;;  %382 = vst [vmem:[%s577_s29 + $0x28] sm:$0xff] %v376_v39  ;;  %vm363_vm8 = vcmp.gt.f32.partialorder %v316_v37, 0.0  ;;  %v369_v40 = vmul.f32 0.2, %v316_v37 }
  0xe4   : > { %380 = vst [vmem:[%s577_s29 + $0x18] sm:$0xff] %v374_v38 }
  0xe5   : > { %v375_v41 = vsel %vm363_vm8, %v316_v37, %v369_v40 }
  0xe6   : > { %381 = vst [vmem:[%s577_s29 + $0x20] sm:$0xff] %v375_v41 }
  0xe7 PF: > { %s13_s12 = sadd.s32 1, %s526_s12  }
  0xe8   : > { %p10_p4 = scmp.ge.s32.totalorder %s13_s12, 8  }
  0xea   :  { %12 = sbr.rel (!%p10_p4) target bundleno = 1 (0x1), region = 68 }

// kernel: biogan_star_shaped_forward.14
= control target key start
LH: loop header
LB: loop body
LE: loop exit
PB: predicated region body
PF: predicated region fallthrough
CT: control target
= control target key end

     0   :  { %s588_s12 = smov 0   ;;  %s657_s0 = inlined_call_operand.vmem [shape: bf16[6,32,144], index: 0, kind: input, shape index: {}]   ;;  %s658_s1 = inlined_call_operand.vmem [shape: bf16[6,144,96], index: 1, kind: input, shape index: {}]   ;;  %s659_s2 = inlined_call_operand.vmem [shape: f32[6,32,1], index: 2, kind: input, shape index: {}]   ;;  %s660_s3 = inlined_call_operand.vmem [shape: f32[6,32,96], index: 3, kind: output, shape index: {}]  }
   0x1 LB: > { %s482_s13 = sadd.s32 4294967295, %s565_s12   ;;  %p486_p0 = scmp.ge.s32.totalorder %s565_s12, 1  ;;  %s565_s12 = sphi %s588_s12, %s13_s12  }
   0x2   : > { %p157_p1 = scmp.lt.s32.totalorder %s565_s12, 7 }
   0x4   : > { %p158_p2 = pnand %p486_p0, %p157_p1 }
   0x5   : > { %p191_p3 = scmp.lt.s32.totalorder (!%p158_p2), %s482_s13, 5 }
   0x6   : > { %161 = sbr.rel (%p158_p2) target bundleno = 254 (0xfe), region = 32 }
   0xb   : > { %v567_v0 = vmov 0   ;;  %s662_s13 = smov (!%p191_p3, %s482_s13), 5  ;;  %vm330_vm0 = vcmask 130048   ;;  %vm398_vm1 = vcmask 785408  }
   0xc   : > { %337 = vmatprep.subr.bf16.mxu0 %v567_v0  ;;  %514 = vmatprep.subr.bf16.mxu1 %v567_v0  ;;  %s532_s14 = smul.u32 72, %s662_s13  ;;  %s600_s15 = sshll.u32 %s662_s13, 5 }
   0xd   : > { %543 = vset.pattern.permute.xlu1 %v567_v0  ;;  %542 = vset.pattern.permute.xlu0 %v567_v0  ;;  %s606_s18 = scalar_lea.vmem %s657_s0, %s600_s15  ;;  %s205_s24 = scalar_lea.vmem %s659_s2, %s600_s15 }
   0xe   : > { %s611_s21 = scalar_lea.vmem %s658_s1, %s532_s14  ;;  %v555_v4 = vld [vmem:[%s606_s18 + $0x4] ss:$8 sps:$4 sm:$0xff]   ;;  %v558_v6 = vld [vmem:[%s606_s18 + $0x14] ss:$8 sps:$4 sm:$0xff]   ;;  %v553_v16 = vld [vmem:[%s606_s18] ss:$8 sps:$4 sm:$0xff]   ;;  %s210_s27 = scalar_lea.vmem %s660_s3, %s600_s15 }
   0xf   : > { %v544_v1 = vld [vmem:[%s611_s21 + $0x38] sm:$0xff]   ;;  %v545_v2 = vld [vmem:[%s611_s21 + $0x30] sm:$0xff]   ;;  %v546_v3 = vld [vmem:[%s611_s21 + $0x28] sm:$0xff]   ;;  %507 = vmatprep.mubr.msk.bf16.mxu0 %vm330_vm0, %v555_v4  ;;  %508 = vmatprep.mubr.msk.bf16.mxu1 %vm330_vm0, %v558_v6 }
  0x10   : > { %338 = vmatpush1.bf16.msra.mxu0 %v544_v1  ;;  %523 = vmatpush1.bf16.msra.mxu1 %v544_v1  ;;  %v547_v5 = vld [vmem:[%s611_s21 + $0x20] sm:$0xff]   ;;  %v236_v7 = vld [vmem:[%s205_s24 + $0x10] sm:$0xff]  ;;  %v548_v9 = vld [vmem:[%s611_s21 + $0x18] sm:$0xff]  }
  0x11   : > { %339 = vmatprep.subr.bf16.mxu0 %v567_v0  ;;  %515 = vmatprep.subr.bf16.mxu1 %v567_v0  ;;  %v234_v8 = vld [vmem:[%s205_s24] sm:$0xff]  ;;  %v237_v10 = vld [vmem:[%s205_s24 + $0x18] sm:$0xff]  ;;  %v235_v11 = vld [vmem:[%s205_s24 + $0x8] sm:$0xff] }
  0x12   : > { %250 = vperm.xlu1 %543, %v236_v7   ;;  %240 = vperm.xlu0 %542, %v234_v8   ;;  %v549_v12 = vld [vmem:[%s611_s21 + $0x10] sm:$0xff]   ;;  %v550_v13 = vld [vmem:[%s611_s21 + $0x8] sm:$0xff]   ;;  %v551_v14 = vld [vmem:[%s611_s21] sm:$0xff]  }
  0x13   : > { %v552_v15 = vld [vmem:[%s611_s21 + $0x40] sm:$0xff]   ;;  %v556_v17 = vld [vmem:[%s606_s18 + $0x10] ss:$8 sps:$4 sm:$0xff]  }
  0x14   : > { %340 = vmatpush1.bf16.msra.mxu0 %v545_v2  ;;  %524 = vmatpush1.bf16.msra.mxu1 %v545_v2 }
  0x15   : > { %341 = vmatprep.subr.bf16.mxu0 %v567_v0  ;;  %516 = vmatprep.subr.bf16.mxu1 %v567_v0 }
  0x16   : > { %255 = vperm.xlu1 %543, %v237_v10   ;;  %245 = vperm.xlu0 %542, %v235_v11  }
  0x18   : > { %342 = vmatpush1.bf16.msra.mxu0 %v546_v3  ;;  %525 = vmatpush1.bf16.msra.mxu1 %v546_v3 }
  0x19   : > { %343 = vmatprep.subr.bf16.mxu0 %v567_v0  ;;  %517 = vmatprep.subr.bf16.mxu1 %v567_v0 }
  0x1c   : > { %344 = vmatpush1.bf16.msra.mxu0 %v547_v5  ;;  %526 = vmatpush1.bf16.msra.mxu1 %v547_v5 }
  0x1d   : > { %345 = vmatprep.subr.bf16.mxu0 %v567_v0  ;;  %518 = vmatprep.subr.bf16.mxu1 %v567_v0 }
  0x20   : > { %346 = vmatpush1.bf16.msra.mxu0 %v548_v9  ;;  %527 = vmatpush1.bf16.msra.mxu1 %v548_v9 }
  0x21   : > { %347 = vmatprep.subr.bf16.mxu0 %v567_v0  ;;  %519 = vmatprep.subr.bf16.mxu1 %v567_v0 }
  0x24   : > { %348 = vmatpush1.bf16.msra.mxu0 %v549_v12  ;;  %528 = vmatpush1.bf16.msra.mxu1 %v549_v12 }
  0x25   : > { %349 = vmatprep.subr.bf16.mxu0 %v567_v0  ;;  %520 = vmatprep.subr.bf16.mxu1 %v567_v0 }
  0x28   : > { %350 = vmatpush1.bf16.msra.mxu0 %v550_v13  ;;  %529 = vmatpush1.bf16.msra.mxu1 %v550_v13 }
  0x29   : > { %351 = vmatprep.subr.bf16.mxu0 %v567_v0  ;;  %521 = vmatprep.subr.bf16.mxu1 %v567_v0 }
  0x2c   : > { %352 = vmatpush1.bf16.msra.mxu0 %v551_v14  ;;  %530 = vmatpush1.bf16.msra.mxu1 %v551_v14 }
  0x2d   : > { %367 = vmatprep.subr.bf16.mxu0 %v567_v0  ;;  %522 = vmatprep.subr.bf16.mxu1 %v567_v0 }
  0x30   : > { %368 = vmatpush2.bf16.msra.mxu0 %v552_v15  ;;  %531 = vmatpush2.bf16.msra.mxu1 %v552_v15 }
  0x33   : > { %370 = vmatmul.mubr.bf16.vlgmr.msra.gmra.mxu0 %v553_v16  ;;  %378 = vmatmul.mubr.bf16.vlgmr.msra.gmra.mxu1 %v556_v17 }
  0x8d   : > { %v251_v18 = vpop.permute.xlu1 %250  ;;  %v241_v19 = vpop.permute.xlu0 %240 }
  0x91   : > { %v256_v26 = vpop.permute.xlu1 %255  ;;  %v246_v27 = vpop.permute.xlu0 %245 }
  0xf3   : > { %v371_v20 = vpop.f32.mrf.mxu0  ;;  %v379_v21 = vpop.f32.mrf.mxu1 }
  0xf4   : > { %v372_v22 = vadd.f32 %v371_v20, %v241_v19  ;;  %v380_v23 = vadd.f32 %v379_v21, %v251_v18 }
  0xf5   : > { %v373_v24 = vpop.f32.mrf.mxu0  ;;  %v381_v25 = vpop.f32.mrf.mxu1 }
  0xf6   : > { %vm386_vm2 = vcmp.gt.f32.partialorder %v372_v22, 0.0  ;;  %v390_v28 = vmul.f32 0.2, %v372_v22  ;;  %vm388_vm3 = vcmp.gt.f32.partialorder %v380_v23, 0.0  ;;  %v392_v29 = vmul.f32 0.2, %v380_v23 }
  0xf7   : > { %v374_v30 = vpop.f32.mrf.mxu0  ;;  %v382_v31 = vpop.f32.mrf.mxu1 }
  0xf8   : > { %v394_v32 = vsel %vm386_vm2, %v372_v22, %v390_v28  ;;  %v396_v33 = vsel %vm388_vm3, %v380_v23, %v392_v29  ;;  %v375_v34 = vadd.f32 %v374_v30, %v246_v27  ;;  %v383_v35 = vadd.f32 %v382_v31, %v256_v26 }
  0xf9   : > { %399 = vst.msk [vmem:[%s210_s27] sm:$0xff] %vm398_vm1, %v394_v32  ;;  %401 = vst.msk [vmem:[%s210_s27 + $0x10] sm:$0xff] %vm398_vm1, %v396_v33  ;;  %v376_v36 = vpop.f32.mrf.mxu0  ;;  %v384_v37 = vpop.f32.mrf.mxu1 }
  0xfa   : > { %vm387_vm4 = vcmp.gt.f32.partialorder %v375_v34, 0.0  ;;  %v391_v38 = vmul.f32 0.2, %v375_v34  ;;  %vm389_vm5 = vcmp.gt.f32.partialorder %v383_v35, 0.0  ;;  %v393_v39 = vmul.f32 0.2, %v383_v35 }
  0xfc   : > { %v395_v40 = vsel %vm387_vm4, %v375_v34, %v391_v38  ;;  %v397_v41 = vsel %vm389_vm5, %v383_v35, %v393_v39 }
  0xfd   : > { %400 = vst.msk [vmem:[%s210_s27 + $0x8] sm:$0xff] %vm398_vm1, %v395_v40  ;;  %402 = vst.msk [vmem:[%s210_s27 + $0x18] sm:$0xff] %vm398_vm1, %v397_v41 }
  0xfe PF: > { %s13_s12 = sadd.s32 1, %s565_s12  }
  0xff   : > { %p10_p4 = scmp.ge.s32.totalorder %s13_s12, 8  }
 0x101   :  { %12 = sbr.rel (!%p10_p4) target bundleno = 1 (0x1), region = 68 }

// kernel: biogan_star_shaped_forward.15
= control target key start
LH: loop header
LB: loop body
LE: loop exit
PB: predicated region body
PF: predicated region fallthrough
CT: control target
= control target key end

     0   :  { %10 = vsyncpa [#allocation3], 0  ;;  %s640_s0 = inlined_call_operand.vmem [shape: f32[6,6,512], index: 0, kind: input, shape index: {}]   ;;  %s641_s1 = inlined_call_operand.vmem [shape: f32[6,1,512], index: 1, kind: input, shape index: {}]   ;;  %s642_s2 = inlined_call_operand.vmem [shape: f32[6,1,1], index: 2, kind: input, shape index: {}]   ;;  %s643_s3 = inlined_call_operand.hbm [shape: f32[1,1], index: 3, kind: output, shape index: {0}]   ;;  %s644_s4 = inlined_call_operand.hbm [shape: f32[1,1], index: 4, kind: output, shape index: {1}]  }
   0x1   :  { %11 = vsyncpa [#allocation5], 0  ;;  %s572_s15 = smov 0  }
   0x2 LB: > { %s578_s16 = sadd.s32 4294967295, %s542_s15   ;;  %p434_p0 = scmp.ge.s32.totalorder %s542_s15, 1  ;;  %s542_s15 = sphi %s572_s15, %s17_s15  }
   0x3   : > { %p174_p1 = scmp.lt.s32.totalorder %s542_s15, 7 }
   0x5   : > { %p175_p2 = pnand %p434_p0, %p174_p1 }
   0x6   : > { %p202_p3 = scmp.lt.s32.totalorder (!%p175_p2), %s578_s16, 5  ;;  %p438_p4 = scmp.ne.s32.totalorder (!%p175_p2), %s578_s16, 0 }
   0x7   : > { %178 = sbr.rel (%p175_p2) target bundleno = 448 (0x1c0), region = 32 }
   0xc   : > { %s584_s17 = scalar_select %p202_p3, %s578_s16, 5 }
   0xd   : > { %217 = sbr.rel (%p438_p4) target bundleno = 20 (0x14), region = 36 }
   0xe   : > { %s446_s18 = sshll.u32 %s584_s17, 5  ;;  %s437_s19 = sshll.u32 %s584_s17, 2 }
   0xf   : > { %s206_s22 = scalar_lea.vmem %s640_s0, %s446_s18  ;;  %s210_s25 = scalar_lea.vmem %s641_s1, %s437_s19 }
  0x10   : > { %s213_s28 = scalar_lea.vmem %s642_s2, %s584_s17 }
  0x12   : > { %vm218_vm0 = vcmask 0   ;;  %v544_v0 = vmov 0.0  }
  0x13   : > { %219 = vst.msk [vmem:[#allocation2] sm:$0x1] %vm218_vm0, %v544_v0  ;;  %220 = vst.msk [vmem:[#allocation4] sm:$0x1] %vm218_vm0, %v544_v0 }
  0x14 PF: > { %v227_v1 = vlaneseq  ;;  %v225_v3 = vld [vmem:[%s210_s25] sm:$0xf]  ;;  %v222_v9 = vld [vmem:[%s206_s22 + $0x8] sm:$0x3f]  ;;  %v223_v10 = vld [vmem:[%s206_s22 + $0x10] sm:$0x3f] }
  0x15   : > { %v221_v4 = vld [vmem:[%s206_s22] sm:$0x3f]  ;;  %v224_v11 = vld [vmem:[%s206_s22 + $0x18] sm:$0x3f]  ;;  %vm251_vm1 = vcmask 1045504   ;;  %vm291_vm7 = vcmask 5120  }
  0x16   : > { %v599_v2 = vshrl.u32 %v227_v1, 7  ;;  %v439_v27 = vld [vmem:[%s213_s28] ss:$0 sm:$0xff]  ;;  %s545_s8 = smov [#allocation4]   ;;  %s546_s10 = smov [#allocation2]   ;;  %vm336_vm9 = vcmask 0  }
  0x17   : > { %s360_s9 = sshll.u32 %s545_s8, 4  ;;  %s349_s11 = sshll.u32 %s546_s10, 4  ;;  %s361_s9 = int_to_ptr.vmem [resolvable:$true] %s360_s9  ;;  %s350_s11 = int_to_ptr.vmem [resolvable:$true] %s349_s11 }
  0x18   : > { %v229_v5 = vsub.s32 0, %v599_v2  ;;  %v233_v6 = vsub.s32 1, %v599_v2  ;;  %v237_v7 = vsub.s32 2, %v599_v2  ;;  %v241_v8 = vsub.s32 3, %v599_v2  ;;  %p461_p5 = scmp.eq.s32.totalorder %s578_s16, 5  ;;  %s480_s12 = scalar_lea.vmem %s361_s9, 16 }
  0x19   : > { %vm303_vm2 = vcmp.ge.s32.totalorder %v599_v2, 2  ;;  %vm304_vm3 = vcmp.lt.s32.totalorder %v599_v2, 4  ;;  %vm289_vm6 = vcmp.lt.s32.totalorder %v599_v2, 2  ;;  %vm318_vm8 = vcmp.ge.s32.totalorder %v599_v2, 4  ;;  %p481_p6 = scmp.ne.s32.totalorder %s361_s9, %s480_s12  ;;  %s486_s13 = scalar_lea.vmem %s361_s9, 32 }
  0x1a   : > { %v230_v12 = vrot.slane %v225_v3, %v229_v5  ;;  %v234_v13 = vrot.slane %v225_v3, %v233_v6  ;;  %v238_v14 = vrot.slane %v225_v3, %v237_v7  ;;  %v242_v15 = vrot.slane %v225_v3, %v241_v8  ;;  %vm305_vm5 = vmand %vm303_vm2, %vm304_vm3  ;;  %p487_p9 = scmp.lt.s32.totalorder %s361_s9, %s361_s9  ;;  %p488_p10 = scmp.lt.s32.totalorder %s486_s13, %s480_s12 }
  0x1b   : > { %p482_p7 = pnand %p481_p6, %p461_p5 }
  0x1c   : > { %v247_v16 = vmul.f32 %v230_v12, %v221_v4  ;;  %v248_v17 = vmul.f32 %v234_v13, %v222_v9  ;;  %v249_v18 = vmul.f32 %v238_v14, %v223_v10  ;;  %v250_v19 = vmul.f32 %v242_v15, %v224_v11  ;;  %v338_v15 = vld [vmem:[#allocation4] sm:$0x1]  ;;  %p489_p11 = por %p488_p10, %p487_p9 }
  0x1d   : > { %p483_p8 = pneg %p482_p7 }
  0x1e   : > { %v252_v20 = vsel %vm251_vm1, %v247_v16, 0.0  ;;  %v253_v21 = vsel %vm251_vm1, %v248_v17, 0.0  ;;  %v255_v22 = vsel %vm251_vm1, %v249_v18, 0.0  ;;  %v257_v24 = vsel %vm251_vm1, %v250_v19, 0.0  ;;  %v331_v17 = vld [vmem:[#allocation2] sm:$0x1] }
  0x1f   : > { %v254_v23 = vadd.f32 %v253_v21, %v252_v20  ;;  %p490_p12 = pnand %p489_p11, %p483_p8 }
  0x21   : > { %v256_v25 = vadd.f32 %v255_v22, %v254_v23 }
  0x23   : > { %v258_v26 = vadd.f32 %v257_v24, %v256_v25 }
  0x25   : > { %259 = vadd.xlane.f32.xlu0 %v258_v26 }
  0xae   : > { %v260_v28 = vpop.xlane.xlu0 %259 }
  0xaf   : > { %v268_v29 = vadd.f32 %v439_v27, %v260_v28 }
  0xb1   : > { %v271_v30 = vand.u32 2147483647, %v268_v29  ;;  %v269_v37 = vsub.f32 0.0, %v268_v29  ;;  %v285_v42 = vmax.f32 %v268_v29, 0.0 }
  0xb3   : > { %v272_v31 = vsub.f32 0.0, %v271_v30  ;;  %v270_v43 = vmax.f32 %v269_v37, 0.0 }
  0xb5   : > { %v273_v32 = vmul.f32 1.442695, %v272_v31 }
  0xb7   : > { %476 = vpow2.f32 %v273_v32 }
  0xc4   : > { %v477_v33 = vpop.eup %476 }
  0xc5   : > { %v275_v34 = vadd.f32 1.0, %v477_v33  ;;  %v278_v35 = vmul.f32 -0.5, %v477_v33  ;;  %v281_v38 = vand.u32 2147483647, %v477_v33 }
  0xc7   : > { %478 = vlog2.f32 %v275_v34  ;;  %v279_v36 = vadd.f32 1.0, %v278_v35  ;;  %vm282_vm4 = vcmp.lt.f32.partialorder %v281_v38, 0.0004427343 }
  0xc9   : > { %v280_v41 = vmul.f32 %v477_v33, %v279_v36 }
  0xd4   : > { %v479_v39 = vpop.eup %478 }
  0xd5   : > { %v277_v40 = vmul.f32 0.6931472, %v479_v39 }
  0xd7   : > { %v283_v44 = vsel %vm282_vm4, %v280_v41, %v277_v40 }
  0xd8   : > { %v286_v45 = vadd.f32 %v285_v42, %v283_v44  ;;  %v284_v46 = vadd.f32 %v283_v44, %v270_v43 }
  0xda   : > { %v306_v47 = vsel %vm305_vm5, %v286_v45, 0.0  ;;  %v290_v48 = vsel %vm289_vm6, %v284_v46, 0.0  ;;  %v319_v51 = vsel %vm318_vm8, %v284_v46, 0.0 }
  0xdb   : > { %v307_v49 = vsel %vm291_vm7, %v306_v47, 0.0  ;;  %v292_v50 = vsel %vm291_vm7, %v290_v48, 0.0  ;;  %v320_v52 = vsel %vm291_vm7, %v319_v51, 0.0 }
  0xdc   : > { %308 = vadd.xlane.f32.xlu1 %v307_v49  ;;  %293 = vadd.xlane.f32.xlu0 %v292_v50 }
  0xe0   : > { %321 = vadd.xlane.f32.xlu1 %v320_v52 }
 0x165   : > { %v309_v53 = vpop.xlane.xlu1 %308  ;;  %v294_v54 = vpop.xlane.xlu0 %293 }
 0x166   : > { %v310_v55 = vrot.slane %v309_v53, 4  ;;  %v295_v56 = vrot.slane %v294_v54, 4 }
 0x168   : > { %v311_v57 = vadd.f32 %v310_v55, %v309_v53  ;;  %v296_v58 = vadd.f32 %v295_v56, %v294_v54 }
 0x169   : > { %v322_v59 = vpop.xlane.xlu1 %321 }
 0x16a   : > { %v312_v60 = vrot.slane %v311_v57, 2  ;;  %v297_v61 = vrot.slane %v296_v58, 2  ;;  %v323_v62 = vrot.slane %v322_v59, 4 }
 0x16c   : > { %v324_v63 = vadd.f32 %v323_v62, %v322_v59  ;;  %v298_v0 = vadd.f32 %v297_v61, %v296_v58  ;;  %v313_v1 = vadd.f32 %v312_v60, %v311_v57 }
 0x16e   : > { %v325_v2 = vrot.slane %v324_v63, 2  ;;  %v299_v3 = vrot.slane %v298_v0, 1  ;;  %v314_v4 = vrot.slane %v313_v1, 1 }
 0x170   : > { %v326_v5 = vadd.f32 %v325_v2, %v324_v63  ;;  %v300_v6 = vadd.f32 %v299_v3, %v298_v0  ;;  %v315_v7 = vadd.f32 %v314_v4, %v313_v1 }
 0x172   : > { %447 = vpush %v300_v6  ;;  %v327_v8 = vrot.slane %v326_v5, 1 }
 0x173   : > { %449 = vpush %v315_v7 }
 0x174   : > { %v328_v9 = vadd.f32 %v327_v8, %v326_v5 }
 0x176   : > { %451 = vpush %v328_v9 }
 0x1a3   : > { %s448_s5 = spop %447 }
 0x1a4   : > { %v302_v10 = vstv %s448_s5  ;;  %s450_s6 = spop %449 }
 0x1a5   : > { %v317_v11 = vstv %s450_s6 }
 0x1a6   : > { %v332_v12 = vadd.f32 %v317_v11, %v302_v10 }
 0x1a7   : > { %s452_s7 = spop %451 }
 0x1a8   : > { %v333_v13 = vmul.f32 0.5, %v332_v12  ;;  %v330_v14 = vstv %s452_s7 }
 0x1a9   : > { %v339_v16 = vmul.f32 0.083333336, %v330_v14 }
 0x1aa   : > { %v334_v18 = vmul.f32 0.083333336, %v333_v13 }
 0x1ab   : > { %v340_v19 = vadd.f32 %v339_v16, %v338_v15 }
 0x1ac   : > { %v335_v20 = vadd.f32 %v334_v18, %v331_v17 }
 0x1ad   : > { %341 = vst.msk [vmem:[#allocation4] sm:$0x1] %vm336_vm9, %v340_v19 }
 0x1ae   : > { %337 = vst.msk [vmem:[#allocation2] sm:$0x1] %vm336_vm9, %v335_v20 }
 0x1af   : > { %493 = shalt.err (!%p490_p12)
}
 0x1b0   : > { %456 = dma.vmem_to_hbm [thread:$0]  (%p461_p5), %s361_s9, 16, %s644_s4, [#allocation5]  }
 0x1b1   : > { %s504_s18 = scalar_lea.vmem %s350_s11, 16  ;;  %s510_s19 = scalar_lea.vmem %s350_s11, 32 }
 0x1b2   : > { %p505_p13 = scmp.ne.s32.totalorder %s350_s11, %s504_s18  ;;  %p511_p2 = scmp.lt.s32.totalorder %s350_s11, %s350_s11 }
 0x1b3   : > { %p512_p3 = scmp.lt.s32.totalorder %s510_s19, %s504_s18 }
 0x1b4   : > { %p506_p0 = pnand %p505_p13, %p461_p5 }
 0x1b5   : > { %p513_p4 = por %p512_p3, %p511_p2 }
 0x1b6   : > { %p507_p1 = pneg %p506_p0 }
 0x1b8   : > { %p514_p6 = pnand %p513_p4, %p507_p1 }
 0x1ba   : > { %517 = shalt.err (!%p514_p6)
}
 0x1bb   : > { %454 = dma.vmem_to_hbm [thread:$0]  (%p461_p5), %s350_s11, 16, %s643_s3, [#allocation3]  }
 0x1bc   : > { %533 = dma.done.wait (%p461_p5), [#allocation3], 16  }
 0x1bd   : > { %535 = vsyncadd (%p461_p5), [#allocation3], 4294967280 }
 0x1be   : > { %537 = dma.done.wait (%p461_p5), [#allocation5], 16  }
 0x1bf   : > { %539 = vsyncadd (%p461_p5), [#allocation5], 4294967280 }
 0x1c0 PF: > { %s17_s15 = sadd.s32 1, %s542_s15  }
 0x1c1   : > { %p14_p7 = scmp.ge.s32.totalorder %s17_s15, 8  }
 0x1c3   :  { %16 = sbr.rel (!%p14_p7) target bundleno = 2 (0x2), region = 77 }
 0x1c8   :  { %377 = vsyncpa [#allocation3], 1 }
 0x1c9   :  { %379 = vsyncpa [#allocation3 + $0x1], 1 }
 0x1ca   :  { %380 = vsyncpa [#allocation5], 1 }

</bundles_post_ra>
